<compile_context>
chip_gen: v5e
topology: v5e:2x2
jax: 0.10.0
libtpu: 0.0.40
codegen_flags: <defaults>
</compile_context>

<pallas_src>
import functools

import jax
import jax.numpy as jnp
from jax import lax
from jax.experimental import pallas as pl
from jax.experimental.pallas import tpu as pltpu


def _lstm_disc_kernel(emb_ref,                      # (TC*B, E)  bf16, time-major flat
                      wih0_ref, whh0_ref, b0_ref,   # (E,4H) bf16, (H,4H) bf16, (1,4H) f32
                      wih1_ref, whh1_ref, b1_ref,   # (H,4H) bf16, (H,4H) bf16, (1,4H) f32
                      wfc_ref, bfc_ref,             # (1,H) f32, (1,1) f32
                      logits_ref,                   # (B, TC)    f32, lane-dense
                      hn_ref, cn_ref,               # (2, B, H)  f32, resident state
                      pre_ref, hseq_ref,            # (TC,B,4H), (TC,B,H) f32 scratch
                      *, unroll):
    TC, B, H = hseq_ref.shape

    # hidden=None in the PyTorch forward -> zero initial state (first chunk only).
    @pl.when(pl.program_id(0) == 0)
    def _():
        hn_ref[...] = jnp.zeros_like(hn_ref)
        cn_ref[...] = jnp.zeros_like(cn_ref)

    # Load the small recurrent weights once per chunk.
    w_hh = (whh0_ref[...], whh1_ref[...])           # bf16 (H, 4H)

    def recurrence(layer):
        """Serial scan for one layer over the chunk.  pre_ref already holds the
        batched input projection; only h @ W_hh + gate math run per step."""
        whh = w_hh[layer]

        def step(t, carry):
            h = hn_ref[layer]                       # (B, H) f32
            c = cn_ref[layer]                       # (B, H) f32
            pre = pre_ref[t] + jnp.dot(h.astype(jnp.bfloat16), whh,
                                       preferred_element_type=jnp.float32)
            # Nonlinearities batched over the full 4H width (one EUP pass each),
            # then static (i, f, g, o) gate views in PyTorch order.
            sig = jax.nn.sigmoid(pre)
            tnh = jnp.tanh(pre)
            i_g = sig[:, 0 * H:1 * H]
            f_g = sig[:, 1 * H:2 * H]
            g_g = tnh[:, 2 * H:3 * H]
            o_g = sig[:, 3 * H:4 * H]
            c_new = f_g * c + i_g * g_g
            h_new = o_g * jnp.tanh(c_new)
            hn_ref[layer] = h_new
            cn_ref[layer] = c_new
            hseq_ref[t] = h_new                     # record the hidden sequence
            return carry

        lax.fori_loop(0, TC, step, 0, unroll=unroll)

    # -- Layer 0: one big MXU matmul for the whole chunk's input projection.
    pre0 = jnp.dot(emb_ref[...], wih0_ref[...],
                   preferred_element_type=jnp.float32) + b0_ref[...]
    pre_ref[...] = pre0.reshape(TC, B, 4 * H)       # tile-aligned (B padded to 8)
    recurrence(0)

    # -- Layer 1: batched input projection of the layer-0 hidden sequence.
    h0_flat = hseq_ref[...].reshape(TC * B, H).astype(jnp.bfloat16)
    pre1 = jnp.dot(h0_flat, wih1_ref[...],
                   preferred_element_type=jnp.float32) + b1_ref[...]
    pre_ref[...] = pre1.reshape(TC, B, 4 * H)
    recurrence(1)                                   # overwrites hseq with layer-1 h

    # -- fc head over the whole chunk: logits[b, t] = h1[t, b, :] . w_fc + b_fc.
    #    Lane reduction instead of a degenerate N=1 MXU matmul, then a single
    #    lane-dense (B, TC) store.
    logits_tb = jnp.sum(hseq_ref[...] * wfc_ref[...], axis=-1) + bfc_ref[...]
    logits_ref[...] = logits_tb.T


def _pick_t_chunk(t_total):
    # The logits output block is (B, T_CHUNK); its lane dim must be a multiple
    # of 128 or equal to T.  Prefer large chunks (more batched MXU work per
    # grid step) while streaming the sequence chunk-by-chunk.
    for cand in (512, 256, 128):
        if t_total % cand == 0:
            return cand
    return t_total


def init_params(key, vocab_size, embedding_dim, hidden_dim):
    """Deterministic parameter init mimicking the module's shapes."""
    E, H = embedding_dim, hidden_dim
    ks = jax.random.split(key, 12)
    bound = 1.0 / jnp.sqrt(jnp.float32(H))

    def u(k, shape):
        return jax.random.uniform(k, shape, jnp.float32, -bound, bound)

    params = {
        "embedding": jax.random.normal(ks[0], (vocab_size, E), jnp.float32),
        # nn.LSTM layer 0 (input size E)
        "weight_ih_l0": u(ks[1], (4 * H, E)),
        "weight_hh_l0": u(ks[2], (4 * H, H)),
        "bias_ih_l0": u(ks[3], (4 * H,)),
        "bias_hh_l0": u(ks[4], (4 * H,)),
        # nn.LSTM layer 1 (input size H)
        "weight_ih_l1": u(ks[5], (4 * H, H)),
        "weight_hh_l1": u(ks[6], (4 * H, H)),
        "bias_ih_l1": u(ks[7], (4 * H,)),
        "bias_hh_l1": u(ks[8], (4 * H,)),
        # nn.Linear(H, 1)
        "fc_weight": u(ks[9], (1, H)),
        "fc_bias": u(ks[10], (1,)),
    }
    return params


@jax.jit
def lstm_discriminator_forward(tokens, params):
    """tokens: (B, T) int32 -> (logits (B, T), (h_n, c_n) each (2, B, H))."""
    emb_table = params["embedding"]                       # (V, E)
    E = emb_table.shape[1]
    H = params["weight_hh_l0"].shape[1]
    B, T = tokens.shape
    B_pad = max(8, ((B + 7) // 8) * 8)                    # sublane-tile aligned batch

    # Embedding lookup (plain-JAX gather glue), padded batch, time-major and
    # flattened to (T*B_pad, E) so the kernel's layer-0 input projection is a
    # single well-shaped 2-D MXU matmul per chunk.
    embedded = jnp.take(emb_table, tokens, axis=0)        # (B, T, E)
    embedded = jnp.pad(embedded, ((0, B_pad - B), (0, 0), (0, 0)))
    emb_flat = (jnp.transpose(embedded, (1, 0, 2))        # (T, B_pad, E)
                .reshape(T * B_pad, E)
                .astype(jnp.bfloat16))

    # Weights pre-transposed to (in, 4H), ih+hh biases folded.  MXU operands in
    # bf16 (f32 accumulation in-kernel); biases and the fc head stay f32.
    wih0 = params["weight_ih_l0"].T.astype(jnp.bfloat16)  # (E, 4H)
    whh0 = params["weight_hh_l0"].T.astype(jnp.bfloat16)  # (H, 4H)
    b0 = (params["bias_ih_l0"] + params["bias_hh_l0"]).reshape(1, 4 * H)
    wih1 = params["weight_ih_l1"].T.astype(jnp.bfloat16)  # (H, 4H)
    whh1 = params["weight_hh_l1"].T.astype(jnp.bfloat16)  # (H, 4H)
    b1 = (params["bias_ih_l1"] + params["bias_hh_l1"]).reshape(1, 4 * H)
    wfc = params["fc_weight"].reshape(1, H)               # (1, H) f32
    bfc = params["fc_bias"].reshape(1, 1)                 # (1, 1) f32

    t_chunk = _pick_t_chunk(T)
    grid = (T // t_chunk,)
    unroll = True if t_chunk <= 32 else 8                 # full unroll for short chunks

    out_shapes = (
        jax.ShapeDtypeStruct((B_pad, T), jnp.float32),        # logits (batch-major)
        jax.ShapeDtypeStruct((2, B_pad, H), jnp.float32),     # h_n
        jax.ShapeDtypeStruct((2, B_pad, H), jnp.float32),     # c_n
    )
    in_specs = [
        pl.BlockSpec((t_chunk * B_pad, E), lambda t: (t, 0)),   # streamed embeddings
        pl.BlockSpec((E, 4 * H), lambda t: (0, 0)),             # resident weights
        pl.BlockSpec((H, 4 * H), lambda t: (0, 0)),
        pl.BlockSpec((1, 4 * H), lambda t: (0, 0)),
        pl.BlockSpec((H, 4 * H), lambda t: (0, 0)),
        pl.BlockSpec((H, 4 * H), lambda t: (0, 0)),
        pl.BlockSpec((1, 4 * H), lambda t: (0, 0)),
        pl.BlockSpec((1, H), lambda t: (0, 0)),
        pl.BlockSpec((1, 1), lambda t: (0, 0)),
    ]
    out_specs = [
        pl.BlockSpec((B_pad, t_chunk), lambda t: (0, t)),       # lane-dense logits
        pl.BlockSpec((2, B_pad, H), lambda t: (0, 0, 0)),       # resident h state
        pl.BlockSpec((2, B_pad, H), lambda t: (0, 0, 0)),       # resident c state
    ]
    scratch_shapes = [
        pltpu.VMEM((t_chunk, B_pad, 4 * H), jnp.float32),   # batched gate pre-acts
        pltpu.VMEM((t_chunk, B_pad, H), jnp.float32),       # hidden-state sequence
    ]

    # VMEM budget: double-buffered streamed blocks + resident weights/state +
    # scratch, with headroom for layout padding; capped below v7x's 64 MiB.
    lane = lambda n: ((n + 127) // 128) * 128
    est = (2 * (t_chunk * B_pad * lane(E) * 2 + B_pad * lane(t_chunk) * 4)
           + lane(4 * H) * (E + 3 * H) * 2
           + 4 * B_pad * lane(H) * 4
           + t_chunk * B_pad * (lane(4 * H) + lane(H)) * 4)
    vmem_limit = int(min(max(2 * est, 32 * 1024 * 1024), 56 * 1024 * 1024))

    cost = pl.CostEstimate(
        flops=2 * T * B_pad * 4 * H * (E + 3 * H) + 2 * T * B_pad * H,
        transcendentals=T * B_pad * 2 * (2 * 4 * H + H),
        bytes_accessed=(emb_flat.size * 2 + (E + 3 * H) * 4 * H * 2
                        + B_pad * T * 4 + 4 * B_pad * H * 4))

    logits_pad, h_n_pad, c_n_pad = pl.pallas_call(
        functools.partial(_lstm_disc_kernel, unroll=unroll),
        out_shape=out_shapes,
        grid_spec=pltpu.PrefetchScalarGridSpec(
            num_scalar_prefetch=0,
            grid=grid,
            in_specs=in_specs,
            out_specs=out_specs,
            scratch_shapes=scratch_shapes),
        compiler_params=pltpu.CompilerParams(
            dimension_semantics=("arbitrary",),      # serial recurrence over time
            vmem_limit_bytes=vmem_limit),
        cost_estimate=cost,
    )(emb_flat, wih0, whh0, b0, wih1, whh1, b1, wfc, bfc)

    # Drop batch padding; kernel logits are already (B, T) == batch_first layout.
    logits = logits_pad[:B]
    hidden = (h_n_pad[:, :B], c_n_pad[:, :B])
    return logits, hidden


def _reference_forward(tokens, params):
    """Pure-JAX f32 reference matching nn.LSTM(num_layers=2) + Linear(H,1)."""
    emb = jnp.take(params["embedding"], tokens, axis=0)   # (B, T, E)
    B = emb.shape[0]

    def lstm_layer(x_seq, wih, whh, bih, bhh):
        H = whh.shape[1]

        def cell(carry, x_t):
            h, c = carry
            pre = x_t @ wih.T + bih + h @ whh.T + bhh
            i = jax.nn.sigmoid(pre[:, 0 * H:1 * H])
            f = jax.nn.sigmoid(pre[:, 1 * H:2 * H])
            g = jnp.tanh(pre[:, 2 * H:3 * H])
            o = jax.nn.sigmoid(pre[:, 3 * H:4 * H])
            c_new = f * c + i * g
            h_new = o * jnp.tanh(c_new)
            return (h_new, c_new), h_new

        init = (jnp.zeros((B, H), jnp.float32), jnp.zeros((B, H), jnp.float32))
        (h_T, c_T), hs = lax.scan(cell, init, jnp.transpose(x_seq, (1, 0, 2)))
        return jnp.transpose(hs, (1, 0, 2)), h_T, c_T

    y0, h0, c0 = lstm_layer(emb, params["weight_ih_l0"], params["weight_hh_l0"],
                            params["bias_ih_l0"], params["bias_hh_l0"])
    y1, h1, c1 = lstm_layer(y0, params["weight_ih_l1"], params["weight_hh_l1"],
                            params["bias_ih_l1"], params["bias_hh_l1"])
    logits = jnp.squeeze(y1 @ params["fc_weight"].T + params["fc_bias"], -1)
    return logits, (jnp.stack([h0, h1]), jnp.stack([c0, c1]))


if __name__ == "__main__":
    vocab_size, embedding_dim, hidden_dim = 50, 32, 32
    batch, seq = 2, 8

    key = jax.random.PRNGKey(0)
    k_params, k_tokens = jax.random.split(key)
    params = init_params(k_params, vocab_size, embedding_dim, hidden_dim)
    tokens = jax.random.randint(k_tokens, (batch, seq), 0, vocab_size,
                                dtype=jnp.int32)

    logits, (h_n, c_n) = lstm_discriminator_forward(tokens, params)
    jax.block_until_ready((logits, h_n, c_n))

    assert logits.shape == (batch, seq)
    assert h_n.shape == (2, batch, hidden_dim)
    assert c_n.shape == (2, batch, hidden_dim)
    assert bool(jnp.all(jnp.isfinite(logits)))

    # Numerical check against the f32 pure-JAX reference (bf16 MXU operands in
    # the kernel -> loose tolerance).
    ref_logits, (ref_h, ref_c) = _reference_forward(tokens, params)
    err_l = float(jnp.max(jnp.abs(logits - ref_logits)))
    err_h = float(jnp.max(jnp.abs(h_n - ref_h)))
    err_c = float(jnp.max(jnp.abs(c_n - ref_c)))
    assert err_l < 5e-2, f"logits mismatch, max abs err {err_l}"
    assert err_h < 5e-2, f"h_n mismatch, max abs err {err_h}"
    assert err_c < 5e-2, f"c_n mismatch, max abs err {err_c}"

    print("KERNEL_OK")
</pallas_src>

<mosaic_0001>
module attributes {stable_mosaic.version = 11 : i64} {
  func.func @_lstm_disc_kernel(%arg0: i32, %arg1: memref<64x32xbf16, #tpu.memory_space<vmem>>, %arg2: memref<32x128xbf16, #tpu.memory_space<vmem>>, %arg3: memref<32x128xbf16, #tpu.memory_space<vmem>>, %arg4: memref<1x128xf32, #tpu.memory_space<vmem>>, %arg5: memref<32x128xbf16, #tpu.memory_space<vmem>>, %arg6: memref<32x128xbf16, #tpu.memory_space<vmem>>, %arg7: memref<1x128xf32, #tpu.memory_space<vmem>>, %arg8: memref<1x32xf32, #tpu.memory_space<vmem>>, %arg9: memref<1x1xf32, #tpu.memory_space<vmem>>, %arg10: memref<8x8xf32, #tpu.memory_space<vmem>>, %arg11: memref<2x8x32xf32, #tpu.memory_space<vmem>>, %arg12: memref<2x8x32xf32, #tpu.memory_space<vmem>>, %arg13: memref<8x8x128xf32, #tpu.memory_space<vmem>>, %arg14: memref<8x8x32xf32, #tpu.memory_space<vmem>>) attributes {dimension_semantics = [#tpu.dimension_semantics<arbitrary>], iteration_bounds = array<i64: 1>, scalar_prefetch = 0 : i64, scratch_operands = 2 : i64, tpu.core_type = #tpu.core_type<tc>, window_params = [{transform_indices = @transform_0, window_bounds = array<i64: 64, 32>}, {pipeline_mode = #tpu.pipeline_mode<synchronous>, transform_indices = @transform_1, window_bounds = array<i64: 32, 128>}, {pipeline_mode = #tpu.pipeline_mode<synchronous>, transform_indices = @transform_2, window_bounds = array<i64: 32, 128>}, {pipeline_mode = #tpu.pipeline_mode<synchronous>, transform_indices = @transform_3, window_bounds = array<i64: 1, 128>}, {pipeline_mode = #tpu.pipeline_mode<synchronous>, transform_indices = @transform_4, window_bounds = array<i64: 32, 128>}, {pipeline_mode = #tpu.pipeline_mode<synchronous>, transform_indices = @transform_5, window_bounds = array<i64: 32, 128>}, {pipeline_mode = #tpu.pipeline_mode<synchronous>, transform_indices = @transform_6, window_bounds = array<i64: 1, 128>}, {pipeline_mode = #tpu.pipeline_mode<synchronous>, transform_indices = @transform_7, window_bounds = array<i64: 1, 32>}, {pipeline_mode = #tpu.pipeline_mode<synchronous>, transform_indices = @transform_8, window_bounds = array<i64: 1, 1>}, {transform_indices = @transform_9, window_bounds = array<i64: 8, 8>}, {pipeline_mode = #tpu.pipeline_mode<synchronous>, transform_indices = @transform_10, window_bounds = array<i64: 2, 8, 32>}, {pipeline_mode = #tpu.pipeline_mode<synchronous>, transform_indices = @transform_11, window_bounds = array<i64: 2, 8, 32>}]} {
    %c0_i32 = arith.constant 0 : i32
    %0 = arith.cmpi eq, %arg0, %c0_i32 : i32
    %1 = arith.extui %0 : i1 to i32
    %c0_i32_0 = arith.constant 0 : i32
    %2 = arith.cmpi ne, %1, %c0_i32_0 : i32
    scf.if %2 {
      %cst_331 = arith.constant 0.000000e+00 : f32
      %594 = vector.broadcast %cst_331 : f32 to vector<2x8x32xf32>
      %c0_332 = arith.constant 0 : index
      %c0_333 = arith.constant 0 : index
      %c0_334 = arith.constant 0 : index
      %595 = vector.load %arg11[%c0_332, %c0_333, %c0_334] : memref<2x8x32xf32, #tpu.memory_space<vmem>>, vector<2x8x32xf32>
      tpu.vector_store %arg11[%c0_332, %c0_333, %c0_334], %594 {strides = array<i32>} : memref<2x8x32xf32, #tpu.memory_space<vmem>>, vector<2x8x32xf32>,
      %cst_335 = arith.constant 0.000000e+00 : f32
      %596 = vector.broadcast %cst_335 : f32 to vector<2x8x32xf32>
      %c0_336 = arith.constant 0 : index
      %c0_337 = arith.constant 0 : index
      %c0_338 = arith.constant 0 : index
      %597 = vector.load %arg12[%c0_336, %c0_337, %c0_338] : memref<2x8x32xf32, #tpu.memory_space<vmem>>, vector<2x8x32xf32>
      tpu.vector_store %arg12[%c0_336, %c0_337, %c0_338], %596 {strides = array<i32>} : memref<2x8x32xf32, #tpu.memory_space<vmem>>, vector<2x8x32xf32>,
    } else {
    }
    %c0 = arith.constant 0 : index
    %c0_1 = arith.constant 0 : index
    %3 = vector.load %arg3[%c0, %c0_1] : memref<32x128xbf16, #tpu.memory_space<vmem>>, vector<32x128xbf16>
    %c0_2 = arith.constant 0 : index
    %c0_3 = arith.constant 0 : index
    %4 = vector.load %arg6[%c0_2, %c0_3] : memref<32x128xbf16, #tpu.memory_space<vmem>>, vector<32x128xbf16>
    %c0_4 = arith.constant 0 : index
    %c0_5 = arith.constant 0 : index
    %5 = vector.load %arg1[%c0_4, %c0_5] : memref<64x32xbf16, #tpu.memory_space<vmem>>, vector<64x32xbf16>
    %c0_6 = arith.constant 0 : index
    %c0_7 = arith.constant 0 : index
    %6 = vector.load %arg2[%c0_6, %c0_7] : memref<32x128xbf16, #tpu.memory_space<vmem>>, vector<32x128xbf16>
    %cst = arith.constant dense<0.000000e+00> : vector<64x128xf32>
    %7 = tpu.matmul %5, %6, %cst {dimension_numbers = #tpu.dot_dimension_numbers<[1], [0], [0], [1], [0, 0, 1, 1], [], []>} : vector<64x32xbf16>, vector<32x128xbf16>, vector<64x128xf32> -> vector<64x128xf32>
    %c0_8 = arith.constant 0 : index
    %c0_9 = arith.constant 0 : index
    %8 = vector.load %arg4[%c0_8, %c0_9] : memref<1x128xf32, #tpu.memory_space<vmem>>, vector<1x128xf32>
    %9 = vector.broadcast %8 : vector<1x128xf32> to vector<64x128xf32>
    %10 = arith.addf %7, %9 : vector<64x128xf32>
    %11 = vector.shape_cast %10 : vector<64x128xf32> to vector<8x8x128xf32>
    %c0_10 = arith.constant 0 : index
    %c0_11 = arith.constant 0 : index
    %c0_12 = arith.constant 0 : index
    %12 = vector.load %arg13[%c0_10, %c0_11, %c0_12] : memref<8x8x128xf32, #tpu.memory_space<vmem>>, vector<8x8x128xf32>
    tpu.vector_store %arg13[%c0_10, %c0_11, %c0_12], %11 {strides = array<i32>} : memref<8x8x128xf32, #tpu.memory_space<vmem>>, vector<8x8x128xf32>,
    %c0_i32_13 = arith.constant 0 : i32
    %c0_14 = arith.constant 0 : index
    %c0_15 = arith.constant 0 : index
    %c0_16 = arith.constant 0 : index
    %13 = vector.load %arg11[%c0_14, %c0_15, %c0_16] : memref<2x8x32xf32, #tpu.memory_space<vmem>>, vector<1x8x32xf32>
    %14 = vector.shape_cast %13 : vector<1x8x32xf32> to vector<8x32xf32>
    %c0_17 = arith.constant 0 : index
    %c0_18 = arith.constant 0 : index
    %c0_19 = arith.constant 0 : index
    %15 = vector.load %arg12[%c0_17, %c0_18, %c0_19] : memref<2x8x32xf32, #tpu.memory_space<vmem>>, vector<1x8x32xf32>
    %16 = vector.shape_cast %15 : vector<1x8x32xf32> to vector<8x32xf32>
    %17 = arith.index_cast %c0_i32_13 : i32 to index
    %c0_20 = arith.constant 0 : index
    %c0_21 = arith.constant 0 : index
    %18 = vector.load %arg13[%17, %c0_20, %c0_21] : memref<8x8x128xf32, #tpu.memory_space<vmem>>, vector<1x8x128xf32>
    %19 = vector.shape_cast %18 : vector<1x8x128xf32> to vector<8x128xf32>
    %20 = arith.truncf %14 : vector<8x32xf32> to vector<8x32xbf16>
    %cst_22 = arith.constant dense<0.000000e+00> : vector<8x128xf32>
    %21 = tpu.matmul %20, %3, %cst_22 {dimension_numbers = #tpu.dot_dimension_numbers<[1], [0], [0], [1], [0, 0, 1, 1], [], []>} : vector<8x32xbf16>, vector<32x128xbf16>, vector<8x128xf32> -> vector<8x128xf32>
    %22 = arith.addf %19, %21 : vector<8x128xf32>
    %23 = arith.negf %22 : vector<8x128xf32>
    %24 = math.exp %23 : vector<8x128xf32>
    %cst_23 = arith.constant 1.000000e+00 : f32
    %25 = vector.broadcast %cst_23 : f32 to vector<8x128xf32>
    %26 = arith.addf %25, %24 : vector<8x128xf32>
    %27 = arith.divf %25, %26 : vector<8x128xf32>
    %28 = math.tanh %22 : vector<8x128xf32>
    %29 = vector.extract_strided_slice %27 {offsets = [0, 0], sizes = [8, 32], strides = [1, 1]} : vector<8x128xf32> to vector<8x32xf32>
    %30 = vector.extract_strided_slice %27 {offsets = [0, 32], sizes = [8, 32], strides = [1, 1]} : vector<8x128xf32> to vector<8x32xf32>
    %31 = vector.extract_strided_slice %28 {offsets = [0, 64], sizes = [8, 32], strides = [1, 1]} : vector<8x128xf32> to vector<8x32xf32>
    %32 = vector.extract_strided_slice %27 {offsets = [0, 96], sizes = [8, 32], strides = [1, 1]} : vector<8x128xf32> to vector<8x32xf32>
    %33 = arith.mulf %30, %16 : vector<8x32xf32>
    %34 = arith.mulf %29, %31 : vector<8x32xf32>
    %35 = arith.addf %33, %34 : vector<8x32xf32>
    %36 = math.tanh %35 : vector<8x32xf32>
    %37 = arith.mulf %32, %36 : vector<8x32xf32>
    %c0_24 = arith.constant 0 : index
    %c0_25 = arith.constant 0 : index
    %c0_26 = arith.constant 0 : index
    %38 = vector.load %arg11[%c0_24, %c0_25, %c0_26] : memref<2x8x32xf32, #tpu.memory_space<vmem>>, vector<1x8x32xf32>
    %39 = vector.shape_cast %38 : vector<1x8x32xf32> to vector<8x32xf32>
    %40 = vector.shape_cast %37 : vector<8x32xf32> to vector<1x8x32xf32>
    tpu.vector_store %arg11[%c0_24, %c0_25, %c0_26], %40 {strides = array<i32>} : memref<2x8x32xf32, #tpu.memory_space<vmem>>, vector<1x8x32xf32>,
    %c0_27 = arith.constant 0 : index
    %c0_28 = arith.constant 0 : index
    %c0_29 = arith.constant 0 : index
    %41 = vector.load %arg12[%c0_27, %c0_28, %c0_29] : memref<2x8x32xf32, #tpu.memory_space<vmem>>, vector<1x8x32xf32>
    %42 = vector.shape_cast %41 : vector<1x8x32xf32> to vector<8x32xf32>
    %43 = vector.shape_cast %35 : vector<8x32xf32> to vector<1x8x32xf32>
    tpu.vector_store %arg12[%c0_27, %c0_28, %c0_29], %43 {strides = array<i32>} : memref<2x8x32xf32, #tpu.memory_space<vmem>>, vector<1x8x32xf32>,
    %44 = arith.index_cast %c0_i32_13 : i32 to index
    %c0_30 = arith.constant 0 : index
    %c0_31 = arith.constant 0 : index
    %45 = vector.load %arg14[%44, %c0_30, %c0_31] : memref<8x8x32xf32, #tpu.memory_space<vmem>>, vector<1x8x32xf32>
    %46 = vector.shape_cast %45 : vector<1x8x32xf32> to vector<8x32xf32>
    %47 = vector.shape_cast %37 : vector<8x32xf32> to vector<1x8x32xf32>
    tpu.vector_store %arg14[%44, %c0_30, %c0_31], %47 {strides = array<i32>} : memref<8x8x32xf32, #tpu.memory_space<vmem>>, vector<1x8x32xf32>,
    %c1_i32 = arith.constant 1 : i32
    %c0_32 = arith.constant 0 : index
    %c0_33 = arith.constant 0 : index
    %c0_34 = arith.constant 0 : index
    %48 = vector.load %arg11[%c0_32, %c0_33, %c0_34] : memref<2x8x32xf32, #tpu.memory_space<vmem>>, vector<1x8x32xf32>
    %49 = vector.shape_cast %48 : vector<1x8x32xf32> to vector<8x32xf32>
    %c0_35 = arith.constant 0 : index
    %c0_36 = arith.constant 0 : index
    %c0_37 = arith.constant 0 : index
    %50 = vector.load %arg12[%c0_35, %c0_36, %c0_37] : memref<2x8x32xf32, #tpu.memory_space<vmem>>, vector<1x8x32xf32>
    %51 = vector.shape_cast %50 : vector<1x8x32xf32> to vector<8x32xf32>
    %52 = arith.index_cast %c1_i32 : i32 to index
    %c0_38 = arith.constant 0 : index
    %c0_39 = arith.constant 0 : index
    %53 = vector.load %arg13[%52, %c0_38, %c0_39] : memref<8x8x128xf32, #tpu.memory_space<vmem>>, vector<1x8x128xf32>
    %54 = vector.shape_cast %53 : vector<1x8x128xf32> to vector<8x128xf32>
    %55 = arith.truncf %49 : vector<8x32xf32> to vector<8x32xbf16>
    %cst_40 = arith.constant dense<0.000000e+00> : vector<8x128xf32>
    %56 = tpu.matmul %55, %3, %cst_40 {dimension_numbers = #tpu.dot_dimension_numbers<[1], [0], [0], [1], [0, 0, 1, 1], [], []>} : vector<8x32xbf16>, vector<32x128xbf16>, vector<8x128xf32> -> vector<8x128xf32>
    %57 = arith.addf %54, %56 : vector<8x128xf32>
    %58 = arith.negf %57 : vector<8x128xf32>
    %59 = math.exp %58 : vector<8x128xf32>
    %cst_41 = arith.constant 1.000000e+00 : f32
    %60 = vector.broadcast %cst_41 : f32 to vector<8x128xf32>
    %61 = arith.addf %60, %59 : vector<8x128xf32>
    %62 = arith.divf %60, %61 : vector<8x128xf32>
    %63 = math.tanh %57 : vector<8x128xf32>
    %64 = vector.extract_strided_slice %62 {offsets = [0, 0], sizes = [8, 32], strides = [1, 1]} : vector<8x128xf32> to vector<8x32xf32>
    %65 = vector.extract_strided_slice %62 {offsets = [0, 32], sizes = [8, 32], strides = [1, 1]} : vector<8x128xf32> to vector<8x32xf32>
    %66 = vector.extract_strided_slice %63 {offsets = [0, 64], sizes = [8, 32], strides = [1, 1]} : vector<8x128xf32> to vector<8x32xf32>
    %67 = vector.extract_strided_slice %62 {offsets = [0, 96], sizes = [8, 32], strides = [1, 1]} : vector<8x128xf32> to vector<8x32xf32>
    %68 = arith.mulf %65, %51 : vector<8x32xf32>
    %69 = arith.mulf %64, %66 : vector<8x32xf32>
    %70 = arith.addf %68, %69 : vector<8x32xf32>
    %71 = math.tanh %70 : vector<8x32xf32>
    %72 = arith.mulf %67, %71 : vector<8x32xf32>
    %c0_42 = arith.constant 0 : index
    %c0_43 = arith.constant 0 : index
    %c0_44 = arith.constant 0 : index
    %73 = vector.load %arg11[%c0_42, %c0_43, %c0_44] : memref<2x8x32xf32, #tpu.memory_space<vmem>>, vector<1x8x32xf32>
    %74 = vector.shape_cast %73 : vector<1x8x32xf32> to vector<8x32xf32>
    %75 = vector.shape_cast %72 : vector<8x32xf32> to vector<1x8x32xf32>
    tpu.vector_store %arg11[%c0_42, %c0_43, %c0_44], %75 {strides = array<i32>} : memref<2x8x32xf32, #tpu.memory_space<vmem>>, vector<1x8x32xf32>,
    %c0_45 = arith.constant 0 : index
    %c0_46 = arith.constant 0 : index
    %c0_47 = arith.constant 0 : index
    %76 = vector.load %arg12[%c0_45, %c0_46, %c0_47] : memref<2x8x32xf32, #tpu.memory_space<vmem>>, vector<1x8x32xf32>
    %77 = vector.shape_cast %76 : vector<1x8x32xf32> to vector<8x32xf32>
    %78 = vector.shape_cast %70 : vector<8x32xf32> to vector<1x8x32xf32>
    tpu.vector_store %arg12[%c0_45, %c0_46, %c0_47], %78 {strides = array<i32>} : memref<2x8x32xf32, #tpu.memory_space<vmem>>, vector<1x8x32xf32>,
    %79 = arith.index_cast %c1_i32 : i32 to index
    %c0_48 = arith.constant 0 : index
    %c0_49 = arith.constant 0 : index
    %80 = vector.load %arg14[%79, %c0_48, %c0_49] : memref<8x8x32xf32, #tpu.memory_space<vmem>>, vector<1x8x32xf32>
    %81 = vector.shape_cast %80 : vector<1x8x32xf32> to vector<8x32xf32>
    %82 = vector.shape_cast %72 : vector<8x32xf32> to vector<1x8x32xf32>
    tpu.vector_store %arg14[%79, %c0_48, %c0_49], %82 {strides = array<i32>} : memref<8x8x32xf32, #tpu.memory_space<vmem>>, vector<1x8x32xf32>,
    %c2_i32 = arith.constant 2 : i32
    %c0_50 = arith.constant 0 : index
    %c0_51 = arith.constant 0 : index
    %c0_52 = arith.constant 0 : index
    %83 = vector.load %arg11[%c0_50, %c0_51, %c0_52] : memref<2x8x32xf32, #tpu.memory_space<vmem>>, vector<1x8x32xf32>
    %84 = vector.shape_cast %83 : vector<1x8x32xf32> to vector<8x32xf32>
    %c0_53 = arith.constant 0 : index
    %c0_54 = arith.constant 0 : index
    %c0_55 = arith.constant 0 : index
    %85 = vector.load %arg12[%c0_53, %c0_54, %c0_55] : memref<2x8x32xf32, #tpu.memory_space<vmem>>, vector<1x8x32xf32>
    %86 = vector.shape_cast %85 : vector<1x8x32xf32> to vector<8x32xf32>
    %87 = arith.index_cast %c2_i32 : i32 to index
    %c0_56 = arith.constant 0 : index
    %c0_57 = arith.constant 0 : index
    %88 = vector.load %arg13[%87, %c0_56, %c0_57] : memref<8x8x128xf32, #tpu.memory_space<vmem>>, vector<1x8x128xf32>
    %89 = vector.shape_cast %88 : vector<1x8x128xf32> to vector<8x128xf32>
    %90 = arith.truncf %84 : vector<8x32xf32> to vector<8x32xbf16>
    %cst_58 = arith.constant dense<0.000000e+00> : vector<8x128xf32>
    %91 = tpu.matmul %90, %3, %cst_58 {dimension_numbers = #tpu.dot_dimension_numbers<[1], [0], [0], [1], [0, 0, 1, 1], [], []>} : vector<8x32xbf16>, vector<32x128xbf16>, vector<8x128xf32> -> vector<8x128xf32>
    %92 = arith.addf %89, %91 : vector<8x128xf32>
    %93 = arith.negf %92 : vector<8x128xf32>
    %94 = math.exp %93 : vector<8x128xf32>
    %cst_59 = arith.constant 1.000000e+00 : f32
    %95 = vector.broadcast %cst_59 : f32 to vector<8x128xf32>
    %96 = arith.addf %95, %94 : vector<8x128xf32>
    %97 = arith.divf %95, %96 : vector<8x128xf32>
    %98 = math.tanh %92 : vector<8x128xf32>
    %99 = vector.extract_strided_slice %97 {offsets = [0, 0], sizes = [8, 32], strides = [1, 1]} : vector<8x128xf32> to vector<8x32xf32>
    %100 = vector.extract_strided_slice %97 {offsets = [0, 32], sizes = [8, 32], strides = [1, 1]} : vector<8x128xf32> to vector<8x32xf32>
    %101 = vector.extract_strided_slice %98 {offsets = [0, 64], sizes = [8, 32], strides = [1, 1]} : vector<8x128xf32> to vector<8x32xf32>
    %102 = vector.extract_strided_slice %97 {offsets = [0, 96], sizes = [8, 32], strides = [1, 1]} : vector<8x128xf32> to vector<8x32xf32>
    %103 = arith.mulf %100, %86 : vector<8x32xf32>
    %104 = arith.mulf %99, %101 : vector<8x32xf32>
    %105 = arith.addf %103, %104 : vector<8x32xf32>
    %106 = math.tanh %105 : vector<8x32xf32>
    %107 = arith.mulf %102, %106 : vector<8x32xf32>
    %c0_60 = arith.constant 0 : index
    %c0_61 = arith.constant 0 : index
    %c0_62 = arith.constant 0 : index
    %108 = vector.load %arg11[%c0_60, %c0_61, %c0_62] : memref<2x8x32xf32, #tpu.memory_space<vmem>>, vector<1x8x32xf32>
    %109 = vector.shape_cast %108 : vector<1x8x32xf32> to vector<8x32xf32>
    %110 = vector.shape_cast %107 : vector<8x32xf32> to vector<1x8x32xf32>
    tpu.vector_store %arg11[%c0_60, %c0_61, %c0_62], %110 {strides = array<i32>} : memref<2x8x32xf32, #tpu.memory_space<vmem>>, vector<1x8x32xf32>,
    %c0_63 = arith.constant 0 : index
    %c0_64 = arith.constant 0 : index
    %c0_65 = arith.constant 0 : index
    %111 = vector.load %arg12[%c0_63, %c0_64, %c0_65] : memref<2x8x32xf32, #tpu.memory_space<vmem>>, vector<1x8x32xf32>
    %112 = vector.shape_cast %111 : vector<1x8x32xf32> to vector<8x32xf32>
    %113 = vector.shape_cast %105 : vector<8x32xf32> to vector<1x8x32xf32>
    tpu.vector_store %arg12[%c0_63, %c0_64, %c0_65], %113 {strides = array<i32>} : memref<2x8x32xf32, #tpu.memory_space<vmem>>, vector<1x8x32xf32>,
    %114 = arith.index_cast %c2_i32 : i32 to index
    %c0_66 = arith.constant 0 : index
    %c0_67 = arith.constant 0 : index
    %115 = vector.load %arg14[%114, %c0_66, %c0_67] : memref<8x8x32xf32, #tpu.memory_space<vmem>>, vector<1x8x32xf32>
    %116 = vector.shape_cast %115 : vector<1x8x32xf32> to vector<8x32xf32>
    %117 = vector.shape_cast %107 : vector<8x32xf32> to vector<1x8x32xf32>
    tpu.vector_store %arg14[%114, %c0_66, %c0_67], %117 {strides = array<i32>} : memref<8x8x32xf32, #tpu.memory_space<vmem>>, vector<1x8x32xf32>,
    %c3_i32 = arith.constant 3 : i32
    %c0_68 = arith.constant 0 : index
    %c0_69 = arith.constant 0 : index
    %c0_70 = arith.constant 0 : index
    %118 = vector.load %arg11[%c0_68, %c0_69, %c0_70] : memref<2x8x32xf32, #tpu.memory_space<vmem>>, vector<1x8x32xf32>
    %119 = vector.shape_cast %118 : vector<1x8x32xf32> to vector<8x32xf32>
    %c0_71 = arith.constant 0 : index
    %c0_72 = arith.constant 0 : index
    %c0_73 = arith.constant 0 : index
    %120 = vector.load %arg12[%c0_71, %c0_72, %c0_73] : memref<2x8x32xf32, #tpu.memory_space<vmem>>, vector<1x8x32xf32>
    %121 = vector.shape_cast %120 : vector<1x8x32xf32> to vector<8x32xf32>
    %122 = arith.index_cast %c3_i32 : i32 to index
    %c0_74 = arith.constant 0 : index
    %c0_75 = arith.constant 0 : index
    %123 = vector.load %arg13[%122, %c0_74, %c0_75] : memref<8x8x128xf32, #tpu.memory_space<vmem>>, vector<1x8x128xf32>
    %124 = vector.shape_cast %123 : vector<1x8x128xf32> to vector<8x128xf32>
    %125 = arith.truncf %119 : vector<8x32xf32> to vector<8x32xbf16>
    %cst_76 = arith.constant dense<0.000000e+00> : vector<8x128xf32>
    %126 = tpu.matmul %125, %3, %cst_76 {dimension_numbers = #tpu.dot_dimension_numbers<[1], [0], [0], [1], [0, 0, 1, 1], [], []>} : vector<8x32xbf16>, vector<32x128xbf16>, vector<8x128xf32> -> vector<8x128xf32>
    %127 = arith.addf %124, %126 : vector<8x128xf32>
    %128 = arith.negf %127 : vector<8x128xf32>
    %129 = math.exp %128 : vector<8x128xf32>
    %cst_77 = arith.constant 1.000000e+00 : f32
    %130 = vector.broadcast %cst_77 : f32 to vector<8x128xf32>
    %131 = arith.addf %130, %129 : vector<8x128xf32>
    %132 = arith.divf %130, %131 : vector<8x128xf32>
    %133 = math.tanh %127 : vector<8x128xf32>
    %134 = vector.extract_strided_slice %132 {offsets = [0, 0], sizes = [8, 32], strides = [1, 1]} : vector<8x128xf32> to vector<8x32xf32>
    %135 = vector.extract_strided_slice %132 {offsets = [0, 32], sizes = [8, 32], strides = [1, 1]} : vector<8x128xf32> to vector<8x32xf32>
    %136 = vector.extract_strided_slice %133 {offsets = [0, 64], sizes = [8, 32], strides = [1, 1]} : vector<8x128xf32> to vector<8x32xf32>
    %137 = vector.extract_strided_slice %132 {offsets = [0, 96], sizes = [8, 32], strides = [1, 1]} : vector<8x128xf32> to vector<8x32xf32>
    %138 = arith.mulf %135, %121 : vector<8x32xf32>
    %139 = arith.mulf %134, %136 : vector<8x32xf32>
    %140 = arith.addf %138, %139 : vector<8x32xf32>
    %141 = math.tanh %140 : vector<8x32xf32>
    %142 = arith.mulf %137, %141 : vector<8x32xf32>
    %c0_78 = arith.constant 0 : index
    %c0_79 = arith.constant 0 : index
    %c0_80 = arith.constant 0 : index
    %143 = vector.load %arg11[%c0_78, %c0_79, %c0_80] : memref<2x8x32xf32, #tpu.memory_space<vmem>>, vector<1x8x32xf32>
    %144 = vector.shape_cast %143 : vector<1x8x32xf32> to vector<8x32xf32>
    %145 = vector.shape_cast %142 : vector<8x32xf32> to vector<1x8x32xf32>
    tpu.vector_store %arg11[%c0_78, %c0_79, %c0_80], %145 {strides = array<i32>} : memref<2x8x32xf32, #tpu.memory_space<vmem>>, vector<1x8x32xf32>,
    %c0_81 = arith.constant 0 : index
    %c0_82 = arith.constant 0 : index
    %c0_83 = arith.constant 0 : index
    %146 = vector.load %arg12[%c0_81, %c0_82, %c0_83] : memref<2x8x32xf32, #tpu.memory_space<vmem>>, vector<1x8x32xf32>
    %147 = vector.shape_cast %146 : vector<1x8x32xf32> to vector<8x32xf32>
    %148 = vector.shape_cast %140 : vector<8x32xf32> to vector<1x8x32xf32>
    tpu.vector_store %arg12[%c0_81, %c0_82, %c0_83], %148 {strides = array<i32>} : memref<2x8x32xf32, #tpu.memory_space<vmem>>, vector<1x8x32xf32>,
    %149 = arith.index_cast %c3_i32 : i32 to index
    %c0_84 = arith.constant 0 : index
    %c0_85 = arith.constant 0 : index
    %150 = vector.load %arg14[%149, %c0_84, %c0_85] : memref<8x8x32xf32, #tpu.memory_space<vmem>>, vector<1x8x32xf32>
    %151 = vector.shape_cast %150 : vector<1x8x32xf32> to vector<8x32xf32>
    %152 = vector.shape_cast %142 : vector<8x32xf32> to vector<1x8x32xf32>
    tpu.vector_store %arg14[%149, %c0_84, %c0_85], %152 {strides = array<i32>} : memref<8x8x32xf32, #tpu.memory_space<vmem>>, vector<1x8x32xf32>,
    %c4_i32 = arith.constant 4 : i32
    %c0_86 = arith.constant 0 : index
    %c0_87 = arith.constant 0 : index
    %c0_88 = arith.constant 0 : index
    %153 = vector.load %arg11[%c0_86, %c0_87, %c0_88] : memref<2x8x32xf32, #tpu.memory_space<vmem>>, vector<1x8x32xf32>
    %154 = vector.shape_cast %153 : vector<1x8x32xf32> to vector<8x32xf32>
    %c0_89 = arith.constant 0 : index
    %c0_90 = arith.constant 0 : index
    %c0_91 = arith.constant 0 : index
    %155 = vector.load %arg12[%c0_89, %c0_90, %c0_91] : memref<2x8x32xf32, #tpu.memory_space<vmem>>, vector<1x8x32xf32>
    %156 = vector.shape_cast %155 : vector<1x8x32xf32> to vector<8x32xf32>
    %157 = arith.index_cast %c4_i32 : i32 to index
    %c0_92 = arith.constant 0 : index
    %c0_93 = arith.constant 0 : index
    %158 = vector.load %arg13[%157, %c0_92, %c0_93] : memref<8x8x128xf32, #tpu.memory_space<vmem>>, vector<1x8x128xf32>
    %159 = vector.shape_cast %158 : vector<1x8x128xf32> to vector<8x128xf32>
    %160 = arith.truncf %154 : vector<8x32xf32> to vector<8x32xbf16>
    %cst_94 = arith.constant dense<0.000000e+00> : vector<8x128xf32>
    %161 = tpu.matmul %160, %3, %cst_94 {dimension_numbers = #tpu.dot_dimension_numbers<[1], [0], [0], [1], [0, 0, 1, 1], [], []>} : vector<8x32xbf16>, vector<32x128xbf16>, vector<8x128xf32> -> vector<8x128xf32>
    %162 = arith.addf %159, %161 : vector<8x128xf32>
    %163 = arith.negf %162 : vector<8x128xf32>
    %164 = math.exp %163 : vector<8x128xf32>
    %cst_95 = arith.constant 1.000000e+00 : f32
    %165 = vector.broadcast %cst_95 : f32 to vector<8x128xf32>
    %166 = arith.addf %165, %164 : vector<8x128xf32>
    %167 = arith.divf %165, %166 : vector<8x128xf32>
    %168 = math.tanh %162 : vector<8x128xf32>
    %169 = vector.extract_strided_slice %167 {offsets = [0, 0], sizes = [8, 32], strides = [1, 1]} : vector<8x128xf32> to vector<8x32xf32>
    %170 = vector.extract_strided_slice %167 {offsets = [0, 32], sizes = [8, 32], strides = [1, 1]} : vector<8x128xf32> to vector<8x32xf32>
    %171 = vector.extract_strided_slice %168 {offsets = [0, 64], sizes = [8, 32], strides = [1, 1]} : vector<8x128xf32> to vector<8x32xf32>
    %172 = vector.extract_strided_slice %167 {offsets = [0, 96], sizes = [8, 32], strides = [1, 1]} : vector<8x128xf32> to vector<8x32xf32>
    %173 = arith.mulf %170, %156 : vector<8x32xf32>
    %174 = arith.mulf %169, %171 : vector<8x32xf32>
    %175 = arith.addf %173, %174 : vector<8x32xf32>
    %176 = math.tanh %175 : vector<8x32xf32>
    %177 = arith.mulf %172, %176 : vector<8x32xf32>
    %c0_96 = arith.constant 0 : index
    %c0_97 = arith.constant 0 : index
    %c0_98 = arith.constant 0 : index
    %178 = vector.load %arg11[%c0_96, %c0_97, %c0_98] : memref<2x8x32xf32, #tpu.memory_space<vmem>>, vector<1x8x32xf32>
    %179 = vector.shape_cast %178 : vector<1x8x32xf32> to vector<8x32xf32>
    %180 = vector.shape_cast %177 : vector<8x32xf32> to vector<1x8x32xf32>
    tpu.vector_store %arg11[%c0_96, %c0_97, %c0_98], %180 {strides = array<i32>} : memref<2x8x32xf32, #tpu.memory_space<vmem>>, vector<1x8x32xf32>,
    %c0_99 = arith.constant 0 : index
    %c0_100 = arith.constant 0 : index
    %c0_101 = arith.constant 0 : index
    %181 = vector.load %arg12[%c0_99, %c0_100, %c0_101] : memref<2x8x32xf32, #tpu.memory_space<vmem>>, vector<1x8x32xf32>
    %182 = vector.shape_cast %181 : vector<1x8x32xf32> to vector<8x32xf32>
    %183 = vector.shape_cast %175 : vector<8x32xf32> to vector<1x8x32xf32>
    tpu.vector_store %arg12[%c0_99, %c0_100, %c0_101], %183 {strides = array<i32>} : memref<2x8x32xf32, #tpu.memory_space<vmem>>, vector<1x8x32xf32>,
    %184 = arith.index_cast %c4_i32 : i32 to index
    %c0_102 = arith.constant 0 : index
    %c0_103 = arith.constant 0 : index
    %185 = vector.load %arg14[%184, %c0_102, %c0_103] : memref<8x8x32xf32, #tpu.memory_space<vmem>>, vector<1x8x32xf32>
    %186 = vector.shape_cast %185 : vector<1x8x32xf32> to vector<8x32xf32>
    %187 = vector.shape_cast %177 : vector<8x32xf32> to vector<1x8x32xf32>
    tpu.vector_store %arg14[%184, %c0_102, %c0_103], %187 {strides = array<i32>} : memref<8x8x32xf32, #tpu.memory_space<vmem>>, vector<1x8x32xf32>,
    %c5_i32 = arith.constant 5 : i32
    %c0_104 = arith.constant 0 : index
    %c0_105 = arith.constant 0 : index
    %c0_106 = arith.constant 0 : index
    %188 = vector.load %arg11[%c0_104, %c0_105, %c0_106] : memref<2x8x32xf32, #tpu.memory_space<vmem>>, vector<1x8x32xf32>
    %189 = vector.shape_cast %188 : vector<1x8x32xf32> to vector<8x32xf32>
    %c0_107 = arith.constant 0 : index
    %c0_108 = arith.constant 0 : index
    %c0_109 = arith.constant 0 : index
    %190 = vector.load %arg12[%c0_107, %c0_108, %c0_109] : memref<2x8x32xf32, #tpu.memory_space<vmem>>, vector<1x8x32xf32>
    %191 = vector.shape_cast %190 : vector<1x8x32xf32> to vector<8x32xf32>
    %192 = arith.index_cast %c5_i32 : i32 to index
    %c0_110 = arith.constant 0 : index
    %c0_111 = arith.constant 0 : index
    %193 = vector.load %arg13[%192, %c0_110, %c0_111] : memref<8x8x128xf32, #tpu.memory_space<vmem>>, vector<1x8x128xf32>
    %194 = vector.shape_cast %193 : vector<1x8x128xf32> to vector<8x128xf32>
    %195 = arith.truncf %189 : vector<8x32xf32> to vector<8x32xbf16>
    %cst_112 = arith.constant dense<0.000000e+00> : vector<8x128xf32>
    %196 = tpu.matmul %195, %3, %cst_112 {dimension_numbers = #tpu.dot_dimension_numbers<[1], [0], [0], [1], [0, 0, 1, 1], [], []>} : vector<8x32xbf16>, vector<32x128xbf16>, vector<8x128xf32> -> vector<8x128xf32>
    %197 = arith.addf %194, %196 : vector<8x128xf32>
    %198 = arith.negf %197 : vector<8x128xf32>
    %199 = math.exp %198 : vector<8x128xf32>
    %cst_113 = arith.constant 1.000000e+00 : f32
    %200 = vector.broadcast %cst_113 : f32 to vector<8x128xf32>
    %201 = arith.addf %200, %199 : vector<8x128xf32>
    %202 = arith.divf %200, %201 : vector<8x128xf32>
    %203 = math.tanh %197 : vector<8x128xf32>
    %204 = vector.extract_strided_slice %202 {offsets = [0, 0], sizes = [8, 32], strides = [1, 1]} : vector<8x128xf32> to vector<8x32xf32>
    %205 = vector.extract_strided_slice %202 {offsets = [0, 32], sizes = [8, 32], strides = [1, 1]} : vector<8x128xf32> to vector<8x32xf32>
    %206 = vector.extract_strided_slice %203 {offsets = [0, 64], sizes = [8, 32], strides = [1, 1]} : vector<8x128xf32> to vector<8x32xf32>
    %207 = vector.extract_strided_slice %202 {offsets = [0, 96], sizes = [8, 32], strides = [1, 1]} : vector<8x128xf32> to vector<8x32xf32>
    %208 = arith.mulf %205, %191 : vector<8x32xf32>
    %209 = arith.mulf %204, %206 : vector<8x32xf32>
    %210 = arith.addf %208, %209 : vector<8x32xf32>
    %211 = math.tanh %210 : vector<8x32xf32>
    %212 = arith.mulf %207, %211 : vector<8x32xf32>
    %c0_114 = arith.constant 0 : index
    %c0_115 = arith.constant 0 : index
    %c0_116 = arith.constant 0 : index
    %213 = vector.load %arg11[%c0_114, %c0_115, %c0_116] : memref<2x8x32xf32, #tpu.memory_space<vmem>>, vector<1x8x32xf32>
    %214 = vector.shape_cast %213 : vector<1x8x32xf32> to vector<8x32xf32>
    %215 = vector.shape_cast %212 : vector<8x32xf32> to vector<1x8x32xf32>
    tpu.vector_store %arg11[%c0_114, %c0_115, %c0_116], %215 {strides = array<i32>} : memref<2x8x32xf32, #tpu.memory_space<vmem>>, vector<1x8x32xf32>,
    %c0_117 = arith.constant 0 : index
    %c0_118 = arith.constant 0 : index
    %c0_119 = arith.constant 0 : index
    %216 = vector.load %arg12[%c0_117, %c0_118, %c0_119] : memref<2x8x32xf32, #tpu.memory_space<vmem>>, vector<1x8x32xf32>
    %217 = vector.shape_cast %216 : vector<1x8x32xf32> to vector<8x32xf32>
    %218 = vector.shape_cast %210 : vector<8x32xf32> to vector<1x8x32xf32>
    tpu.vector_store %arg12[%c0_117, %c0_118, %c0_119], %218 {strides = array<i32>} : memref<2x8x32xf32, #tpu.memory_space<vmem>>, vector<1x8x32xf32>,
    %219 = arith.index_cast %c5_i32 : i32 to index
    %c0_120 = arith.constant 0 : index
    %c0_121 = arith.constant 0 : index
    %220 = vector.load %arg14[%219, %c0_120, %c0_121] : memref<8x8x32xf32, #tpu.memory_space<vmem>>, vector<1x8x32xf32>
    %221 = vector.shape_cast %220 : vector<1x8x32xf32> to vector<8x32xf32>
    %222 = vector.shape_cast %212 : vector<8x32xf32> to vector<1x8x32xf32>
    tpu.vector_store %arg14[%219, %c0_120, %c0_121], %222 {strides = array<i32>} : memref<8x8x32xf32, #tpu.memory_space<vmem>>, vector<1x8x32xf32>,
    %c6_i32 = arith.constant 6 : i32
    %c0_122 = arith.constant 0 : index
    %c0_123 = arith.constant 0 : index
    %c0_124 = arith.constant 0 : index
    %223 = vector.load %arg11[%c0_122, %c0_123, %c0_124] : memref<2x8x32xf32, #tpu.memory_space<vmem>>, vector<1x8x32xf32>
    %224 = vector.shape_cast %223 : vector<1x8x32xf32> to vector<8x32xf32>
    %c0_125 = arith.constant 0 : index
    %c0_126 = arith.constant 0 : index
    %c0_127 = arith.constant 0 : index
    %225 = vector.load %arg12[%c0_125, %c0_126, %c0_127] : memref<2x8x32xf32, #tpu.memory_space<vmem>>, vector<1x8x32xf32>
    %226 = vector.shape_cast %225 : vector<1x8x32xf32> to vector<8x32xf32>
    %227 = arith.index_cast %c6_i32 : i32 to index
    %c0_128 = arith.constant 0 : index
    %c0_129 = arith.constant 0 : index
    %228 = vector.load %arg13[%227, %c0_128, %c0_129] : memref<8x8x128xf32, #tpu.memory_space<vmem>>, vector<1x8x128xf32>
    %229 = vector.shape_cast %228 : vector<1x8x128xf32> to vector<8x128xf32>
    %230 = arith.truncf %224 : vector<8x32xf32> to vector<8x32xbf16>
    %cst_130 = arith.constant dense<0.000000e+00> : vector<8x128xf32>
    %231 = tpu.matmul %230, %3, %cst_130 {dimension_numbers = #tpu.dot_dimension_numbers<[1], [0], [0], [1], [0, 0, 1, 1], [], []>} : vector<8x32xbf16>, vector<32x128xbf16>, vector<8x128xf32> -> vector<8x128xf32>
    %232 = arith.addf %229, %231 : vector<8x128xf32>
    %233 = arith.negf %232 : vector<8x128xf32>
    %234 = math.exp %233 : vector<8x128xf32>
    %cst_131 = arith.constant 1.000000e+00 : f32
    %235 = vector.broadcast %cst_131 : f32 to vector<8x128xf32>
    %236 = arith.addf %235, %234 : vector<8x128xf32>
    %237 = arith.divf %235, %236 : vector<8x128xf32>
    %238 = math.tanh %232 : vector<8x128xf32>
    %239 = vector.extract_strided_slice %237 {offsets = [0, 0], sizes = [8, 32], strides = [1, 1]} : vector<8x128xf32> to vector<8x32xf32>
    %240 = vector.extract_strided_slice %237 {offsets = [0, 32], sizes = [8, 32], strides = [1, 1]} : vector<8x128xf32> to vector<8x32xf32>
    %241 = vector.extract_strided_slice %238 {offsets = [0, 64], sizes = [8, 32], strides = [1, 1]} : vector<8x128xf32> to vector<8x32xf32>
    %242 = vector.extract_strided_slice %237 {offsets = [0, 96], sizes = [8, 32], strides = [1, 1]} : vector<8x128xf32> to vector<8x32xf32>
    %243 = arith.mulf %240, %226 : vector<8x32xf32>
    %244 = arith.mulf %239, %241 : vector<8x32xf32>
    %245 = arith.addf %243, %244 : vector<8x32xf32>
    %246 = math.tanh %245 : vector<8x32xf32>
    %247 = arith.mulf %242, %246 : vector<8x32xf32>
    %c0_132 = arith.constant 0 : index
    %c0_133 = arith.constant 0 : index
    %c0_134 = arith.constant 0 : index
    %248 = vector.load %arg11[%c0_132, %c0_133, %c0_134] : memref<2x8x32xf32, #tpu.memory_space<vmem>>, vector<1x8x32xf32>
    %249 = vector.shape_cast %248 : vector<1x8x32xf32> to vector<8x32xf32>
    %250 = vector.shape_cast %247 : vector<8x32xf32> to vector<1x8x32xf32>
    tpu.vector_store %arg11[%c0_132, %c0_133, %c0_134], %250 {strides = array<i32>} : memref<2x8x32xf32, #tpu.memory_space<vmem>>, vector<1x8x32xf32>,
    %c0_135 = arith.constant 0 : index
    %c0_136 = arith.constant 0 : index
    %c0_137 = arith.constant 0 : index
    %251 = vector.load %arg12[%c0_135, %c0_136, %c0_137] : memref<2x8x32xf32, #tpu.memory_space<vmem>>, vector<1x8x32xf32>
    %252 = vector.shape_cast %251 : vector<1x8x32xf32> to vector<8x32xf32>
    %253 = vector.shape_cast %245 : vector<8x32xf32> to vector<1x8x32xf32>
    tpu.vector_store %arg12[%c0_135, %c0_136, %c0_137], %253 {strides = array<i32>} : memref<2x8x32xf32, #tpu.memory_space<vmem>>, vector<1x8x32xf32>,
    %254 = arith.index_cast %c6_i32 : i32 to index
    %c0_138 = arith.constant 0 : index
    %c0_139 = arith.constant 0 : index
    %255 = vector.load %arg14[%254, %c0_138, %c0_139] : memref<8x8x32xf32, #tpu.memory_space<vmem>>, vector<1x8x32xf32>
    %256 = vector.shape_cast %255 : vector<1x8x32xf32> to vector<8x32xf32>
    %257 = vector.shape_cast %247 : vector<8x32xf32> to vector<1x8x32xf32>
    tpu.vector_store %arg14[%254, %c0_138, %c0_139], %257 {strides = array<i32>} : memref<8x8x32xf32, #tpu.memory_space<vmem>>, vector<1x8x32xf32>,
    %c7_i32 = arith.constant 7 : i32
    %c0_140 = arith.constant 0 : index
    %c0_141 = arith.constant 0 : index
    %c0_142 = arith.constant 0 : index
    %258 = vector.load %arg11[%c0_140, %c0_141, %c0_142] : memref<2x8x32xf32, #tpu.memory_space<vmem>>, vector<1x8x32xf32>
    %259 = vector.shape_cast %258 : vector<1x8x32xf32> to vector<8x32xf32>
    %c0_143 = arith.constant 0 : index
    %c0_144 = arith.constant 0 : index
    %c0_145 = arith.constant 0 : index
    %260 = vector.load %arg12[%c0_143, %c0_144, %c0_145] : memref<2x8x32xf32, #tpu.memory_space<vmem>>, vector<1x8x32xf32>
    %261 = vector.shape_cast %260 : vector<1x8x32xf32> to vector<8x32xf32>
    %262 = arith.index_cast %c7_i32 : i32 to index
    %c0_146 = arith.constant 0 : index
    %c0_147 = arith.constant 0 : index
    %263 = vector.load %arg13[%262, %c0_146, %c0_147] : memref<8x8x128xf32, #tpu.memory_space<vmem>>, vector<1x8x128xf32>
    %264 = vector.shape_cast %263 : vector<1x8x128xf32> to vector<8x128xf32>
    %265 = arith.truncf %259 : vector<8x32xf32> to vector<8x32xbf16>
    %cst_148 = arith.constant dense<0.000000e+00> : vector<8x128xf32>
    %266 = tpu.matmul %265, %3, %cst_148 {dimension_numbers = #tpu.dot_dimension_numbers<[1], [0], [0], [1], [0, 0, 1, 1], [], []>} : vector<8x32xbf16>, vector<32x128xbf16>, vector<8x128xf32> -> vector<8x128xf32>
    %267 = arith.addf %264, %266 : vector<8x128xf32>
    %268 = arith.negf %267 : vector<8x128xf32>
    %269 = math.exp %268 : vector<8x128xf32>
    %cst_149 = arith.constant 1.000000e+00 : f32
    %270 = vector.broadcast %cst_149 : f32 to vector<8x128xf32>
    %271 = arith.addf %270, %269 : vector<8x128xf32>
    %272 = arith.divf %270, %271 : vector<8x128xf32>
    %273 = math.tanh %267 : vector<8x128xf32>
    %274 = vector.extract_strided_slice %272 {offsets = [0, 0], sizes = [8, 32], strides = [1, 1]} : vector<8x128xf32> to vector<8x32xf32>
    %275 = vector.extract_strided_slice %272 {offsets = [0, 32], sizes = [8, 32], strides = [1, 1]} : vector<8x128xf32> to vector<8x32xf32>
    %276 = vector.extract_strided_slice %273 {offsets = [0, 64], sizes = [8, 32], strides = [1, 1]} : vector<8x128xf32> to vector<8x32xf32>
    %277 = vector.extract_strided_slice %272 {offsets = [0, 96], sizes = [8, 32], strides = [1, 1]} : vector<8x128xf32> to vector<8x32xf32>
    %278 = arith.mulf %275, %261 : vector<8x32xf32>
    %279 = arith.mulf %274, %276 : vector<8x32xf32>
    %280 = arith.addf %278, %279 : vector<8x32xf32>
    %281 = math.tanh %280 : vector<8x32xf32>
    %282 = arith.mulf %277, %281 : vector<8x32xf32>
    %c0_150 = arith.constant 0 : index
    %c0_151 = arith.constant 0 : index
    %c0_152 = arith.constant 0 : index
    %283 = vector.load %arg11[%c0_150, %c0_151, %c0_152] : memref<2x8x32xf32, #tpu.memory_space<vmem>>, vector<1x8x32xf32>
    %284 = vector.shape_cast %283 : vector<1x8x32xf32> to vector<8x32xf32>
    %285 = vector.shape_cast %282 : vector<8x32xf32> to vector<1x8x32xf32>
    tpu.vector_store %arg11[%c0_150, %c0_151, %c0_152], %285 {strides = array<i32>} : memref<2x8x32xf32, #tpu.memory_space<vmem>>, vector<1x8x32xf32>,
    %c0_153 = arith.constant 0 : index
    %c0_154 = arith.constant 0 : index
    %c0_155 = arith.constant 0 : index
    %286 = vector.load %arg12[%c0_153, %c0_154, %c0_155] : memref<2x8x32xf32, #tpu.memory_space<vmem>>, vector<1x8x32xf32>
    %287 = vector.shape_cast %286 : vector<1x8x32xf32> to vector<8x32xf32>
    %288 = vector.shape_cast %280 : vector<8x32xf32> to vector<1x8x32xf32>
    tpu.vector_store %arg12[%c0_153, %c0_154, %c0_155], %288 {strides = array<i32>} : memref<2x8x32xf32, #tpu.memory_space<vmem>>, vector<1x8x32xf32>,
    %289 = arith.index_cast %c7_i32 : i32 to index
    %c0_156 = arith.constant 0 : index
    %c0_157 = arith.constant 0 : index
    %290 = vector.load %arg14[%289, %c0_156, %c0_157] : memref<8x8x32xf32, #tpu.memory_space<vmem>>, vector<1x8x32xf32>
    %291 = vector.shape_cast %290 : vector<1x8x32xf32> to vector<8x32xf32>
    %292 = vector.shape_cast %282 : vector<8x32xf32> to vector<1x8x32xf32>
    tpu.vector_store %arg14[%289, %c0_156, %c0_157], %292 {strides = array<i32>} : memref<8x8x32xf32, #tpu.memory_space<vmem>>, vector<1x8x32xf32>,
    %c8_i32 = arith.constant 8 : i32
    %c0_158 = arith.constant 0 : index
    %c0_159 = arith.constant 0 : index
    %c0_160 = arith.constant 0 : index
    %293 = vector.load %arg14[%c0_158, %c0_159, %c0_160] : memref<8x8x32xf32, #tpu.memory_space<vmem>>, vector<8x8x32xf32>
    %294 = vector.shape_cast %293 : vector<8x8x32xf32> to vector<64x32xf32>
    %295 = arith.truncf %294 : vector<64x32xf32> to vector<64x32xbf16>
    %c0_161 = arith.constant 0 : index
    %c0_162 = arith.constant 0 : index
    %296 = vector.load %arg5[%c0_161, %c0_162] : memref<32x128xbf16, #tpu.memory_space<vmem>>, vector<32x128xbf16>
    %cst_163 = arith.constant dense<0.000000e+00> : vector<64x128xf32>
    %297 = tpu.matmul %295, %296, %cst_163 {dimension_numbers = #tpu.dot_dimension_numbers<[1], [0], [0], [1], [0, 0, 1, 1], [], []>} : vector<64x32xbf16>, vector<32x128xbf16>, vector<64x128xf32> -> vector<64x128xf32>
    %c0_164 = arith.constant 0 : index
    %c0_165 = arith.constant 0 : index
    %298 = vector.load %arg7[%c0_164, %c0_165] : memref<1x128xf32, #tpu.memory_space<vmem>>, vector<1x128xf32>
    %299 = vector.broadcast %298 : vector<1x128xf32> to vector<64x128xf32>
    %300 = arith.addf %297, %299 : vector<64x128xf32>
    %301 = vector.shape_cast %300 : vector<64x128xf32> to vector<8x8x128xf32>
    %c0_166 = arith.constant 0 : index
    %c0_167 = arith.constant 0 : index
    %c0_168 = arith.constant 0 : index
    %302 = vector.load %arg13[%c0_166, %c0_167, %c0_168] : memref<8x8x128xf32, #tpu.memory_space<vmem>>, vector<8x8x128xf32>
    tpu.vector_store %arg13[%c0_166, %c0_167, %c0_168], %301 {strides = array<i32>} : memref<8x8x128xf32, #tpu.memory_space<vmem>>, vector<8x8x128xf32>,
    %c0_i32_169 = arith.constant 0 : i32
    %c1 = arith.constant 1 : index
    %c0_170 = arith.constant 0 : index
    %c0_171 = arith.constant 0 : index
    %303 = vector.load %arg11[%c1, %c0_170, %c0_171] : memref<2x8x32xf32, #tpu.memory_space<vmem>>, vector<1x8x32xf32>
    %304 = vector.shape_cast %303 : vector<1x8x32xf32> to vector<8x32xf32>
    %c1_172 = arith.constant 1 : index
    %c0_173 = arith.constant 0 : index
    %c0_174 = arith.constant 0 : index
    %305 = vector.load %arg12[%c1_172, %c0_173, %c0_174] : memref<2x8x32xf32, #tpu.memory_space<vmem>>, vector<1x8x32xf32>
    %306 = vector.shape_cast %305 : vector<1x8x32xf32> to vector<8x32xf32>
    %307 = arith.index_cast %c0_i32_169 : i32 to index
    %c0_175 = arith.constant 0 : index
    %c0_176 = arith.constant 0 : index
    %308 = vector.load %arg13[%307, %c0_175, %c0_176] : memref<8x8x128xf32, #tpu.memory_space<vmem>>, vector<1x8x128xf32>
    %309 = vector.shape_cast %308 : vector<1x8x128xf32> to vector<8x128xf32>
    %310 = arith.truncf %304 : vector<8x32xf32> to vector<8x32xbf16>
    %cst_177 = arith.constant dense<0.000000e+00> : vector<8x128xf32>
    %311 = tpu.matmul %310, %4, %cst_177 {dimension_numbers = #tpu.dot_dimension_numbers<[1], [0], [0], [1], [0, 0, 1, 1], [], []>} : vector<8x32xbf16>, vector<32x128xbf16>, vector<8x128xf32> -> vector<8x128xf32>
    %312 = arith.addf %309, %311 : vector<8x128xf32>
    %313 = arith.negf %312 : vector<8x128xf32>
    %314 = math.exp %313 : vector<8x128xf32>
    %cst_178 = arith.constant 1.000000e+00 : f32
    %315 = vector.broadcast %cst_178 : f32 to vector<8x128xf32>
    %316 = arith.addf %315, %314 : vector<8x128xf32>
    %317 = arith.divf %315, %316 : vector<8x128xf32>
    %318 = math.tanh %312 : vector<8x128xf32>
    %319 = vector.extract_strided_slice %317 {offsets = [0, 0], sizes = [8, 32], strides = [1, 1]} : vector<8x128xf32> to vector<8x32xf32>
    %320 = vector.extract_strided_slice %317 {offsets = [0, 32], sizes = [8, 32], strides = [1, 1]} : vector<8x128xf32> to vector<8x32xf32>
    %321 = vector.extract_strided_slice %318 {offsets = [0, 64], sizes = [8, 32], strides = [1, 1]} : vector<8x128xf32> to vector<8x32xf32>
    %322 = vector.extract_strided_slice %317 {offsets = [0, 96], sizes = [8, 32], strides = [1, 1]} : vector<8x128xf32> to vector<8x32xf32>
    %323 = arith.mulf %320, %306 : vector<8x32xf32>
    %324 = arith.mulf %319, %321 : vector<8x32xf32>
    %325 = arith.addf %323, %324 : vector<8x32xf32>
    %326 = math.tanh %325 : vector<8x32xf32>
    %327 = arith.mulf %322, %326 : vector<8x32xf32>
    %c1_179 = arith.constant 1 : index
    %c0_180 = arith.constant 0 : index
    %c0_181 = arith.constant 0 : index
    %328 = vector.load %arg11[%c1_179, %c0_180, %c0_181] : memref<2x8x32xf32, #tpu.memory_space<vmem>>, vector<1x8x32xf32>
    %329 = vector.shape_cast %328 : vector<1x8x32xf32> to vector<8x32xf32>
    %330 = vector.shape_cast %327 : vector<8x32xf32> to vector<1x8x32xf32>
    tpu.vector_store %arg11[%c1_179, %c0_180, %c0_181], %330 {strides = array<i32>} : memref<2x8x32xf32, #tpu.memory_space<vmem>>, vector<1x8x32xf32>,
    %c1_182 = arith.constant 1 : index
    %c0_183 = arith.constant 0 : index
    %c0_184 = arith.constant 0 : index
    %331 = vector.load %arg12[%c1_182, %c0_183, %c0_184] : memref<2x8x32xf32, #tpu.memory_space<vmem>>, vector<1x8x32xf32>
    %332 = vector.shape_cast %331 : vector<1x8x32xf32> to vector<8x32xf32>
    %333 = vector.shape_cast %325 : vector<8x32xf32> to vector<1x8x32xf32>
    tpu.vector_store %arg12[%c1_182, %c0_183, %c0_184], %333 {strides = array<i32>} : memref<2x8x32xf32, #tpu.memory_space<vmem>>, vector<1x8x32xf32>,
    %334 = arith.index_cast %c0_i32_169 : i32 to index
    %c0_185 = arith.constant 0 : index
    %c0_186 = arith.constant 0 : index
    %335 = vector.load %arg14[%334, %c0_185, %c0_186] : memref<8x8x32xf32, #tpu.memory_space<vmem>>, vector<1x8x32xf32>
    %336 = vector.shape_cast %335 : vector<1x8x32xf32> to vector<8x32xf32>
    %337 = vector.shape_cast %327 : vector<8x32xf32> to vector<1x8x32xf32>
    tpu.vector_store %arg14[%334, %c0_185, %c0_186], %337 {strides = array<i32>} : memref<8x8x32xf32, #tpu.memory_space<vmem>>, vector<1x8x32xf32>,
    %c1_i32_187 = arith.constant 1 : i32
    %c1_188 = arith.constant 1 : index
    %c0_189 = arith.constant 0 : index
    %c0_190 = arith.constant 0 : index
    %338 = vector.load %arg11[%c1_188, %c0_189, %c0_190] : memref<2x8x32xf32, #tpu.memory_space<vmem>>, vector<1x8x32xf32>
    %339 = vector.shape_cast %338 : vector<1x8x32xf32> to vector<8x32xf32>
    %c1_191 = arith.constant 1 : index
    %c0_192 = arith.constant 0 : index
    %c0_193 = arith.constant 0 : index
    %340 = vector.load %arg12[%c1_191, %c0_192, %c0_193] : memref<2x8x32xf32, #tpu.memory_space<vmem>>, vector<1x8x32xf32>
    %341 = vector.shape_cast %340 : vector<1x8x32xf32> to vector<8x32xf32>
    %342 = arith.index_cast %c1_i32_187 : i32 to index
    %c0_194 = arith.constant 0 : index
    %c0_195 = arith.constant 0 : index
    %343 = vector.load %arg13[%342, %c0_194, %c0_195] : memref<8x8x128xf32, #tpu.memory_space<vmem>>, vector<1x8x128xf32>
    %344 = vector.shape_cast %343 : vector<1x8x128xf32> to vector<8x128xf32>
    %345 = arith.truncf %339 : vector<8x32xf32> to vector<8x32xbf16>
    %cst_196 = arith.constant dense<0.000000e+00> : vector<8x128xf32>
    %346 = tpu.matmul %345, %4, %cst_196 {dimension_numbers = #tpu.dot_dimension_numbers<[1], [0], [0], [1], [0, 0, 1, 1], [], []>} : vector<8x32xbf16>, vector<32x128xbf16>, vector<8x128xf32> -> vector<8x128xf32>
    %347 = arith.addf %344, %346 : vector<8x128xf32>
    %348 = arith.negf %347 : vector<8x128xf32>
    %349 = math.exp %348 : vector<8x128xf32>
    %cst_197 = arith.constant 1.000000e+00 : f32
    %350 = vector.broadcast %cst_197 : f32 to vector<8x128xf32>
    %351 = arith.addf %350, %349 : vector<8x128xf32>
    %352 = arith.divf %350, %351 : vector<8x128xf32>
    %353 = math.tanh %347 : vector<8x128xf32>
    %354 = vector.extract_strided_slice %352 {offsets = [0, 0], sizes = [8, 32], strides = [1, 1]} : vector<8x128xf32> to vector<8x32xf32>
    %355 = vector.extract_strided_slice %352 {offsets = [0, 32], sizes = [8, 32], strides = [1, 1]} : vector<8x128xf32> to vector<8x32xf32>
    %356 = vector.extract_strided_slice %353 {offsets = [0, 64], sizes = [8, 32], strides = [1, 1]} : vector<8x128xf32> to vector<8x32xf32>
    %357 = vector.extract_strided_slice %352 {offsets = [0, 96], sizes = [8, 32], strides = [1, 1]} : vector<8x128xf32> to vector<8x32xf32>
    %358 = arith.mulf %355, %341 : vector<8x32xf32>
    %359 = arith.mulf %354, %356 : vector<8x32xf32>
    %360 = arith.addf %358, %359 : vector<8x32xf32>
    %361 = math.tanh %360 : vector<8x32xf32>
    %362 = arith.mulf %357, %361 : vector<8x32xf32>
    %c1_198 = arith.constant 1 : index
    %c0_199 = arith.constant 0 : index
    %c0_200 = arith.constant 0 : index
    %363 = vector.load %arg11[%c1_198, %c0_199, %c0_200] : memref<2x8x32xf32, #tpu.memory_space<vmem>>, vector<1x8x32xf32>
    %364 = vector.shape_cast %363 : vector<1x8x32xf32> to vector<8x32xf32>
    %365 = vector.shape_cast %362 : vector<8x32xf32> to vector<1x8x32xf32>
    tpu.vector_store %arg11[%c1_198, %c0_199, %c0_200], %365 {strides = array<i32>} : memref<2x8x32xf32, #tpu.memory_space<vmem>>, vector<1x8x32xf32>,
    %c1_201 = arith.constant 1 : index
    %c0_202 = arith.constant 0 : index
    %c0_203 = arith.constant 0 : index
    %366 = vector.load %arg12[%c1_201, %c0_202, %c0_203] : memref<2x8x32xf32, #tpu.memory_space<vmem>>, vector<1x8x32xf32>
    %367 = vector.shape_cast %366 : vector<1x8x32xf32> to vector<8x32xf32>
    %368 = vector.shape_cast %360 : vector<8x32xf32> to vector<1x8x32xf32>
    tpu.vector_store %arg12[%c1_201, %c0_202, %c0_203], %368 {strides = array<i32>} : memref<2x8x32xf32, #tpu.memory_space<vmem>>, vector<1x8x32xf32>,
    %369 = arith.index_cast %c1_i32_187 : i32 to index
    %c0_204 = arith.constant 0 : index
    %c0_205 = arith.constant 0 : index
    %370 = vector.load %arg14[%369, %c0_204, %c0_205] : memref<8x8x32xf32, #tpu.memory_space<vmem>>, vector<1x8x32xf32>
    %371 = vector.shape_cast %370 : vector<1x8x32xf32> to vector<8x32xf32>
    %372 = vector.shape_cast %362 : vector<8x32xf32> to vector<1x8x32xf32>
    tpu.vector_store %arg14[%369, %c0_204, %c0_205], %372 {strides = array<i32>} : memref<8x8x32xf32, #tpu.memory_space<vmem>>, vector<1x8x32xf32>,
    %c2_i32_206 = arith.constant 2 : i32
    %c1_207 = arith.constant 1 : index
    %c0_208 = arith.constant 0 : index
    %c0_209 = arith.constant 0 : index
    %373 = vector.load %arg11[%c1_207, %c0_208, %c0_209] : memref<2x8x32xf32, #tpu.memory_space<vmem>>, vector<1x8x32xf32>
    %374 = vector.shape_cast %373 : vector<1x8x32xf32> to vector<8x32xf32>
    %c1_210 = arith.constant 1 : index
    %c0_211 = arith.constant 0 : index
    %c0_212 = arith.constant 0 : index
    %375 = vector.load %arg12[%c1_210, %c0_211, %c0_212] : memref<2x8x32xf32, #tpu.memory_space<vmem>>, vector<1x8x32xf32>
    %376 = vector.shape_cast %375 : vector<1x8x32xf32> to vector<8x32xf32>
    %377 = arith.index_cast %c2_i32_206 : i32 to index
    %c0_213 = arith.constant 0 : index
    %c0_214 = arith.constant 0 : index
    %378 = vector.load %arg13[%377, %c0_213, %c0_214] : memref<8x8x128xf32, #tpu.memory_space<vmem>>, vector<1x8x128xf32>
    %379 = vector.shape_cast %378 : vector<1x8x128xf32> to vector<8x128xf32>
    %380 = arith.truncf %374 : vector<8x32xf32> to vector<8x32xbf16>
    %cst_215 = arith.constant dense<0.000000e+00> : vector<8x128xf32>
    %381 = tpu.matmul %380, %4, %cst_215 {dimension_numbers = #tpu.dot_dimension_numbers<[1], [0], [0], [1], [0, 0, 1, 1], [], []>} : vector<8x32xbf16>, vector<32x128xbf16>, vector<8x128xf32> -> vector<8x128xf32>
    %382 = arith.addf %379, %381 : vector<8x128xf32>
    %383 = arith.negf %382 : vector<8x128xf32>
    %384 = math.exp %383 : vector<8x128xf32>
    %cst_216 = arith.constant 1.000000e+00 : f32
    %385 = vector.broadcast %cst_216 : f32 to vector<8x128xf32>
    %386 = arith.addf %385, %384 : vector<8x128xf32>
    %387 = arith.divf %385, %386 : vector<8x128xf32>
    %388 = math.tanh %382 : vector<8x128xf32>
    %389 = vector.extract_strided_slice %387 {offsets = [0, 0], sizes = [8, 32], strides = [1, 1]} : vector<8x128xf32> to vector<8x32xf32>
    %390 = vector.extract_strided_slice %387 {offsets = [0, 32], sizes = [8, 32], strides = [1, 1]} : vector<8x128xf32> to vector<8x32xf32>
    %391 = vector.extract_strided_slice %388 {offsets = [0, 64], sizes = [8, 32], strides = [1, 1]} : vector<8x128xf32> to vector<8x32xf32>
    %392 = vector.extract_strided_slice %387 {offsets = [0, 96], sizes = [8, 32], strides = [1, 1]} : vector<8x128xf32> to vector<8x32xf32>
    %393 = arith.mulf %390, %376 : vector<8x32xf32>
    %394 = arith.mulf %389, %391 : vector<8x32xf32>
    %395 = arith.addf %393, %394 : vector<8x32xf32>
    %396 = math.tanh %395 : vector<8x32xf32>
    %397 = arith.mulf %392, %396 : vector<8x32xf32>
    %c1_217 = arith.constant 1 : index
    %c0_218 = arith.constant 0 : index
    %c0_219 = arith.constant 0 : index
    %398 = vector.load %arg11[%c1_217, %c0_218, %c0_219] : memref<2x8x32xf32, #tpu.memory_space<vmem>>, vector<1x8x32xf32>
    %399 = vector.shape_cast %398 : vector<1x8x32xf32> to vector<8x32xf32>
    %400 = vector.shape_cast %397 : vector<8x32xf32> to vector<1x8x32xf32>
    tpu.vector_store %arg11[%c1_217, %c0_218, %c0_219], %400 {strides = array<i32>} : memref<2x8x32xf32, #tpu.memory_space<vmem>>, vector<1x8x32xf32>,
    %c1_220 = arith.constant 1 : index
    %c0_221 = arith.constant 0 : index
    %c0_222 = arith.constant 0 : index
    %401 = vector.load %arg12[%c1_220, %c0_221, %c0_222] : memref<2x8x32xf32, #tpu.memory_space<vmem>>, vector<1x8x32xf32>
    %402 = vector.shape_cast %401 : vector<1x8x32xf32> to vector<8x32xf32>
    %403 = vector.shape_cast %395 : vector<8x32xf32> to vector<1x8x32xf32>
    tpu.vector_store %arg12[%c1_220, %c0_221, %c0_222], %403 {strides = array<i32>} : memref<2x8x32xf32, #tpu.memory_space<vmem>>, vector<1x8x32xf32>,
    %404 = arith.index_cast %c2_i32_206 : i32 to index
    %c0_223 = arith.constant 0 : index
    %c0_224 = arith.constant 0 : index
    %405 = vector.load %arg14[%404, %c0_223, %c0_224] : memref<8x8x32xf32, #tpu.memory_space<vmem>>, vector<1x8x32xf32>
    %406 = vector.shape_cast %405 : vector<1x8x32xf32> to vector<8x32xf32>
    %407 = vector.shape_cast %397 : vector<8x32xf32> to vector<1x8x32xf32>
    tpu.vector_store %arg14[%404, %c0_223, %c0_224], %407 {strides = array<i32>} : memref<8x8x32xf32, #tpu.memory_space<vmem>>, vector<1x8x32xf32>,
    %c3_i32_225 = arith.constant 3 : i32
    %c1_226 = arith.constant 1 : index
    %c0_227 = arith.constant 0 : index
    %c0_228 = arith.constant 0 : index
    %408 = vector.load %arg11[%c1_226, %c0_227, %c0_228] : memref<2x8x32xf32, #tpu.memory_space<vmem>>, vector<1x8x32xf32>
    %409 = vector.shape_cast %408 : vector<1x8x32xf32> to vector<8x32xf32>
    %c1_229 = arith.constant 1 : index
    %c0_230 = arith.constant 0 : index
    %c0_231 = arith.constant 0 : index
    %410 = vector.load %arg12[%c1_229, %c0_230, %c0_231] : memref<2x8x32xf32, #tpu.memory_space<vmem>>, vector<1x8x32xf32>
    %411 = vector.shape_cast %410 : vector<1x8x32xf32> to vector<8x32xf32>
    %412 = arith.index_cast %c3_i32_225 : i32 to index
    %c0_232 = arith.constant 0 : index
    %c0_233 = arith.constant 0 : index
    %413 = vector.load %arg13[%412, %c0_232, %c0_233] : memref<8x8x128xf32, #tpu.memory_space<vmem>>, vector<1x8x128xf32>
    %414 = vector.shape_cast %413 : vector<1x8x128xf32> to vector<8x128xf32>
    %415 = arith.truncf %409 : vector<8x32xf32> to vector<8x32xbf16>
    %cst_234 = arith.constant dense<0.000000e+00> : vector<8x128xf32>
    %416 = tpu.matmul %415, %4, %cst_234 {dimension_numbers = #tpu.dot_dimension_numbers<[1], [0], [0], [1], [0, 0, 1, 1], [], []>} : vector<8x32xbf16>, vector<32x128xbf16>, vector<8x128xf32> -> vector<8x128xf32>
    %417 = arith.addf %414, %416 : vector<8x128xf32>
    %418 = arith.negf %417 : vector<8x128xf32>
    %419 = math.exp %418 : vector<8x128xf32>
    %cst_235 = arith.constant 1.000000e+00 : f32
    %420 = vector.broadcast %cst_235 : f32 to vector<8x128xf32>
    %421 = arith.addf %420, %419 : vector<8x128xf32>
    %422 = arith.divf %420, %421 : vector<8x128xf32>
    %423 = math.tanh %417 : vector<8x128xf32>
    %424 = vector.extract_strided_slice %422 {offsets = [0, 0], sizes = [8, 32], strides = [1, 1]} : vector<8x128xf32> to vector<8x32xf32>
    %425 = vector.extract_strided_slice %422 {offsets = [0, 32], sizes = [8, 32], strides = [1, 1]} : vector<8x128xf32> to vector<8x32xf32>
    %426 = vector.extract_strided_slice %423 {offsets = [0, 64], sizes = [8, 32], strides = [1, 1]} : vector<8x128xf32> to vector<8x32xf32>
    %427 = vector.extract_strided_slice %422 {offsets = [0, 96], sizes = [8, 32], strides = [1, 1]} : vector<8x128xf32> to vector<8x32xf32>
    %428 = arith.mulf %425, %411 : vector<8x32xf32>
    %429 = arith.mulf %424, %426 : vector<8x32xf32>
    %430 = arith.addf %428, %429 : vector<8x32xf32>
    %431 = math.tanh %430 : vector<8x32xf32>
    %432 = arith.mulf %427, %431 : vector<8x32xf32>
    %c1_236 = arith.constant 1 : index
    %c0_237 = arith.constant 0 : index
    %c0_238 = arith.constant 0 : index
    %433 = vector.load %arg11[%c1_236, %c0_237, %c0_238] : memref<2x8x32xf32, #tpu.memory_space<vmem>>, vector<1x8x32xf32>
    %434 = vector.shape_cast %433 : vector<1x8x32xf32> to vector<8x32xf32>
    %435 = vector.shape_cast %432 : vector<8x32xf32> to vector<1x8x32xf32>
    tpu.vector_store %arg11[%c1_236, %c0_237, %c0_238], %435 {strides = array<i32>} : memref<2x8x32xf32, #tpu.memory_space<vmem>>, vector<1x8x32xf32>,
    %c1_239 = arith.constant 1 : index
    %c0_240 = arith.constant 0 : index
    %c0_241 = arith.constant 0 : index
    %436 = vector.load %arg12[%c1_239, %c0_240, %c0_241] : memref<2x8x32xf32, #tpu.memory_space<vmem>>, vector<1x8x32xf32>
    %437 = vector.shape_cast %436 : vector<1x8x32xf32> to vector<8x32xf32>
    %438 = vector.shape_cast %430 : vector<8x32xf32> to vector<1x8x32xf32>
    tpu.vector_store %arg12[%c1_239, %c0_240, %c0_241], %438 {strides = array<i32>} : memref<2x8x32xf32, #tpu.memory_space<vmem>>, vector<1x8x32xf32>,
    %439 = arith.index_cast %c3_i32_225 : i32 to index
    %c0_242 = arith.constant 0 : index
    %c0_243 = arith.constant 0 : index
    %440 = vector.load %arg14[%439, %c0_242, %c0_243] : memref<8x8x32xf32, #tpu.memory_space<vmem>>, vector<1x8x32xf32>
    %441 = vector.shape_cast %440 : vector<1x8x32xf32> to vector<8x32xf32>
    %442 = vector.shape_cast %432 : vector<8x32xf32> to vector<1x8x32xf32>
    tpu.vector_store %arg14[%439, %c0_242, %c0_243], %442 {strides = array<i32>} : memref<8x8x32xf32, #tpu.memory_space<vmem>>, vector<1x8x32xf32>,
    %c4_i32_244 = arith.constant 4 : i32
    %c1_245 = arith.constant 1 : index
    %c0_246 = arith.constant 0 : index
    %c0_247 = arith.constant 0 : index
    %443 = vector.load %arg11[%c1_245, %c0_246, %c0_247] : memref<2x8x32xf32, #tpu.memory_space<vmem>>, vector<1x8x32xf32>
    %444 = vector.shape_cast %443 : vector<1x8x32xf32> to vector<8x32xf32>
    %c1_248 = arith.constant 1 : index
    %c0_249 = arith.constant 0 : index
    %c0_250 = arith.constant 0 : index
    %445 = vector.load %arg12[%c1_248, %c0_249, %c0_250] : memref<2x8x32xf32, #tpu.memory_space<vmem>>, vector<1x8x32xf32>
    %446 = vector.shape_cast %445 : vector<1x8x32xf32> to vector<8x32xf32>
    %447 = arith.index_cast %c4_i32_244 : i32 to index
    %c0_251 = arith.constant 0 : index
    %c0_252 = arith.constant 0 : index
    %448 = vector.load %arg13[%447, %c0_251, %c0_252] : memref<8x8x128xf32, #tpu.memory_space<vmem>>, vector<1x8x128xf32>
    %449 = vector.shape_cast %448 : vector<1x8x128xf32> to vector<8x128xf32>
    %450 = arith.truncf %444 : vector<8x32xf32> to vector<8x32xbf16>
    %cst_253 = arith.constant dense<0.000000e+00> : vector<8x128xf32>
    %451 = tpu.matmul %450, %4, %cst_253 {dimension_numbers = #tpu.dot_dimension_numbers<[1], [0], [0], [1], [0, 0, 1, 1], [], []>} : vector<8x32xbf16>, vector<32x128xbf16>, vector<8x128xf32> -> vector<8x128xf32>
    %452 = arith.addf %449, %451 : vector<8x128xf32>
    %453 = arith.negf %452 : vector<8x128xf32>
    %454 = math.exp %453 : vector<8x128xf32>
    %cst_254 = arith.constant 1.000000e+00 : f32
    %455 = vector.broadcast %cst_254 : f32 to vector<8x128xf32>
    %456 = arith.addf %455, %454 : vector<8x128xf32>
    %457 = arith.divf %455, %456 : vector<8x128xf32>
    %458 = math.tanh %452 : vector<8x128xf32>
    %459 = vector.extract_strided_slice %457 {offsets = [0, 0], sizes = [8, 32], strides = [1, 1]} : vector<8x128xf32> to vector<8x32xf32>
    %460 = vector.extract_strided_slice %457 {offsets = [0, 32], sizes = [8, 32], strides = [1, 1]} : vector<8x128xf32> to vector<8x32xf32>
    %461 = vector.extract_strided_slice %458 {offsets = [0, 64], sizes = [8, 32], strides = [1, 1]} : vector<8x128xf32> to vector<8x32xf32>
    %462 = vector.extract_strided_slice %457 {offsets = [0, 96], sizes = [8, 32], strides = [1, 1]} : vector<8x128xf32> to vector<8x32xf32>
    %463 = arith.mulf %460, %446 : vector<8x32xf32>
    %464 = arith.mulf %459, %461 : vector<8x32xf32>
    %465 = arith.addf %463, %464 : vector<8x32xf32>
    %466 = math.tanh %465 : vector<8x32xf32>
    %467 = arith.mulf %462, %466 : vector<8x32xf32>
    %c1_255 = arith.constant 1 : index
    %c0_256 = arith.constant 0 : index
    %c0_257 = arith.constant 0 : index
    %468 = vector.load %arg11[%c1_255, %c0_256, %c0_257] : memref<2x8x32xf32, #tpu.memory_space<vmem>>, vector<1x8x32xf32>
    %469 = vector.shape_cast %468 : vector<1x8x32xf32> to vector<8x32xf32>
    %470 = vector.shape_cast %467 : vector<8x32xf32> to vector<1x8x32xf32>
    tpu.vector_store %arg11[%c1_255, %c0_256, %c0_257], %470 {strides = array<i32>} : memref<2x8x32xf32, #tpu.memory_space<vmem>>, vector<1x8x32xf32>,
    %c1_258 = arith.constant 1 : index
    %c0_259 = arith.constant 0 : index
    %c0_260 = arith.constant 0 : index
    %471 = vector.load %arg12[%c1_258, %c0_259, %c0_260] : memref<2x8x32xf32, #tpu.memory_space<vmem>>, vector<1x8x32xf32>
    %472 = vector.shape_cast %471 : vector<1x8x32xf32> to vector<8x32xf32>
    %473 = vector.shape_cast %465 : vector<8x32xf32> to vector<1x8x32xf32>
    tpu.vector_store %arg12[%c1_258, %c0_259, %c0_260], %473 {strides = array<i32>} : memref<2x8x32xf32, #tpu.memory_space<vmem>>, vector<1x8x32xf32>,
    %474 = arith.index_cast %c4_i32_244 : i32 to index
    %c0_261 = arith.constant 0 : index
    %c0_262 = arith.constant 0 : index
    %475 = vector.load %arg14[%474, %c0_261, %c0_262] : memref<8x8x32xf32, #tpu.memory_space<vmem>>, vector<1x8x32xf32>
    %476 = vector.shape_cast %475 : vector<1x8x32xf32> to vector<8x32xf32>
    %477 = vector.shape_cast %467 : vector<8x32xf32> to vector<1x8x32xf32>
    tpu.vector_store %arg14[%474, %c0_261, %c0_262], %477 {strides = array<i32>} : memref<8x8x32xf32, #tpu.memory_space<vmem>>, vector<1x8x32xf32>,
    %c5_i32_263 = arith.constant 5 : i32
    %c1_264 = arith.constant 1 : index
    %c0_265 = arith.constant 0 : index
    %c0_266 = arith.constant 0 : index
    %478 = vector.load %arg11[%c1_264, %c0_265, %c0_266] : memref<2x8x32xf32, #tpu.memory_space<vmem>>, vector<1x8x32xf32>
    %479 = vector.shape_cast %478 : vector<1x8x32xf32> to vector<8x32xf32>
    %c1_267 = arith.constant 1 : index
    %c0_268 = arith.constant 0 : index
    %c0_269 = arith.constant 0 : index
    %480 = vector.load %arg12[%c1_267, %c0_268, %c0_269] : memref<2x8x32xf32, #tpu.memory_space<vmem>>, vector<1x8x32xf32>
    %481 = vector.shape_cast %480 : vector<1x8x32xf32> to vector<8x32xf32>
    %482 = arith.index_cast %c5_i32_263 : i32 to index
    %c0_270 = arith.constant 0 : index
    %c0_271 = arith.constant 0 : index
    %483 = vector.load %arg13[%482, %c0_270, %c0_271] : memref<8x8x128xf32, #tpu.memory_space<vmem>>, vector<1x8x128xf32>
    %484 = vector.shape_cast %483 : vector<1x8x128xf32> to vector<8x128xf32>
    %485 = arith.truncf %479 : vector<8x32xf32> to vector<8x32xbf16>
    %cst_272 = arith.constant dense<0.000000e+00> : vector<8x128xf32>
    %486 = tpu.matmul %485, %4, %cst_272 {dimension_numbers = #tpu.dot_dimension_numbers<[1], [0], [0], [1], [0, 0, 1, 1], [], []>} : vector<8x32xbf16>, vector<32x128xbf16>, vector<8x128xf32> -> vector<8x128xf32>
    %487 = arith.addf %484, %486 : vector<8x128xf32>
    %488 = arith.negf %487 : vector<8x128xf32>
    %489 = math.exp %488 : vector<8x128xf32>
    %cst_273 = arith.constant 1.000000e+00 : f32
    %490 = vector.broadcast %cst_273 : f32 to vector<8x128xf32>
    %491 = arith.addf %490, %489 : vector<8x128xf32>
    %492 = arith.divf %490, %491 : vector<8x128xf32>
    %493 = math.tanh %487 : vector<8x128xf32>
    %494 = vector.extract_strided_slice %492 {offsets = [0, 0], sizes = [8, 32], strides = [1, 1]} : vector<8x128xf32> to vector<8x32xf32>
    %495 = vector.extract_strided_slice %492 {offsets = [0, 32], sizes = [8, 32], strides = [1, 1]} : vector<8x128xf32> to vector<8x32xf32>
    %496 = vector.extract_strided_slice %493 {offsets = [0, 64], sizes = [8, 32], strides = [1, 1]} : vector<8x128xf32> to vector<8x32xf32>
    %497 = vector.extract_strided_slice %492 {offsets = [0, 96], sizes = [8, 32], strides = [1, 1]} : vector<8x128xf32> to vector<8x32xf32>
    %498 = arith.mulf %495, %481 : vector<8x32xf32>
    %499 = arith.mulf %494, %496 : vector<8x32xf32>
    %500 = arith.addf %498, %499 : vector<8x32xf32>
    %501 = math.tanh %500 : vector<8x32xf32>
    %502 = arith.mulf %497, %501 : vector<8x32xf32>
    %c1_274 = arith.constant 1 : index
    %c0_275 = arith.constant 0 : index
    %c0_276 = arith.constant 0 : index
    %503 = vector.load %arg11[%c1_274, %c0_275, %c0_276] : memref<2x8x32xf32, #tpu.memory_space<vmem>>, vector<1x8x32xf32>
    %504 = vector.shape_cast %503 : vector<1x8x32xf32> to vector<8x32xf32>
    %505 = vector.shape_cast %502 : vector<8x32xf32> to vector<1x8x32xf32>
    tpu.vector_store %arg11[%c1_274, %c0_275, %c0_276], %505 {strides = array<i32>} : memref<2x8x32xf32, #tpu.memory_space<vmem>>, vector<1x8x32xf32>,
    %c1_277 = arith.constant 1 : index
    %c0_278 = arith.constant 0 : index
    %c0_279 = arith.constant 0 : index
    %506 = vector.load %arg12[%c1_277, %c0_278, %c0_279] : memref<2x8x32xf32, #tpu.memory_space<vmem>>, vector<1x8x32xf32>
    %507 = vector.shape_cast %506 : vector<1x8x32xf32> to vector<8x32xf32>
    %508 = vector.shape_cast %500 : vector<8x32xf32> to vector<1x8x32xf32>
    tpu.vector_store %arg12[%c1_277, %c0_278, %c0_279], %508 {strides = array<i32>} : memref<2x8x32xf32, #tpu.memory_space<vmem>>, vector<1x8x32xf32>,
    %509 = arith.index_cast %c5_i32_263 : i32 to index
    %c0_280 = arith.constant 0 : index
    %c0_281 = arith.constant 0 : index
    %510 = vector.load %arg14[%509, %c0_280, %c0_281] : memref<8x8x32xf32, #tpu.memory_space<vmem>>, vector<1x8x32xf32>
    %511 = vector.shape_cast %510 : vector<1x8x32xf32> to vector<8x32xf32>
    %512 = vector.shape_cast %502 : vector<8x32xf32> to vector<1x8x32xf32>
    tpu.vector_store %arg14[%509, %c0_280, %c0_281], %512 {strides = array<i32>} : memref<8x8x32xf32, #tpu.memory_space<vmem>>, vector<1x8x32xf32>,
    %c6_i32_282 = arith.constant 6 : i32
    %c1_283 = arith.constant 1 : index
    %c0_284 = arith.constant 0 : index
    %c0_285 = arith.constant 0 : index
    %513 = vector.load %arg11[%c1_283, %c0_284, %c0_285] : memref<2x8x32xf32, #tpu.memory_space<vmem>>, vector<1x8x32xf32>
    %514 = vector.shape_cast %513 : vector<1x8x32xf32> to vector<8x32xf32>
    %c1_286 = arith.constant 1 : index
    %c0_287 = arith.constant 0 : index
    %c0_288 = arith.constant 0 : index
    %515 = vector.load %arg12[%c1_286, %c0_287, %c0_288] : memref<2x8x32xf32, #tpu.memory_space<vmem>>, vector<1x8x32xf32>
    %516 = vector.shape_cast %515 : vector<1x8x32xf32> to vector<8x32xf32>
    %517 = arith.index_cast %c6_i32_282 : i32 to index
    %c0_289 = arith.constant 0 : index
    %c0_290 = arith.constant 0 : index
    %518 = vector.load %arg13[%517, %c0_289, %c0_290] : memref<8x8x128xf32, #tpu.memory_space<vmem>>, vector<1x8x128xf32>
    %519 = vector.shape_cast %518 : vector<1x8x128xf32> to vector<8x128xf32>
    %520 = arith.truncf %514 : vector<8x32xf32> to vector<8x32xbf16>
    %cst_291 = arith.constant dense<0.000000e+00> : vector<8x128xf32>
    %521 = tpu.matmul %520, %4, %cst_291 {dimension_numbers = #tpu.dot_dimension_numbers<[1], [0], [0], [1], [0, 0, 1, 1], [], []>} : vector<8x32xbf16>, vector<32x128xbf16>, vector<8x128xf32> -> vector<8x128xf32>
    %522 = arith.addf %519, %521 : vector<8x128xf32>
    %523 = arith.negf %522 : vector<8x128xf32>
    %524 = math.exp %523 : vector<8x128xf32>
    %cst_292 = arith.constant 1.000000e+00 : f32
    %525 = vector.broadcast %cst_292 : f32 to vector<8x128xf32>
    %526 = arith.addf %525, %524 : vector<8x128xf32>
    %527 = arith.divf %525, %526 : vector<8x128xf32>
    %528 = math.tanh %522 : vector<8x128xf32>
    %529 = vector.extract_strided_slice %527 {offsets = [0, 0], sizes = [8, 32], strides = [1, 1]} : vector<8x128xf32> to vector<8x32xf32>
    %530 = vector.extract_strided_slice %527 {offsets = [0, 32], sizes = [8, 32], strides = [1, 1]} : vector<8x128xf32> to vector<8x32xf32>
    %531 = vector.extract_strided_slice %528 {offsets = [0, 64], sizes = [8, 32], strides = [1, 1]} : vector<8x128xf32> to vector<8x32xf32>
    %532 = vector.extract_strided_slice %527 {offsets = [0, 96], sizes = [8, 32], strides = [1, 1]} : vector<8x128xf32> to vector<8x32xf32>
    %533 = arith.mulf %530, %516 : vector<8x32xf32>
    %534 = arith.mulf %529, %531 : vector<8x32xf32>
    %535 = arith.addf %533, %534 : vector<8x32xf32>
    %536 = math.tanh %535 : vector<8x32xf32>
    %537 = arith.mulf %532, %536 : vector<8x32xf32>
    %c1_293 = arith.constant 1 : index
    %c0_294 = arith.constant 0 : index
    %c0_295 = arith.constant 0 : index
    %538 = vector.load %arg11[%c1_293, %c0_294, %c0_295] : memref<2x8x32xf32, #tpu.memory_space<vmem>>, vector<1x8x32xf32>
    %539 = vector.shape_cast %538 : vector<1x8x32xf32> to vector<8x32xf32>
    %540 = vector.shape_cast %537 : vector<8x32xf32> to vector<1x8x32xf32>
    tpu.vector_store %arg11[%c1_293, %c0_294, %c0_295], %540 {strides = array<i32>} : memref<2x8x32xf32, #tpu.memory_space<vmem>>, vector<1x8x32xf32>,
    %c1_296 = arith.constant 1 : index
    %c0_297 = arith.constant 0 : index
    %c0_298 = arith.constant 0 : index
    %541 = vector.load %arg12[%c1_296, %c0_297, %c0_298] : memref<2x8x32xf32, #tpu.memory_space<vmem>>, vector<1x8x32xf32>
    %542 = vector.shape_cast %541 : vector<1x8x32xf32> to vector<8x32xf32>
    %543 = vector.shape_cast %535 : vector<8x32xf32> to vector<1x8x32xf32>
    tpu.vector_store %arg12[%c1_296, %c0_297, %c0_298], %543 {strides = array<i32>} : memref<2x8x32xf32, #tpu.memory_space<vmem>>, vector<1x8x32xf32>,
    %544 = arith.index_cast %c6_i32_282 : i32 to index
    %c0_299 = arith.constant 0 : index
    %c0_300 = arith.constant 0 : index
    %545 = vector.load %arg14[%544, %c0_299, %c0_300] : memref<8x8x32xf32, #tpu.memory_space<vmem>>, vector<1x8x32xf32>
    %546 = vector.shape_cast %545 : vector<1x8x32xf32> to vector<8x32xf32>
    %547 = vector.shape_cast %537 : vector<8x32xf32> to vector<1x8x32xf32>
    tpu.vector_store %arg14[%544, %c0_299, %c0_300], %547 {strides = array<i32>} : memref<8x8x32xf32, #tpu.memory_space<vmem>>, vector<1x8x32xf32>,
    %c7_i32_301 = arith.constant 7 : i32
    %c1_302 = arith.constant 1 : index
    %c0_303 = arith.constant 0 : index
    %c0_304 = arith.constant 0 : index
    %548 = vector.load %arg11[%c1_302, %c0_303, %c0_304] : memref<2x8x32xf32, #tpu.memory_space<vmem>>, vector<1x8x32xf32>
    %549 = vector.shape_cast %548 : vector<1x8x32xf32> to vector<8x32xf32>
    %c1_305 = arith.constant 1 : index
    %c0_306 = arith.constant 0 : index
    %c0_307 = arith.constant 0 : index
    %550 = vector.load %arg12[%c1_305, %c0_306, %c0_307] : memref<2x8x32xf32, #tpu.memory_space<vmem>>, vector<1x8x32xf32>
    %551 = vector.shape_cast %550 : vector<1x8x32xf32> to vector<8x32xf32>
    %552 = arith.index_cast %c7_i32_301 : i32 to index
    %c0_308 = arith.constant 0 : index
    %c0_309 = arith.constant 0 : index
    %553 = vector.load %arg13[%552, %c0_308, %c0_309] : memref<8x8x128xf32, #tpu.memory_space<vmem>>, vector<1x8x128xf32>
    %554 = vector.shape_cast %553 : vector<1x8x128xf32> to vector<8x128xf32>
    %555 = arith.truncf %549 : vector<8x32xf32> to vector<8x32xbf16>
    %cst_310 = arith.constant dense<0.000000e+00> : vector<8x128xf32>
    %556 = tpu.matmul %555, %4, %cst_310 {dimension_numbers = #tpu.dot_dimension_numbers<[1], [0], [0], [1], [0, 0, 1, 1], [], []>} : vector<8x32xbf16>, vector<32x128xbf16>, vector<8x128xf32> -> vector<8x128xf32>
    %557 = arith.addf %554, %556 : vector<8x128xf32>
    %558 = arith.negf %557 : vector<8x128xf32>
    %559 = math.exp %558 : vector<8x128xf32>
    %cst_311 = arith.constant 1.000000e+00 : f32
    %560 = vector.broadcast %cst_311 : f32 to vector<8x128xf32>
    %561 = arith.addf %560, %559 : vector<8x128xf32>
    %562 = arith.divf %560, %561 : vector<8x128xf32>
    %563 = math.tanh %557 : vector<8x128xf32>
    %564 = vector.extract_strided_slice %562 {offsets = [0, 0], sizes = [8, 32], strides = [1, 1]} : vector<8x128xf32> to vector<8x32xf32>
    %565 = vector.extract_strided_slice %562 {offsets = [0, 32], sizes = [8, 32], strides = [1, 1]} : vector<8x128xf32> to vector<8x32xf32>
    %566 = vector.extract_strided_slice %563 {offsets = [0, 64], sizes = [8, 32], strides = [1, 1]} : vector<8x128xf32> to vector<8x32xf32>
    %567 = vector.extract_strided_slice %562 {offsets = [0, 96], sizes = [8, 32], strides = [1, 1]} : vector<8x128xf32> to vector<8x32xf32>
    %568 = arith.mulf %565, %551 : vector<8x32xf32>
    %569 = arith.mulf %564, %566 : vector<8x32xf32>
    %570 = arith.addf %568, %569 : vector<8x32xf32>
    %571 = math.tanh %570 : vector<8x32xf32>
    %572 = arith.mulf %567, %571 : vector<8x32xf32>
    %c1_312 = arith.constant 1 : index
    %c0_313 = arith.constant 0 : index
    %c0_314 = arith.constant 0 : index
    %573 = vector.load %arg11[%c1_312, %c0_313, %c0_314] : memref<2x8x32xf32, #tpu.memory_space<vmem>>, vector<1x8x32xf32>
    %574 = vector.shape_cast %573 : vector<1x8x32xf32> to vector<8x32xf32>
    %575 = vector.shape_cast %572 : vector<8x32xf32> to vector<1x8x32xf32>
    tpu.vector_store %arg11[%c1_312, %c0_313, %c0_314], %575 {strides = array<i32>} : memref<2x8x32xf32, #tpu.memory_space<vmem>>, vector<1x8x32xf32>,
    %c1_315 = arith.constant 1 : index
    %c0_316 = arith.constant 0 : index
    %c0_317 = arith.constant 0 : index
    %576 = vector.load %arg12[%c1_315, %c0_316, %c0_317] : memref<2x8x32xf32, #tpu.memory_space<vmem>>, vector<1x8x32xf32>
    %577 = vector.shape_cast %576 : vector<1x8x32xf32> to vector<8x32xf32>
    %578 = vector.shape_cast %570 : vector<8x32xf32> to vector<1x8x32xf32>
    tpu.vector_store %arg12[%c1_315, %c0_316, %c0_317], %578 {strides = array<i32>} : memref<2x8x32xf32, #tpu.memory_space<vmem>>, vector<1x8x32xf32>,
    %579 = arith.index_cast %c7_i32_301 : i32 to index
    %c0_318 = arith.constant 0 : index
    %c0_319 = arith.constant 0 : index
    %580 = vector.load %arg14[%579, %c0_318, %c0_319] : memref<8x8x32xf32, #tpu.memory_space<vmem>>, vector<1x8x32xf32>
    %581 = vector.shape_cast %580 : vector<1x8x32xf32> to vector<8x32xf32>
    %582 = vector.shape_cast %572 : vector<8x32xf32> to vector<1x8x32xf32>
    tpu.vector_store %arg14[%579, %c0_318, %c0_319], %582 {strides = array<i32>} : memref<8x8x32xf32, #tpu.memory_space<vmem>>, vector<1x8x32xf32>,
    %c8_i32_320 = arith.constant 8 : i32
    %c0_321 = arith.constant 0 : index
    %c0_322 = arith.constant 0 : index
    %c0_323 = arith.constant 0 : index
    %583 = vector.load %arg14[%c0_321, %c0_322, %c0_323] : memref<8x8x32xf32, #tpu.memory_space<vmem>>, vector<8x8x32xf32>
    %c0_324 = arith.constant 0 : index
    %c0_325 = arith.constant 0 : index
    %584 = vector.load %arg8[%c0_324, %c0_325] : memref<1x32xf32, #tpu.memory_space<vmem>>, vector<1x32xf32>
    %585 = vector.shape_cast %584 : vector<1x32xf32> to vector<1x1x32xf32>
    %586 = vector.broadcast %585 : vector<1x1x32xf32> to vector<8x8x32xf32>
    %587 = arith.mulf %583, %586 : vector<8x8x32xf32>
    %cst_326 = arith.constant dense<0.000000e+00> : vector<8x8xf32>
    %588 = vector.multi_reduction <add>, %587, %cst_326 [2] : vector<8x8x32xf32> to vector<8x8xf32>
    %c0_327 = arith.constant 0 : index
    %c0_328 = arith.constant 0 : index
    %589 = vector.load %arg9[%c0_327, %c0_328] : memref<1x1xf32, #tpu.memory_space<vmem>>, vector<1x1xf32>
    %590 = vector.broadcast %589 : vector<1x1xf32> to vector<8x8xf32>
    %591 = arith.addf %588, %590 : vector<8x8xf32>
    %592 = tpu.transpose %591, [1, 0] : vector<8x8xf32> -> vector<8x8xf32>
    %c0_329 = arith.constant 0 : index
    %c0_330 = arith.constant 0 : index
    %593 = vector.load %arg10[%c0_329, %c0_330] : memref<8x8xf32, #tpu.memory_space<vmem>>, vector<8x8xf32>
    tpu.vector_store %arg10[%c0_329, %c0_330], %592 {strides = array<i32>} : memref<8x8xf32, #tpu.memory_space<vmem>>, vector<8x8xf32>,
    return
  }
  func.func @transform_0(%arg0: i32) -> (i32, i32) {
    %c0_i32 = arith.constant 0 : i32
    %c0_i32_0 = arith.constant 0 : i32
    return %arg0, %c0_i32 : i32, i32
  }
  func.func @transform_1(%arg0: i32) -> (i32, i32) {
    %c0_i32 = arith.constant 0 : i32
    %c0_i32_0 = arith.constant 0 : i32
    %c0_i32_1 = arith.constant 0 : i32
    return %c0_i32, %c0_i32_0 : i32, i32
  }
  func.func @transform_2(%arg0: i32) -> (i32, i32) {
    %c0_i32 = arith.constant 0 : i32
    %c0_i32_0 = arith.constant 0 : i32
    %c0_i32_1 = arith.constant 0 : i32
    return %c0_i32, %c0_i32_0 : i32, i32
  }
  func.func @transform_3(%arg0: i32) -> (i32, i32) {
    %c0_i32 = arith.constant 0 : i32
    %c0_i32_0 = arith.constant 0 : i32
    %c0_i32_1 = arith.constant 0 : i32
    return %c0_i32, %c0_i32_0 : i32, i32
  }
  func.func @transform_4(%arg0: i32) -> (i32, i32) {
    %c0_i32 = arith.constant 0 : i32
    %c0_i32_0 = arith.constant 0 : i32
    %c0_i32_1 = arith.constant 0 : i32
    return %c0_i32, %c0_i32_0 : i32, i32
  }
  func.func @transform_5(%arg0: i32) -> (i32, i32) {
    %c0_i32 = arith.constant 0 : i32
    %c0_i32_0 = arith.constant 0 : i32
    %c0_i32_1 = arith.constant 0 : i32
    return %c0_i32, %c0_i32_0 : i32, i32
  }
  func.func @transform_6(%arg0: i32) -> (i32, i32) {
    %c0_i32 = arith.constant 0 : i32
    %c0_i32_0 = arith.constant 0 : i32
    %c0_i32_1 = arith.constant 0 : i32
    return %c0_i32, %c0_i32_0 : i32, i32
  }
  func.func @transform_7(%arg0: i32) -> (i32, i32) {
    %c0_i32 = arith.constant 0 : i32
    %c0_i32_0 = arith.constant 0 : i32
    %c0_i32_1 = arith.constant 0 : i32
    return %c0_i32, %c0_i32_0 : i32, i32
  }
  func.func @transform_8(%arg0: i32) -> (i32, i32) {
    %c0_i32 = arith.constant 0 : i32
    %c0_i32_0 = arith.constant 0 : i32
    %c0_i32_1 = arith.constant 0 : i32
    return %c0_i32, %c0_i32_0 : i32, i32
  }
  func.func @transform_9(%arg0: i32) -> (i32, i32) {
    %c0_i32 = arith.constant 0 : i32
    %c0_i32_0 = arith.constant 0 : i32
    return %c0_i32, %arg0 : i32, i32
  }
  func.func @transform_10(%arg0: i32) -> (i32, i32, i32) {
    %c0_i32 = arith.constant 0 : i32
    %c0_i32_0 = arith.constant 0 : i32
    %c0_i32_1 = arith.constant 0 : i32
    %c0_i32_2 = arith.constant 0 : i32
    return %c0_i32, %c0_i32_0, %c0_i32_1 : i32, i32, i32
  }
  func.func @transform_11(%arg0: i32) -> (i32, i32, i32) {
    %c0_i32 = arith.constant 0 : i32
    %c0_i32_0 = arith.constant 0 : i32
    %c0_i32_1 = arith.constant 0 : i32
    %c0_i32_2 = arith.constant 0 : i32
    return %c0_i32, %c0_i32_0, %c0_i32_1 : i32, i32, i32
  }
}

</mosaic_0001>

<bundles_post_ra>
// kernel: lstm_discriminator_forward.1
= control target key start
LH: loop header
LB: loop body
LE: loop exit
PB: predicated region body
PF: predicated region fallthrough
CT: control target
= control target key end

     0   :  { %vm42_vm0 = vcmask 261120   ;;  %v1852_v2 = vmov 0.0   ;;  %s1853_s18 = smov 64   ;;  %s1854_s21 = smov 32   ;;  %s2428_s1 = inlined_call_operand.vmem [shape: bf16[32,128], index: 1, kind: input, shape index: {}]   ;;  %s2429_s2 = inlined_call_operand.vmem [shape: bf16[32,128], index: 2, kind: input, shape index: {}]   ;;  %s2430_s10 = inlined_call_operand.vmem [shape: f32[2,8,32], index: 10, kind: output, shape index: {1}]   ;;  %s2431_s3 = inlined_call_operand.vmem [shape: f32[1,128], index: 3, kind: input, shape index: {}]   ;;  %s2432_s0 = inlined_call_operand.vmem [shape: bf16[64,32], index: 0, kind: input, shape index: {}]   ;;  %s2433_s11 = inlined_call_operand.vmem [shape: f32[2,8,32], index: 11, kind: output, shape index: {2}]   ;;  %s2434_s4 = inlined_call_operand.vmem [shape: bf16[32,128], index: 4, kind: input, shape index: {}]   ;;  %s2435_s6 = inlined_call_operand.vmem [shape: f32[1,128], index: 6, kind: input, shape index: {}]   ;;  %s2436_s5 = inlined_call_operand.vmem [shape: bf16[32,128], index: 5, kind: input, shape index: {}]   ;;  %s2437_s7 = inlined_call_operand.vmem [shape: f32[1,32], index: 7, kind: input, shape index: {}]   ;;  %s2438_s8 = inlined_call_operand.<no memory space> [shape: f32[1,1], index: 8, kind: input, shape index: {}]   ;;  %s2439_s9 = inlined_call_operand.vmem [shape: f32[8,8], index: 9, kind: output, shape index: {0}]  }
   0x1   :  { %v1709_v0 = vld [vmem:[%s2428_s1 + $0x8] sm:$0xff]  ;;  %43 = vst.msk [vmem:[%s2430_s10] sm:$0xff] %vm42_vm0, %v1852_v2  ;;  %v1708_v3 = vld [vmem:[%s2428_s1] sm:$0xff]  ;;  %s1855_s22 = smov 96  }
   0x2   :  { %v1923_v1 = vld [vmem:[%s2429_s2 + $0x8] sm:$0xff]  ;;  %44 = vst.msk [vmem:[%s2430_s10 + $0x8] sm:$0xff] %vm42_vm0, %v1852_v2  ;;  %122 = vmatpush.bf16.msra.mxu0 %v1709_v0  ;;  %v1940_v4 = vld [vmem:[%s2429_s2] sm:$0xff] }
   0x3   :  { %178 = vmatpush.bf16.msra.mxu1 %v1923_v1  ;;  %252 = vmatpush.bf16.msra.mxu2 %v1923_v1  ;;  %v1704_v5 = vld [vmem:[%s2432_s0] sm:$0xff]  ;;  %45 = vst.msk [vmem:[%s2433_s11] sm:$0xff] %vm42_vm0, %v1852_v2 }
   0x4   :  { %327 = vmatpush.bf16.msra.mxu3 %v1923_v1  ;;  %46 = vst.msk [vmem:[%s2433_s11 + $0x8] sm:$0xff] %vm42_vm0, %v1852_v2  ;;  %v1974_v8 = vld [vmem:[%s2431_s3] ss:$0 sm:$0xff] }
   0x6   :  { %123 = vmatpush.bf16.msra.mxu0 %v1708_v3 }
   0x7   :  { %179 = vmatpush.bf16.msra.mxu1 %v1940_v4  ;;  %253 = vmatpush.bf16.msra.mxu2 %v1940_v4 }
   0x8   :  { %v153_v6 = vld [vmem:[%s2430_s10] sm:$0xff]  ;;  %328 = vmatpush.bf16.msra.mxu3 %v1940_v4 }
   0x9   :  { %v156_v7 = vpack.c.bf16 %v153_v6, %v153_v6  ;;  %1604 = vmatmul.msk.bf16.vlgmr.msra.gmra.mxu0 %vm42_vm0, %v1704_v5 }
   0xa   :  { %v154_v15 = vld [vmem:[%s2433_s11] sm:$0xff] }
   0xb   :  { %402 = vmatpush.bf16.msrb.mxu1 %v1923_v1  ;;  %477 = vmatpush.bf16.msrb.mxu2 %v1923_v1 }
   0xc   :  { %552 = vmatpush.bf16.msrb.mxu3 %v1923_v1  ;;  %1616 = vmatmul.msk.bf16.vlgmr.msra.gmra.mxu1 %vm42_vm0, %v156_v7 }
   0xf   :  { %403 = vmatpush.bf16.msrb.mxu1 %v1940_v4  ;;  %478 = vmatpush.bf16.msrb.mxu2 %v1940_v4 }
  0x10   :  { %553 = vmatpush.bf16.msrb.mxu3 %v1940_v4 }
  0x13   :  { %627 = vmatpush.bf16.msra.mxu1 %v1923_v1 }
  0x17   :  { %628 = vmatpush.bf16.msra.mxu1 %v1940_v4 }
  0x86   :  { %v125_v9 = vpop.f32.mrf.mxu0 }
  0x87   :  { %v126_v10 = vadd.f32 %v1974_v8, %v125_v9 }
  0x89   :  { %v181_v11 = vpop.f32.mrf.mxu1 }
  0x8a   :  { %v185_v12 = vadd.f32 %v181_v11, %v126_v10  ;;  %v1705_v10 = vld [vmem:[%s2432_s0 + $0x8] sm:$0xff] }
  0x8b   :  { %1605 = vmatmul.msk.bf16.gmra.mxu0 %vm42_vm0, %v1705_v10 }
  0x8c   :  { %1723 = vtanh.f32 %v185_v12  ;;  %v1617_v16 = vmul.f32 -1.442695, %v185_v12 }
  0x8e   :  { %1725 = vpow2.f32 %v1617_v16  ;;  %v127_v43 = vpop.f32.mrf.mxu0 }
  0x8f   :  { %v128_v44 = vadd.f32 %v1974_v8, %v127_v43 }
  0x91   :  { %v183_v13 = vpop.f32.mrf.mxu1 }
  0x92   :  { %v1724_v14 = vpop.eup %1723 }
  0x93   :  { %212 = vrot.lane.b32.xlu0 %v1724_v14, %s1853_s18 }
  0x94   :  { %v1726_v17 = vpop.eup %1725 }
  0x95   :  { %v189_v18 = vadd.f32 1.0, %v1726_v17 }
  0x97   :  { %1727 = vrcp.f32 %v189_v18  ;;  %v201_v24 = vand.u32 2147483648, %v189_v18  ;;  %vm195_vm2 = vweird.f32 %v189_v18  ;;  %v199_v25 = vand.u32 2147483647, %v189_v18 }
  0x99   :  { %v202_v27 = vor.u32 1.1754944e-38, %v201_v24  ;;  %vm200_vm4 = vcmp.eq.f32.partialorder %v199_v25, 8.507059e+37 }
  0x9b   :  { %207 = vrot.lane.b32.xlu0 %v154_v15, %s1854_s21 }
  0x9d   :  { %v1728_v19 = vpop.eup %1727 }
  0x9e   :  { %v191_v20 = vmul.f32 %v1728_v19, %v189_v18  ;;  %vm196_vm1 = vweird.f32 %v1728_v19 }
  0x9f   :  { %vm197_vm3 = vmor %vm195_vm2, %vm196_vm1 }
  0xa0   :  { %v192_v21 = vsub.f32 1.0, %v191_v20 }
  0xa2   :  { %v193_v22 = vmul.f32 %v1728_v19, %v192_v21 }
  0xa4   :  { %v194_v23 = vadd.f32 %v1728_v19, %v193_v22 }
  0xa6   :  { %v198_v26 = vsel %vm197_vm3, %v1728_v19, %v194_v23 }
  0xa7   :  { %v203_v29 = vsel %vm200_vm4, %v202_v27, %v198_v26 }
 0x105   :  { %v213_v28 = vpop.permute.xlu0 %212 }
 0x106   :  { %v215_v30 = vmul.f32 %v213_v28, %v203_v29 }
 0x108   :  { %217 = vrot.lane.b32.xlu1 %v215_v30, %s1854_s21  ;;  %v130_v14 = vpop.f32.mrf.mxu0 }
 0x109   :  { %v131_v15 = vadd.f32 %v1974_v8, %v130_v14  ;;  %v1706_v14 = vld [vmem:[%s2432_s0 + $0x10] sm:$0xff] }
 0x10a   :  { %1606 = vmatmul.msk.bf16.gmra.mxu0 %vm42_vm0, %v1706_v14 }
 0x10d   :  { %v208_v31 = vpop.permute.xlu0 %207 }
 0x10e   :  { %v210_v32 = vmul.f32 %v208_v31, %v203_v29 }
 0x17a   :  { %v218_v33 = vpop.permute.xlu1 %217 }
 0x17b   :  { %v220_v34 = vadd.f32 %v218_v33, %v210_v32 }
 0x17d   :  { %1729 = vtanh.f32 %v220_v34 }
 0x183   :  { %v1730_v35 = vpop.eup %1729 }
 0x184   :  { %223 = vrot.lane.b32.xlu1 %v1730_v35, %s1853_s18 }
 0x1f6   :  { %v224_v36 = vpop.permute.xlu1 %223 }
 0x1f7   :  { %v226_v37 = vmul.f32 %v224_v36, %v203_v29 }
 0x1f9   :  { %228 = vrot.lane.b32.xlu2 %v226_v37, %s1854_s21 }
 0x201   :  { %233 = vrot.lane.b32.xlu2 %v220_v34, %s1855_s22 }
 0x253   :  { %v229_v38 = vpop.permute.xlu2 %228 }
 0x254   :  { %231 = vst.msk [vmem:[%s2430_s10] sm:$0xff] %vm42_vm0, %v229_v38 }
 0x255   :  { %237 = vst.msk [vmem:[#allocation3] sm:$0xff] %vm42_vm0, %v229_v38 }
 0x25b   :  { %v234_v39 = vpop.permute.xlu2 %233  ;;  %v238_v40 = vld [vmem:[%s2430_s10] sm:$0xff] }
 0x25c   :  { %236 = vst.msk [vmem:[%s2433_s11] sm:$0xff] %vm42_vm0, %v234_v39  ;;  %v242_v41 = vpack.c.bf16 %v238_v40, %v238_v40 }
 0x25e   :  { %1618 = vmatmul.msk.bf16.vlgmr.msra.gmra.mxu2 %vm42_vm0, %v242_v41 }
 0x25f   :  { %702 = vmatpush.bf16.msra.mxu2 %v1923_v1 }
 0x263   :  { %v239_v42 = vld [vmem:[%s2433_s11] sm:$0xff]  ;;  %703 = vmatpush.bf16.msra.mxu2 %v1940_v4 }
 0x264   :  { %281 = vrot.lane.b32.xlu1 %v239_v42, %s1854_s21 }
 0x2d6   :  { %v282_v0 = vpop.permute.xlu1 %281 }
 0x2e1   :  { %v255_v45 = vpop.f32.mrf.mxu2 }
 0x2e2   :  { %v259_v46 = vadd.f32 %v255_v45, %v128_v44 }
 0x2e4   :  { %1731 = vtanh.f32 %v259_v46  ;;  %v1619_v49 = vmul.f32 -1.442695, %v259_v46 }
 0x2e6   :  { %1733 = vpow2.f32 %v1619_v49 }
 0x2e9   :  { %v257_v47 = vpop.f32.mrf.mxu2 }
 0x2ea   :  { %v1732_v48 = vpop.eup %1731  ;;  %v132_v47 = vpop.f32.mrf.mxu0 }
 0x2eb   :  { %286 = vrot.lane.b32.xlu0 %v1732_v48, %s1853_s18  ;;  %v133_v48 = vadd.f32 %v1974_v8, %v132_v47 }
 0x2ec   :  { %v1734_v50 = vpop.eup %1733 }
 0x2ed   :  { %v263_v51 = vadd.f32 1.0, %v1734_v50 }
 0x2ef   :  { %1735 = vrcp.f32 %v263_v51  ;;  %v275_v57 = vand.u32 2147483648, %v263_v51  ;;  %vm269_vm6 = vweird.f32 %v263_v51  ;;  %v273_v58 = vand.u32 2147483647, %v263_v51 }
 0x2f1   :  { %v276_v60 = vor.u32 1.1754944e-38, %v275_v57  ;;  %vm274_vm8 = vcmp.eq.f32.partialorder %v273_v58, 8.507059e+37 }
 0x2f5   :  { %v1736_v52 = vpop.eup %1735 }
 0x2f6   :  { %v265_v53 = vmul.f32 %v1736_v52, %v263_v51  ;;  %vm270_vm5 = vweird.f32 %v1736_v52 }
 0x2f7   :  { %vm271_vm7 = vmor %vm269_vm6, %vm270_vm5 }
 0x2f8   :  { %v266_v54 = vsub.f32 1.0, %v265_v53 }
 0x2fa   :  { %v267_v55 = vmul.f32 %v1736_v52, %v266_v54 }
 0x2fc   :  { %v268_v56 = vadd.f32 %v1736_v52, %v267_v55 }
 0x2fe   :  { %v272_v59 = vsel %vm271_vm7, %v1736_v52, %v268_v56 }
 0x2ff   :  { %v277_v62 = vsel %vm274_vm8, %v276_v60, %v272_v59 }
 0x300   :  { %v284_v1 = vmul.f32 %v282_v0, %v277_v62 }
 0x35d   :  { %v287_v61 = vpop.permute.xlu0 %286 }
 0x35e   :  { %v289_v63 = vmul.f32 %v287_v61, %v277_v62 }
 0x360   :  { %291 = vrot.lane.b32.xlu2 %v289_v63, %s1854_s21 }
 0x3ba   :  { %v292_v2 = vpop.permute.xlu2 %291 }
 0x3bb   :  { %v294_v3 = vadd.f32 %v292_v2, %v284_v1 }
 0x3bd   :  { %1737 = vtanh.f32 %v294_v3  ;;  %307 = vrot.lane.b32.xlu2 %v294_v3, %s1855_s22 }
 0x3c3   :  { %v1738_v4 = vpop.eup %1737 }
 0x3c4   :  { %297 = vrot.lane.b32.xlu0 %v1738_v4, %s1853_s18 }
 0x417   :  { %v308_v5 = vpop.permute.xlu2 %307 }
 0x418   :  { %310 = vst.msk [vmem:[%s2433_s11] sm:$0xff] %vm42_vm0, %v308_v5 }
 0x41f   :  { %v314_v9 = vld [vmem:[%s2433_s11] sm:$0xff] }
 0x436   :  { %v298_v6 = vpop.permute.xlu0 %297 }
 0x437   :  { %v300_v7 = vmul.f32 %v298_v6, %v277_v62 }
 0x439   :  { %302 = vrot.lane.b32.xlu1 %v300_v7, %s1854_s21 }
 0x441   :  { %356 = vrot.lane.b32.xlu1 %v314_v9, %s1854_s21 }
 0x4ab   :  { %v303_v11 = vpop.permute.xlu1 %302 }
 0x4ac   :  { %305 = vst.msk [vmem:[%s2430_s10] sm:$0xff] %vm42_vm0, %v303_v11 }
 0x4ad   :  { %312 = vst.msk [vmem:[#allocation3 + $0x8] sm:$0xff] %vm42_vm0, %v303_v11 }
 0x4b3   :  { %v313_v12 = vld [vmem:[%s2430_s10] sm:$0xff]  ;;  %v357_v35 = vpop.permute.xlu1 %356 }
 0x4b4   :  { %v317_v13 = vpack.c.bf16 %v313_v12, %v313_v12 }
 0x4b6   :  { %1620 = vmatmul.msk.bf16.vlgmr.msra.gmra.mxu3 %vm42_vm0, %v317_v13 }
 0x539   :  { %v330_v16 = vpop.f32.mrf.mxu3 }
 0x53a   :  { %v334_v17 = vadd.f32 %v330_v16, %v131_v15 }
 0x53c   :  { %1739 = vtanh.f32 %v334_v17  ;;  %v1621_v20 = vmul.f32 -1.442695, %v334_v17 }
 0x53e   :  { %1741 = vpow2.f32 %v1621_v20 }
 0x541   :  { %v332_v18 = vpop.f32.mrf.mxu3 }
 0x542   :  { %v1740_v19 = vpop.eup %1739  ;;  %v135_v18 = vpop.f32.mrf.mxu0 }
 0x543   :  { %361 = vrot.lane.b32.xlu0 %v1740_v19, %s1853_s18  ;;  %v136_v19 = vadd.f32 %v1974_v8, %v135_v18 }
 0x544   :  { %v1742_v21 = vpop.eup %1741 }
 0x545   :  { %v338_v22 = vadd.f32 1.0, %v1742_v21 }
 0x547   :  { %1743 = vrcp.f32 %v338_v22  ;;  %v350_v28 = vand.u32 2147483648, %v338_v22  ;;  %vm344_vm10 = vweird.f32 %v338_v22  ;;  %v348_v29 = vand.u32 2147483647, %v338_v22 }
 0x549   :  { %v351_v31 = vor.u32 1.1754944e-38, %v350_v28  ;;  %vm349_vm12 = vcmp.eq.f32.partialorder %v348_v29, 8.507059e+37 }
 0x54d   :  { %v1744_v23 = vpop.eup %1743 }
 0x54e   :  { %v340_v24 = vmul.f32 %v1744_v23, %v338_v22  ;;  %vm345_vm9 = vweird.f32 %v1744_v23 }
 0x54f   :  { %vm346_vm11 = vmor %vm344_vm10, %vm345_vm9 }
 0x550   :  { %v341_v25 = vsub.f32 1.0, %v340_v24 }
 0x552   :  { %v342_v26 = vmul.f32 %v1744_v23, %v341_v25 }
 0x554   :  { %v343_v27 = vadd.f32 %v1744_v23, %v342_v26 }
 0x556   :  { %v347_v30 = vsel %vm346_vm11, %v1744_v23, %v343_v27 }
 0x557   :  { %v352_v33 = vsel %vm349_vm12, %v351_v31, %v347_v30 }
 0x558   :  { %v359_v36 = vmul.f32 %v357_v35, %v352_v33 }
 0x5b5   :  { %v362_v32 = vpop.permute.xlu0 %361 }
 0x5b6   :  { %v364_v34 = vmul.f32 %v362_v32, %v352_v33 }
 0x5b8   :  { %366 = vrot.lane.b32.xlu2 %v364_v34, %s1854_s21 }
 0x612   :  { %v367_v37 = vpop.permute.xlu2 %366 }
 0x613   :  { %v369_v38 = vadd.f32 %v367_v37, %v359_v36 }
 0x615   :  { %1745 = vtanh.f32 %v369_v38  ;;  %382 = vrot.lane.b32.xlu2 %v369_v38, %s1855_s22 }
 0x61b   :  { %v1746_v39 = vpop.eup %1745 }
 0x61c   :  { %372 = vrot.lane.b32.xlu0 %v1746_v39, %s1853_s18 }
 0x66f   :  { %v383_v40 = vpop.permute.xlu2 %382 }
 0x670   :  { %385 = vst.msk [vmem:[%s2433_s11] sm:$0xff] %vm42_vm0, %v383_v40 }
 0x677   :  { %v389_v43 = vld [vmem:[%s2433_s11] sm:$0xff] }
 0x68e   :  { %v373_v41 = vpop.permute.xlu0 %372 }
 0x68f   :  { %v375_v42 = vmul.f32 %v373_v41, %v352_v33 }
 0x691   :  { %377 = vrot.lane.b32.xlu1 %v375_v42, %s1854_s21 }
 0x699   :  { %431 = vrot.lane.b32.xlu1 %v389_v43, %s1854_s21 }
 0x703   :  { %v378_v44 = vpop.permute.xlu1 %377 }
 0x704   :  { %380 = vst.msk [vmem:[%s2430_s10] sm:$0xff] %vm42_vm0, %v378_v44 }
 0x705   :  { %387 = vst.msk [vmem:[#allocation3 + $0x10] sm:$0xff] %vm42_vm0, %v378_v44 }
 0x70b   :  { %v388_v45 = vld [vmem:[%s2430_s10] sm:$0xff]  ;;  %v432_v4 = vpop.permute.xlu1 %431 }
 0x70c   :  { %v392_v46 = vpack.c.bf16 %v388_v45, %v388_v45 }
 0x70e   :  { %1622 = vmatmul.msk.bf16.vlgmr.msrb.gmra.mxu1 %vm42_vm0, %v392_v46 }
 0x78b   :  { %v405_v49 = vpop.f32.mrf.mxu1 }
 0x78c   :  { %v409_v50 = vadd.f32 %v405_v49, %v133_v48  ;;  %v1711_v48 = vld [vmem:[%s2434_s4 + $0x8] sm:$0xff]  ;;  %v1710_v49 = vld [vmem:[%s2434_s4] sm:$0xff] }
 0x78d   :  { %813 = vmatpush.bf16.msra.mxu3 %v1711_v48 }
 0x78e   :  { %1747 = vtanh.f32 %v409_v50  ;;  %v1623_v53 = vmul.f32 -1.442695, %v409_v50 }
 0x790   :  { %1749 = vpow2.f32 %v1623_v53  ;;  %v764_v53 = vld [vmem:[#allocation3 + $0x8] sm:$0xff] }
 0x791   :  { %814 = vmatpush.bf16.msra.mxu3 %v1710_v49  ;;  %v1645_v49 = vld [vmem:[%s2433_s11 + $0x8] sm:$0xff] }
 0x793   :  { %v407_v51 = vpop.f32.mrf.mxu1 }
 0x794   :  { %v1748_v52 = vpop.eup %1747 }
 0x795   :  { %436 = vrot.lane.b32.xlu0 %v1748_v52, %s1853_s18 }
 0x796   :  { %v1750_v54 = vpop.eup %1749 }
 0x797   :  { %v413_v55 = vadd.f32 1.0, %v1750_v54  ;;  %v763_v54 = vld [vmem:[#allocation3] sm:$0xff] }
 0x799   :  { %1751 = vrcp.f32 %v413_v55  ;;  %v425_v61 = vand.u32 2147483648, %v413_v55  ;;  %vm419_vm14 = vweird.f32 %v413_v55  ;;  %v423_v62 = vand.u32 2147483647, %v413_v55 }
 0x79b   :  { %v426_v0 = vor.u32 1.1754944e-38, %v425_v61  ;;  %vm424_vm1 = vcmp.eq.f32.partialorder %v423_v62, 8.507059e+37 }
 0x79f   :  { %v1752_v56 = vpop.eup %1751 }
 0x7a0   :  { %v415_v57 = vmul.f32 %v1752_v56, %v413_v55  ;;  %vm420_vm13 = vweird.f32 %v1752_v56  ;;  %v771_v55 = vpack.c.bf16 %v764_v53, %v763_v54 }
 0x7a1   :  { %vm421_vm15 = vmor %vm419_vm14, %vm420_vm13 }
 0x7a2   :  { %v416_v58 = vsub.f32 1.0, %v415_v57  ;;  %v765_v57 = vld [vmem:[#allocation3 + $0x10] sm:$0xff] }
 0x7a4   :  { %v417_v59 = vmul.f32 %v1752_v56, %v416_v58 }
 0x7a6   :  { %v418_v60 = vadd.f32 %v1752_v56, %v417_v59  ;;  %v137_v59 = vpop.f32.mrf.mxu0 }
 0x7a8   :  { %v422_v63 = vsel %vm421_vm15, %v1752_v56, %v418_v60  ;;  %v138_v60 = vadd.f32 %v1974_v8, %v137_v59 }
 0x7a9   :  { %v427_v2 = vsel %vm424_vm1, %v426_v0, %v422_v63 }
 0x7aa   :  { %v434_v5 = vmul.f32 %v432_v4, %v427_v2 }
 0x807   :  { %v437_v1 = vpop.permute.xlu0 %436 }
 0x808   :  { %v439_v3 = vmul.f32 %v437_v1, %v427_v2 }
 0x80a   :  { %441 = vrot.lane.b32.xlu2 %v439_v3, %s1854_s21 }
 0x864   :  { %v442_v6 = vpop.permute.xlu2 %441 }
 0x865   :  { %v444_v7 = vadd.f32 %v442_v6, %v434_v5 }
 0x867   :  { %1753 = vtanh.f32 %v444_v7  ;;  %457 = vrot.lane.b32.xlu2 %v444_v7, %s1855_s22 }
 0x86d   :  { %v1754_v9 = vpop.eup %1753 }
 0x86e   :  { %447 = vrot.lane.b32.xlu0 %v1754_v9, %s1853_s18 }
 0x8c1   :  { %v458_v10 = vpop.permute.xlu2 %457 }
 0x8c2   :  { %460 = vst.msk [vmem:[%s2433_s11] sm:$0xff] %vm42_vm0, %v458_v10 }
 0x8c9   :  { %v464_v13 = vld [vmem:[%s2433_s11] sm:$0xff] }
 0x8e0   :  { %v448_v11 = vpop.permute.xlu0 %447 }
 0x8e1   :  { %v450_v12 = vmul.f32 %v448_v11, %v427_v2 }
 0x8e3   :  { %452 = vrot.lane.b32.xlu1 %v450_v12, %s1854_s21 }
 0x8eb   :  { %506 = vrot.lane.b32.xlu1 %v464_v13, %s1854_s21 }
 0x955   :  { %v453_v15 = vpop.permute.xlu1 %452 }
 0x956   :  { %455 = vst.msk [vmem:[%s2430_s10] sm:$0xff] %vm42_vm0, %v453_v15 }
 0x957   :  { %462 = vst.msk [vmem:[#allocation3 + $0x18] sm:$0xff] %vm42_vm0, %v453_v15 }
 0x95d   :  { %v463_v16 = vld [vmem:[%s2430_s10] sm:$0xff]  ;;  %v507_v39 = vpop.permute.xlu1 %506 }
 0x95e   :  { %v467_v17 = vpack.c.bf16 %v463_v16, %v463_v16  ;;  %v766_v56 = vld [vmem:[#allocation3 + $0x18] sm:$0xff] }
 0x95f   :  { %v772_v58 = vpack.c.bf16 %v766_v56, %v765_v57 }
 0x960   :  { %1624 = vmatmul.msk.bf16.vlgmr.msrb.gmra.mxu2 %vm42_vm0, %v467_v17 }
 0x9e3   :  { %v480_v20 = vpop.f32.mrf.mxu2 }
 0x9e4   :  { %v484_v21 = vadd.f32 %v480_v20, %v136_v19 }
 0x9e6   :  { %1755 = vtanh.f32 %v484_v21  ;;  %v1625_v24 = vmul.f32 -1.442695, %v484_v21 }
 0x9e8   :  { %1757 = vpow2.f32 %v1625_v24 }
 0x9eb   :  { %v482_v22 = vpop.f32.mrf.mxu2 }
 0x9ec   :  { %v1756_v23 = vpop.eup %1755 }
 0x9ed   :  { %511 = vrot.lane.b32.xlu0 %v1756_v23, %s1853_s18 }
 0x9ee   :  { %v1758_v25 = vpop.eup %1757 }
 0x9ef   :  { %v488_v26 = vadd.f32 1.0, %v1758_v25 }
 0x9f1   :  { %1759 = vrcp.f32 %v488_v26  ;;  %v500_v32 = vand.u32 2147483648, %v488_v26  ;;  %vm494_vm3 = vweird.f32 %v488_v26  ;;  %v498_v33 = vand.u32 2147483647, %v488_v26 }
 0x9f3   :  { %v501_v35 = vor.u32 1.1754944e-38, %v500_v32  ;;  %vm499_vm5 = vcmp.eq.f32.partialorder %v498_v33, 8.507059e+37 }
 0x9f7   :  { %v1760_v27 = vpop.eup %1759 }
 0x9f8   :  { %v490_v28 = vmul.f32 %v1760_v27, %v488_v26  ;;  %vm495_vm2 = vweird.f32 %v1760_v27  ;;  %v1707_v26 = vld [vmem:[%s2432_s0 + $0x18] sm:$0xff] }
 0x9f9   :  { %vm496_vm4 = vmor %vm494_vm3, %vm495_vm2  ;;  %1607 = vmatmul.msk.bf16.gmra.mxu0 %vm42_vm0, %v1707_v26 }
 0x9fa   :  { %v491_v29 = vsub.f32 1.0, %v490_v28  ;;  %v2140_v28 = vld [vmem:[%s2436_s5] sm:$0xff] }
 0x9fc   :  { %v492_v30 = vmul.f32 %v1760_v27, %v491_v29 }
 0x9fe   :  { %v493_v31 = vadd.f32 %v1760_v27, %v492_v30 }
 0xa00   :  { %v497_v34 = vsel %vm496_vm4, %v1760_v27, %v493_v31  ;;  %v2134_v27 = vld [vmem:[%s2436_s5 + $0x8] sm:$0xff] }
 0xa01   :  { %v502_v37 = vsel %vm499_vm5, %v501_v35, %v497_v34  ;;  %871 = vmatpush.bf16.msrb.mxu1 %v2134_v27  ;;  %944 = vmatpush.bf16.msrb.mxu2 %v2134_v27  ;;  %v1644_v35 = vld [vmem:[%s2430_s10 + $0x8] sm:$0xff] }
 0xa02   :  { %v509_v40 = vmul.f32 %v507_v39, %v502_v37  ;;  %1017 = vmatpush.bf16.msrb.mxu0 %v2134_v27 }
 0xa05   :  { %872 = vmatpush.bf16.msrb.mxu1 %v2140_v28  ;;  %945 = vmatpush.bf16.msrb.mxu2 %v2140_v28 }
 0xa06   :  { %1018 = vmatpush.bf16.msrb.mxu0 %v2140_v28 }
 0xa0a   :  { %1236 = vmatpush.bf16.msra.mxu0 %v2134_v27 }
 0xa0e   :  { %1237 = vmatpush.bf16.msra.mxu0 %v2140_v28 }
 0xa5f   :  { %v512_v36 = vpop.permute.xlu0 %511 }
 0xa60   :  { %v514_v38 = vmul.f32 %v512_v36, %v502_v37  ;;  %v849_v36 = vpack.c.bf16 %v1644_v35, %v1644_v35 }
 0xa62   :  { %516 = vrot.lane.b32.xlu2 %v514_v38, %s1854_s21 }
 0xabc   :  { %v517_v41 = vpop.permute.xlu2 %516 }
 0xabd   :  { %v519_v42 = vadd.f32 %v517_v41, %v509_v40 }
 0xabf   :  { %1761 = vtanh.f32 %v519_v42  ;;  %532 = vrot.lane.b32.xlu2 %v519_v42, %s1855_s22 }
 0xac5   :  { %v1762_v43 = vpop.eup %1761 }
 0xac6   :  { %522 = vrot.lane.b32.xlu0 %v1762_v43, %s1853_s18  ;;  %v2172_v43 = vld [vmem:[%s2435_s6] ss:$0 sm:$0xff] }
 0xb19   :  { %v533_v44 = vpop.permute.xlu2 %532 }
 0xb1a   :  { %535 = vst.msk [vmem:[%s2433_s11] sm:$0xff] %vm42_vm0, %v533_v44 }
 0xb21   :  { %v539_v47 = vld [vmem:[%s2433_s11] sm:$0xff] }
 0xb38   :  { %v523_v45 = vpop.permute.xlu0 %522 }
 0xb39   :  { %v525_v46 = vmul.f32 %v523_v45, %v502_v37  ;;  %v140_v37 = vpop.f32.mrf.mxu0 }
 0xb3a   :  { %v141_v38 = vadd.f32 %v1974_v8, %v140_v37 }
 0xb3b   :  { %527 = vrot.lane.b32.xlu1 %v525_v46, %s1854_s21 }
 0xb43   :  { %581 = vrot.lane.b32.xlu1 %v539_v47, %s1854_s21 }
 0xbad   :  { %v528_v50 = vpop.permute.xlu1 %527 }
 0xbae   :  { %530 = vst.msk [vmem:[%s2430_s10] sm:$0xff] %vm42_vm0, %v528_v50 }
 0xbaf   :  { %537 = vst.msk [vmem:[#allocation3 + $0x20] sm:$0xff] %vm42_vm0, %v528_v50 }
 0xbb5   :  { %v538_v51 = vld [vmem:[%s2430_s10] sm:$0xff]  ;;  %v582_v17 = vpop.permute.xlu1 %581 }
 0xbb6   :  { %v542_v52 = vpack.c.bf16 %v538_v51, %v538_v51  ;;  %v767_v32 = vld [vmem:[#allocation3 + $0x20] sm:$0xff] }
 0xbb8   :  { %1626 = vmatmul.msk.bf16.vlgmr.msrb.gmra.mxu3 %vm42_vm0, %v542_v52 }
 0xbc8   :  { %1640 = vmatmul.msk.bf16.vlgmr.msra.gmra.mxu3 %vm42_vm0, %v771_v55 }
 0xbd8   :  { %1641 = vmatmul.msk.bf16.gmra.mxu3 %vm42_vm0, %v772_v58 }
 0xc3b   :  { %v555_v61 = vpop.f32.mrf.mxu3 }
 0xc3c   :  { %v559_v62 = vadd.f32 %v555_v61, %v138_v60 }
 0xc3e   :  { %1763 = vtanh.f32 %v559_v62  ;;  %v1627_v1 = vmul.f32 -1.442695, %v559_v62 }
 0xc40   :  { %1765 = vpow2.f32 %v1627_v1 }
 0xc43   :  { %v557_v63 = vpop.f32.mrf.mxu3 }
 0xc44   :  { %v1764_v0 = vpop.eup %1763 }
 0xc45   :  { %586 = vrot.lane.b32.xlu0 %v1764_v0, %s1853_s18 }
 0xc46   :  { %v1766_v2 = vpop.eup %1765 }
 0xc47   :  { %v563_v3 = vadd.f32 1.0, %v1766_v2 }
 0xc49   :  { %1767 = vrcp.f32 %v563_v3  ;;  %v575_v10 = vand.u32 2147483648, %v563_v3  ;;  %vm569_vm7 = vweird.f32 %v563_v3  ;;  %v573_v11 = vand.u32 2147483647, %v563_v3 }
 0xc4b   :  { %v576_v13 = vor.u32 1.1754944e-38, %v575_v10  ;;  %vm574_vm9 = vcmp.eq.f32.partialorder %v573_v11, 8.507059e+37  ;;  %v816_v44 = vpop.f32.mrf.mxu3 }
 0xc4c   :  { %v817_v45 = vadd.f32 %v2172_v43, %v816_v44 }
 0xc4f   :  { %v1768_v4 = vpop.eup %1767 }
 0xc50   :  { %v565_v5 = vmul.f32 %v1768_v4, %v563_v3  ;;  %vm570_vm6 = vweird.f32 %v1768_v4 }
 0xc51   :  { %vm571_vm8 = vmor %vm569_vm7, %vm570_vm6 }
 0xc52   :  { %v566_v6 = vsub.f32 1.0, %v565_v5 }
 0xc53   :  { %v818_v44 = vpop.f32.mrf.mxu3 }
 0xc54   :  { %v567_v7 = vmul.f32 %v1768_v4, %v566_v6 }
 0xc56   :  { %v568_v9 = vadd.f32 %v1768_v4, %v567_v7 }
 0xc58   :  { %v572_v12 = vsel %vm571_vm8, %v1768_v4, %v568_v9 }
 0xc59   :  { %v577_v15 = vsel %vm574_vm9, %v576_v13, %v572_v12 }
 0xc5a   :  { %v584_v18 = vmul.f32 %v582_v17, %v577_v15 }
 0xcb7   :  { %v587_v14 = vpop.permute.xlu0 %586 }
 0xcb8   :  { %v589_v16 = vmul.f32 %v587_v14, %v577_v15 }
 0xcba   :  { %591 = vrot.lane.b32.xlu2 %v589_v16, %s1854_s21 }
 0xd14   :  { %v592_v19 = vpop.permute.xlu2 %591 }
 0xd15   :  { %v594_v20 = vadd.f32 %v592_v19, %v584_v18 }
 0xd17   :  { %1769 = vtanh.f32 %v594_v20  ;;  %607 = vrot.lane.b32.xlu2 %v594_v20, %s1855_s22 }
 0xd1d   :  { %v1770_v21 = vpop.eup %1769 }
 0xd1e   :  { %597 = vrot.lane.b32.xlu0 %v1770_v21, %s1853_s18 }
 0xd71   :  { %v608_v22 = vpop.permute.xlu2 %607 }
 0xd72   :  { %610 = vst.msk [vmem:[%s2433_s11] sm:$0xff] %vm42_vm0, %v608_v22 }
 0xd79   :  { %v614_v23 = vld [vmem:[%s2433_s11] sm:$0xff] }
 0xd7a   :  { %656 = vrot.lane.b32.xlu2 %v614_v23, %s1854_s21 }
 0xd90   :  { %v598_v24 = vpop.permute.xlu0 %597 }
 0xd91   :  { %v600_v25 = vmul.f32 %v598_v24, %v577_v15 }
 0xd93   :  { %602 = vrot.lane.b32.xlu1 %v600_v25, %s1854_s21 }
 0xdd4   :  { %v657_v17 = vpop.permute.xlu2 %656 }
 0xe05   :  { %v603_v29 = vpop.permute.xlu1 %602 }
 0xe06   :  { %605 = vst.msk [vmem:[%s2430_s10] sm:$0xff] %vm42_vm0, %v603_v29 }
 0xe07   :  { %612 = vst.msk [vmem:[#allocation3 + $0x28] sm:$0xff] %vm42_vm0, %v603_v29 }
 0xe0d   :  { %v613_v30 = vld [vmem:[%s2430_s10] sm:$0xff] }
 0xe0e   :  { %v617_v31 = vpack.c.bf16 %v613_v30, %v613_v30  ;;  %v768_v33 = vld [vmem:[#allocation3 + $0x28] sm:$0xff] }
 0xe0f   :  { %v773_v34 = vpack.c.bf16 %v768_v33, %v767_v32 }
 0xe10   :  { %1628 = vmatmul.msk.bf16.vlgmr.msra.gmra.mxu1 %vm42_vm0, %v617_v31 }
 0xe11   :  { %1642 = vmatmul.msk.bf16.gmra.mxu3 %vm42_vm0, %v773_v34  ;;  %1090 = vmatpush.bf16.msra.mxu1 %v2134_v27 }
 0xe15   :  { %1091 = vmatpush.bf16.msra.mxu1 %v2140_v28 }
 0xe20   :  { %1654 = vmatmul.msk.bf16.vlgmr.msrb.gmra.mxu1 %vm42_vm0, %v849_v36 }
 0xe21   :  { %1309 = vmatpush.bf16.msrb.mxu1 %v2134_v27 }
 0xe25   :  { %1310 = vmatpush.bf16.msrb.mxu1 %v2140_v28 }
 0xe8d   :  { %v630_v39 = vpop.f32.mrf.mxu1 }
 0xe8e   :  { %v634_v40 = vadd.f32 %v630_v39, %v141_v38 }
 0xe90   :  { %1771 = vtanh.f32 %v634_v40  ;;  %v1629_v50 = vmul.f32 -1.442695, %v634_v40 }
 0xe95   :  { %v632_v41 = vpop.f32.mrf.mxu1 }
 0xe96   :  { %v1772_v42 = vpop.eup %1771 }
 0xe97   :  { %661 = vrot.lane.b32.xlu0 %v1772_v42, %s1853_s18 }
 0xe9d   :  { %v874_v46 = vpop.f32.mrf.mxu1 }
 0xe9e   :  { %v878_v47 = vadd.f32 %v874_v46, %v817_v45  ;;  %v819_v45 = vadd.f32 %v2172_v43, %v818_v44 }
 0xea0   :  { %1773 = vtanh.f32 %v878_v47  ;;  %v1655_v53 = vmul.f32 -1.442695, %v878_v47 }
 0xea1   :  { %1775 = vpow2.f32 %v1629_v50 }
 0xea5   :  { %v876_v48 = vpop.f32.mrf.mxu1 }
 0xea6   :  { %v1774_v8 = vpop.eup %1773 }
 0xea7   :  { %905 = vrot.lane.b32.xlu1 %v1774_v8, %s1853_s18  ;;  %v1776_v51 = vpop.eup %1775 }
 0xea8   :  { %v638_v52 = vadd.f32 1.0, %v1776_v51 }
 0xeaa   :  { %1777 = vrcp.f32 %v638_v52  ;;  %v650_v62 = vand.u32 2147483648, %v638_v52  ;;  %vm644_vm11 = vweird.f32 %v638_v52  ;;  %v648_v63 = vand.u32 2147483647, %v638_v52 }
 0xeab   :  { %1779 = vpow2.f32 %v1655_v53 }
 0xeac   :  { %v651_v2 = vor.u32 1.1754944e-38, %v650_v62  ;;  %vm649_vm13 = vcmp.eq.f32.partialorder %v648_v63, 8.507059e+37 }
 0xeaf   :  { %900 = vrot.lane.b32.xlu1 %v1645_v49, %s1854_s21 }
 0xeb0   :  { %v1778_v54 = vpop.eup %1777 }
 0xeb1   :  { %v1780_v55 = vpop.eup %1779  ;;  %v640_v56 = vmul.f32 %v1778_v54, %v638_v52  ;;  %vm645_vm10 = vweird.f32 %v1778_v54 }
 0xeb2   :  { %v882_v57 = vadd.f32 1.0, %v1780_v55  ;;  %vm646_vm12 = vmor %vm644_vm11, %vm645_vm10 }
 0xeb3   :  { %v641_v58 = vsub.f32 1.0, %v640_v56 }
 0xeb4   :  { %1781 = vrcp.f32 %v882_v57  ;;  %v894_v10 = vand.u32 2147483648, %v882_v57  ;;  %vm888_vm15 = vweird.f32 %v882_v57  ;;  %v892_v11 = vand.u32 2147483647, %v882_v57 }
 0xeb5   :  { %v642_v59 = vmul.f32 %v1778_v54, %v641_v58 }
 0xeb6   :  { %v895_v13 = vor.u32 1.1754944e-38, %v894_v10  ;;  %vm893_vm2 = vcmp.eq.f32.partialorder %v892_v11, 8.507059e+37  ;;  %v2245_v11 = vpop.f32.mrf.mxu0 }
 0xeb7   :  { %v643_v60 = vadd.f32 %v1778_v54, %v642_v59 }
 0xeb9   :  { %v647_v0 = vsel %vm646_vm12, %v1778_v54, %v643_v60 }
 0xeba   :  { %v1782_v61 = vpop.eup %1781  ;;  %v652_v4 = vsel %vm649_vm13, %v651_v2, %v647_v0 }
 0xebb   :  { %v884_v1 = vmul.f32 %v1782_v61, %v882_v57  ;;  %vm889_vm14 = vweird.f32 %v1782_v61  ;;  %v659_v22 = vmul.f32 %v657_v17, %v652_v4 }
 0xebc   :  { %vm890_vm1 = vmor %vm888_vm15, %vm889_vm14 }
 0xebd   :  { %v885_v6 = vsub.f32 1.0, %v884_v1 }
 0xebf   :  { %v886_v7 = vmul.f32 %v1782_v61, %v885_v6 }
 0xec1   :  { %v887_v9 = vadd.f32 %v1782_v61, %v886_v7 }
 0xec3   :  { %v891_v12 = vsel %vm890_vm1, %v1782_v61, %v887_v9 }
 0xec4   :  { %v896_v15 = vsel %vm893_vm2, %v895_v13, %v891_v12  ;;  %v821_v12 = vpop.f32.mrf.mxu3 }
 0xec5   :  { %v822_v13 = vadd.f32 %v2172_v43, %v821_v12 }
 0xf09   :  { %v662_v3 = vpop.permute.xlu0 %661 }
 0xf0a   :  { %v664_v5 = vmul.f32 %v662_v3, %v652_v4 }
 0xf0c   :  { %666 = vrot.lane.b32.xlu0 %v664_v5, %s1854_s21 }
 0xf19   :  { %v906_v14 = vpop.permute.xlu1 %905 }
 0xf1a   :  { %v908_v16 = vmul.f32 %v906_v14, %v896_v15 }
 0xf1c   :  { %910 = vrot.lane.b32.xlu2 %v908_v16, %s1854_s21 }
 0xf21   :  { %v901_v18 = vpop.permute.xlu1 %900 }
 0xf22   :  { %v903_v19 = vmul.f32 %v901_v18, %v896_v15 }
 0xf76   :  { %v911_v20 = vpop.permute.xlu2 %910 }
 0xf77   :  { %v913_v21 = vadd.f32 %v911_v20, %v903_v19 }
 0xf79   :  { %1783 = vtanh.f32 %v913_v21 }
 0xf7e   :  { %v667_v23 = vpop.permute.xlu0 %666 }
 0xf7f   :  { %v1784_v24 = vpop.eup %1783  ;;  %v2182_v25 = vadd.f32 %v667_v23, %v659_v22 }
 0xf80   :  { %916 = vrot.lane.b32.xlu1 %v1784_v24, %s1853_s18 }
 0xf81   :  { %1785 = vtanh.f32 %v2182_v25 }
 0xf87   :  { %v1786_v26 = vpop.eup %1785 }
 0xf88   :  { %672 = vrot.lane.b32.xlu0 %v1786_v26, %s1853_s18  ;;  %926 = vrot.lane.b32.xlu1 %v913_v21, %s1855_s22 }
 0xff2   :  { %v917_v29 = vpop.permute.xlu1 %916 }
 0xff3   :  { %v919_v30 = vmul.f32 %v917_v29, %v896_v15 }
 0xff5   :  { %921 = vrot.lane.b32.xlu0 %v919_v30, %s1854_s21 }
 0xffa   :  { %v673_v31 = vpop.permute.xlu0 %672  ;;  %v927_v32 = vpop.permute.xlu1 %926 }
 0xffb   :  { %v675_v33 = vmul.f32 %v673_v31, %v652_v4  ;;  %1657 = vst.msk [vmem:[%s2433_s11 + $0x8] sm:$0xff] %vm42_vm0, %v927_v32 }
 0xffd   :  { %677 = vrot.lane.b32.xlu2 %v675_v33, %s1854_s21 }
0x1002   :  { %v1659_v34 = vld [vmem:[%s2433_s11 + $0x8] sm:$0xff] }
0x1003   :  { %973 = vrot.lane.b32.xlu0 %v1659_v34, %s1854_s21 }
0x1057   :  { %v678_v35 = vpop.permute.xlu2 %677 }
0x1058   :  { %680 = vst.msk [vmem:[%s2430_s10] sm:$0xff] %vm42_vm0, %v678_v35 }
0x1059   :  { %687 = vst.msk [vmem:[#allocation3 + $0x30] sm:$0xff] %vm42_vm0, %v678_v35 }
0x105f   :  { %v688_v36 = vld [vmem:[%s2430_s10] sm:$0xff] }
0x1060   :  { %v692_v37 = vpack.c.bf16 %v688_v36, %v688_v36 }
0x1062   :  { %1630 = vmatmul.msk.bf16.vlgmr.msra.gmra.mxu2 %vm42_vm0, %v692_v37 }
0x1063   :  { %1163 = vmatpush.bf16.msra.mxu2 %v2134_v27 }
0x1067   :  { %v922_v38 = vpop.permute.xlu0 %921  ;;  %1164 = vmatpush.bf16.msra.mxu2 %v2140_v28 }
0x1068   :  { %1656 = vst.msk [vmem:[%s2430_s10 + $0x8] sm:$0xff] %vm42_vm0, %v922_v38 }
0x1069   :  { %930 = vst.msk [vmem:[#allocation3] sm:$0xff] %vm42_vm0, %v922_v38 }
0x106f   :  { %v1658_v39 = vld [vmem:[%s2430_s10 + $0x8] sm:$0xff] }
0x1070   :  { %v934_v40 = vpack.c.bf16 %v1658_v39, %v1658_v39 }
0x1072   :  { %1660 = vmatmul.msk.bf16.vlgmr.msrb.gmra.mxu2 %vm42_vm0, %v934_v40 }
0x1073   :  { %1382 = vmatpush.bf16.msrb.mxu2 %v2134_v27 }
0x1075   :  { %v974_v62 = vpop.permute.xlu0 %973 }
0x1077   :  { %1383 = vmatpush.bf16.msrb.mxu2 %v2140_v28 }
0x10e5   :  { %v2220_v41 = vpop.f32.mrf.mxu2 }
0x10ed   :  { %v707_v42 = vpop.f32.mrf.mxu2 }
0x10f5   :  { %v947_v46 = vpop.f32.mrf.mxu2 }
0x10f6   :  { %v951_v47 = vadd.f32 %v947_v46, %v819_v45 }
0x10f8   :  { %1787 = vtanh.f32 %v951_v47  ;;  %v1661_v49 = vmul.f32 -1.442695, %v951_v47 }
0x10fa   :  { %1789 = vpow2.f32 %v1661_v49  ;;  %v823_v49 = vpop.f32.mrf.mxu3 }
0x10fd   :  { %v949_v48 = vpop.f32.mrf.mxu2 }
0x10fe   :  { %v1788_v8 = vpop.eup %1787 }
0x10ff   :  { %978 = vrot.lane.b32.xlu2 %v1788_v8, %s1853_s18 }
0x1100   :  { %v1790_v50 = vpop.eup %1789 }
0x1101   :  { %v955_v51 = vadd.f32 1.0, %v1790_v50  ;;  %v824_v50 = vadd.f32 %v2172_v43, %v823_v49 }
0x1103   :  { %1791 = vrcp.f32 %v955_v51  ;;  %v967_v55 = vand.u32 2147483648, %v955_v51  ;;  %vm961_vm4 = vweird.f32 %v955_v51  ;;  %v965_v56 = vand.u32 2147483647, %v955_v51 }
0x1105   :  { %v968_v58 = vor.u32 1.1754944e-38, %v967_v55  ;;  %vm966_vm6 = vcmp.eq.f32.partialorder %v965_v56, 8.507059e+37 }
0x1109   :  { %v1792_v27 = vpop.eup %1791 }
0x110a   :  { %v957_v28 = vmul.f32 %v1792_v27, %v955_v51  ;;  %vm962_vm3 = vweird.f32 %v1792_v27 }
0x110b   :  { %vm963_vm5 = vmor %vm961_vm4, %vm962_vm3 }
0x110c   :  { %v958_v52 = vsub.f32 1.0, %v957_v28 }
0x110e   :  { %v959_v53 = vmul.f32 %v1792_v27, %v958_v52 }
0x1110   :  { %v960_v54 = vadd.f32 %v1792_v27, %v959_v53 }
0x1112   :  { %v964_v57 = vsel %vm963_vm5, %v1792_v27, %v960_v54 }
0x1113   :  { %v969_v60 = vsel %vm966_vm6, %v968_v58, %v964_v57 }
0x1114   :  { %v976_v63 = vmul.f32 %v974_v62, %v969_v60 }
0x1159   :  { %v979_v59 = vpop.permute.xlu2 %978 }
0x115a   :  { %v981_v61 = vmul.f32 %v979_v59, %v969_v60 }
0x115c   :  { %983 = vrot.lane.b32.xlu1 %v981_v61, %s1854_s21 }
0x11ce   :  { %v984_v0 = vpop.permute.xlu1 %983 }
0x11cf   :  { %v986_v1 = vadd.f32 %v984_v0, %v976_v63 }
0x11d1   :  { %1793 = vtanh.f32 %v986_v1  ;;  %999 = vrot.lane.b32.xlu1 %v986_v1, %s1855_s22 }
0x11d7   :  { %v1794_v2 = vpop.eup %1793 }
0x11d8   :  { %989 = vrot.lane.b32.xlu2 %v1794_v2, %s1853_s18 }
0x1232   :  { %v990_v3 = vpop.permute.xlu2 %989 }
0x1233   :  { %v992_v4 = vmul.f32 %v990_v3, %v969_v60 }
0x1235   :  { %994 = vrot.lane.b32.xlu0 %v992_v4, %s1854_s21 }
0x1243   :  { %v1000_v5 = vpop.permute.xlu1 %999 }
0x1244   :  { %1663 = vst.msk [vmem:[%s2433_s11 + $0x8] sm:$0xff] %vm42_vm0, %v1000_v5 }
0x124b   :  { %v1665_v6 = vld [vmem:[%s2433_s11 + $0x8] sm:$0xff] }
0x124c   :  { %1046 = vrot.lane.b32.xlu0 %v1665_v6, %s1854_s21 }
0x12a7   :  { %v995_v7 = vpop.permute.xlu0 %994 }
0x12a8   :  { %1662 = vst.msk [vmem:[%s2430_s10 + $0x8] sm:$0xff] %vm42_vm0, %v995_v7 }
0x12a9   :  { %1003 = vst.msk [vmem:[#allocation3 + $0x8] sm:$0xff] %vm42_vm0, %v995_v7 }
0x12af   :  { %v1664_v9 = vld [vmem:[%s2430_s10 + $0x8] sm:$0xff] }
0x12b0   :  { %v1007_v10 = vpack.c.bf16 %v1664_v9, %v1664_v9 }
0x12b2   :  { %1666 = vmatmul.msk.bf16.vlgmr.msrb.gmra.mxu0 %vm42_vm0, %v1007_v10 }
0x12be   :  { %v1047_v36 = vpop.permute.xlu0 %1046 }
0x132f   :  { %v1020_v14 = vpop.f32.mrf.mxu0 }
0x1330   :  { %v1024_v15 = vadd.f32 %v1020_v14, %v822_v13 }
0x1332   :  { %1795 = vtanh.f32 %v1024_v15  ;;  %v1667_v18 = vmul.f32 -1.442695, %v1024_v15 }
0x1334   :  { %1797 = vpow2.f32 %v1667_v18  ;;  %v826_v18 = vpop.f32.mrf.mxu3 }
0x1337   :  { %v1022_v16 = vpop.f32.mrf.mxu0 }
0x1338   :  { %v1796_v17 = vpop.eup %1795 }
0x1339   :  { %1051 = vrot.lane.b32.xlu2 %v1796_v17, %s1853_s18 }
0x133a   :  { %v1798_v19 = vpop.eup %1797 }
0x133b   :  { %v1028_v20 = vadd.f32 1.0, %v1798_v19  ;;  %v827_v19 = vadd.f32 %v2172_v43, %v826_v18 }
0x133d   :  { %1799 = vrcp.f32 %v1028_v20  ;;  %v1040_v29 = vand.u32 2147483648, %v1028_v20  ;;  %vm1034_vm8 = vweird.f32 %v1028_v20  ;;  %v1038_v30 = vand.u32 2147483647, %v1028_v20 }
0x133f   :  { %v1041_v32 = vor.u32 1.1754944e-38, %v1040_v29  ;;  %vm1039_vm10 = vcmp.eq.f32.partialorder %v1038_v30, 8.507059e+37 }
0x1343   :  { %v1800_v21 = vpop.eup %1799 }
0x1344   :  { %v1030_v22 = vmul.f32 %v1800_v21, %v1028_v20  ;;  %vm1035_vm7 = vweird.f32 %v1800_v21 }
0x1345   :  { %vm1036_vm9 = vmor %vm1034_vm8, %vm1035_vm7 }
0x1346   :  { %v1031_v23 = vsub.f32 1.0, %v1030_v22 }
0x1348   :  { %v1032_v24 = vmul.f32 %v1800_v21, %v1031_v23 }
0x134a   :  { %v1033_v26 = vadd.f32 %v1800_v21, %v1032_v24 }
0x134c   :  { %v1037_v31 = vsel %vm1036_vm9, %v1800_v21, %v1033_v26 }
0x134d   :  { %v1042_v34 = vsel %vm1039_vm10, %v1041_v32, %v1037_v31 }
0x134e   :  { %v1049_v37 = vmul.f32 %v1047_v36, %v1042_v34 }
0x1393   :  { %v1052_v33 = vpop.permute.xlu2 %1051 }
0x1394   :  { %v1054_v35 = vmul.f32 %v1052_v33, %v1042_v34 }
0x1396   :  { %1056 = vrot.lane.b32.xlu1 %v1054_v35, %s1854_s21 }
0x1408   :  { %v1057_v38 = vpop.permute.xlu1 %1056 }
0x1409   :  { %v1059_v39 = vadd.f32 %v1057_v38, %v1049_v37 }
0x140b   :  { %1801 = vtanh.f32 %v1059_v39  ;;  %1072 = vrot.lane.b32.xlu1 %v1059_v39, %s1855_s22 }
0x1411   :  { %v1802_v40 = vpop.eup %1801 }
0x1412   :  { %1062 = vrot.lane.b32.xlu2 %v1802_v40, %s1853_s18 }
0x146c   :  { %v1063_v42 = vpop.permute.xlu2 %1062 }
0x146d   :  { %v1065_v44 = vmul.f32 %v1063_v42, %v1042_v34 }
0x146f   :  { %1067 = vrot.lane.b32.xlu0 %v1065_v44, %s1854_s21 }
0x147d   :  { %v1073_v45 = vpop.permute.xlu1 %1072 }
0x147e   :  { %1669 = vst.msk [vmem:[%s2433_s11 + $0x8] sm:$0xff] %vm42_vm0, %v1073_v45 }
0x1485   :  { %v1671_v46 = vld [vmem:[%s2433_s11 + $0x8] sm:$0xff] }
0x1486   :  { %1119 = vrot.lane.b32.xlu0 %v1671_v46, %s1854_s21 }
0x14e1   :  { %v1068_v47 = vpop.permute.xlu0 %1067 }
0x14e2   :  { %1668 = vst.msk [vmem:[%s2430_s10 + $0x8] sm:$0xff] %vm42_vm0, %v1068_v47 }
0x14e3   :  { %1076 = vst.msk [vmem:[#allocation3 + $0x10] sm:$0xff] %vm42_vm0, %v1068_v47 }
0x14e9   :  { %v1670_v48 = vld [vmem:[%s2430_s10 + $0x8] sm:$0xff] }
0x14ea   :  { %v1080_v8 = vpack.c.bf16 %v1670_v48, %v1670_v48  ;;  %v1851_v48 = vld [vmem:[%s2431_s3] ss:$0 sm:$0xff] }
0x14ec   :  { %1672 = vmatmul.msk.bf16.vlgmr.msra.gmra.mxu1 %vm42_vm0, %v1080_v8  ;;  %v143_v8 = vadd.f32 %v1851_v48, %v2245_v11  ;;  %v769_v48 = vld [vmem:[#allocation3 + $0x30] sm:$0xff] }
0x14ee   :  { %v709_v49 = vadd.f32 %v2220_v41, %v143_v8 }
0x14f0   :  { %v1631_v41 = vmul.f32 -1.442695, %v709_v49 }
0x14f8   :  { %v1120_v4 = vpop.permute.xlu0 %1119 }
0x1569   :  { %v1093_v51 = vpop.f32.mrf.mxu1 }
0x156a   :  { %v1097_v27 = vadd.f32 %v1093_v51, %v824_v50 }
0x156c   :  { %1803 = vtanh.f32 %v1097_v27  ;;  %v1673_v53 = vmul.f32 -1.442695, %v1097_v27 }
0x156e   :  { %1805 = vpow2.f32 %v1673_v53 }
0x1571   :  { %v1095_v28 = vpop.f32.mrf.mxu1 }
0x1572   :  { %v1804_v52 = vpop.eup %1803 }
0x1573   :  { %1124 = vrot.lane.b32.xlu2 %v1804_v52, %s1853_s18 }
0x1574   :  { %v1806_v54 = vpop.eup %1805 }
0x1575   :  { %v1101_v55 = vadd.f32 1.0, %v1806_v54 }
0x1577   :  { %1807 = vrcp.f32 %v1101_v55  ;;  %v1113_v61 = vand.u32 2147483648, %v1101_v55  ;;  %vm1107_vm12 = vweird.f32 %v1101_v55  ;;  %v1111_v62 = vand.u32 2147483647, %v1101_v55 }
0x1579   :  { %v1114_v0 = vor.u32 1.1754944e-38, %v1113_v61  ;;  %vm1112_vm14 = vcmp.eq.f32.partialorder %v1111_v62, 8.507059e+37 }
0x157d   :  { %v1808_v56 = vpop.eup %1807 }
0x157e   :  { %v1103_v57 = vmul.f32 %v1808_v56, %v1101_v55  ;;  %vm1108_vm11 = vweird.f32 %v1808_v56 }
0x157f   :  { %vm1109_vm13 = vmor %vm1107_vm12, %vm1108_vm11 }
0x1580   :  { %v1104_v58 = vsub.f32 1.0, %v1103_v57 }
0x1582   :  { %v1105_v59 = vmul.f32 %v1808_v56, %v1104_v58 }
0x1584   :  { %v1106_v60 = vadd.f32 %v1808_v56, %v1105_v59 }
0x1586   :  { %v1110_v63 = vsel %vm1109_vm13, %v1808_v56, %v1106_v60 }
0x1587   :  { %v1115_v2 = vsel %vm1112_vm14, %v1114_v0, %v1110_v63 }
0x1588   :  { %v1122_v5 = vmul.f32 %v1120_v4, %v1115_v2 }
0x15cd   :  { %v1125_v1 = vpop.permute.xlu2 %1124 }
0x15ce   :  { %v1127_v3 = vmul.f32 %v1125_v1, %v1115_v2 }
0x15d0   :  { %1129 = vrot.lane.b32.xlu1 %v1127_v3, %s1854_s21 }
0x1642   :  { %v1130_v6 = vpop.permute.xlu1 %1129 }
0x1643   :  { %v1132_v7 = vadd.f32 %v1130_v6, %v1122_v5 }
0x1645   :  { %1809 = vtanh.f32 %v1132_v7  ;;  %1145 = vrot.lane.b32.xlu1 %v1132_v7, %s1855_s22 }
0x164b   :  { %v1810_v9 = vpop.eup %1809 }
0x164c   :  { %1135 = vrot.lane.b32.xlu2 %v1810_v9, %s1853_s18 }
0x16a6   :  { %v1136_v10 = vpop.permute.xlu2 %1135 }
0x16a7   :  { %v1138_v12 = vmul.f32 %v1136_v10, %v1115_v2 }
0x16a9   :  { %1140 = vrot.lane.b32.xlu0 %v1138_v12, %s1854_s21 }
0x16b7   :  { %v1146_v13 = vpop.permute.xlu1 %1145 }
0x16b8   :  { %1675 = vst.msk [vmem:[%s2433_s11 + $0x8] sm:$0xff] %vm42_vm0, %v1146_v13  ;;  %v828_v13 = vpop.f32.mrf.mxu3 }
0x16bf   :  { %v1677_v14 = vld [vmem:[%s2433_s11 + $0x8] sm:$0xff] }
0x16c0   :  { %1192 = vrot.lane.b32.xlu0 %v1677_v14, %s1854_s21  ;;  %v829_v14 = vadd.f32 %v2172_v43, %v828_v13 }
0x171b   :  { %v1141_v15 = vpop.permute.xlu0 %1140 }
0x171c   :  { %1674 = vst.msk [vmem:[%s2430_s10 + $0x8] sm:$0xff] %vm42_vm0, %v1141_v15 }
0x171d   :  { %1149 = vst.msk [vmem:[#allocation3 + $0x18] sm:$0xff] %vm42_vm0, %v1141_v15 }
0x1723   :  { %v1676_v16 = vld [vmem:[%s2430_s10 + $0x8] sm:$0xff] }
0x1724   :  { %v1153_v17 = vpack.c.bf16 %v1676_v16, %v1676_v16 }
0x1726   :  { %1678 = vmatmul.msk.bf16.vlgmr.msra.gmra.mxu2 %vm42_vm0, %v1153_v17 }
0x1732   :  { %v1193_v44 = vpop.permute.xlu0 %1192 }
0x17a9   :  { %v1166_v20 = vpop.f32.mrf.mxu2 }
0x17aa   :  { %v1170_v21 = vadd.f32 %v1166_v20, %v827_v19 }
0x17ac   :  { %1811 = vtanh.f32 %v1170_v21  ;;  %v1679_v24 = vmul.f32 -1.442695, %v1170_v21 }
0x17ae   :  { %1813 = vpow2.f32 %v1679_v24 }
0x17b1   :  { %v1168_v22 = vpop.f32.mrf.mxu2 }
0x17b2   :  { %v1812_v23 = vpop.eup %1811 }
0x17b3   :  { %1197 = vrot.lane.b32.xlu2 %v1812_v23, %s1853_s18 }
0x17b4   :  { %v1814_v26 = vpop.eup %1813 }
0x17b5   :  { %v1174_v29 = vadd.f32 1.0, %v1814_v26 }
0x17b7   :  { %1815 = vrcp.f32 %v1174_v29  ;;  %v1186_v35 = vand.u32 2147483648, %v1174_v29  ;;  %vm1180_vm1 = vweird.f32 %v1174_v29  ;;  %v1184_v36 = vand.u32 2147483647, %v1174_v29 }
0x17b9   :  { %v1187_v38 = vor.u32 1.1754944e-38, %v1186_v35  ;;  %vm1185_vm3 = vcmp.eq.f32.partialorder %v1184_v36, 8.507059e+37 }
0x17bd   :  { %v1816_v30 = vpop.eup %1815 }
0x17be   :  { %v1176_v31 = vmul.f32 %v1816_v30, %v1174_v29  ;;  %vm1181_vm15 = vweird.f32 %v1816_v30 }
0x17bf   :  { %vm1182_vm2 = vmor %vm1180_vm1, %vm1181_vm15 }
0x17c0   :  { %v1177_v32 = vsub.f32 1.0, %v1176_v31 }
0x17c2   :  { %v1178_v33 = vmul.f32 %v1816_v30, %v1177_v32 }
0x17c4   :  { %v1179_v34 = vadd.f32 %v1816_v30, %v1178_v33 }
0x17c6   :  { %v1183_v37 = vsel %vm1182_vm2, %v1816_v30, %v1179_v34 }
0x17c7   :  { %v1188_v40 = vsel %vm1185_vm3, %v1187_v38, %v1183_v37 }
0x17c8   :  { %v1195_v45 = vmul.f32 %v1193_v44, %v1188_v40 }
0x180d   :  { %v1198_v39 = vpop.permute.xlu2 %1197 }
0x180e   :  { %v1200_v42 = vmul.f32 %v1198_v39, %v1188_v40 }
0x1810   :  { %1202 = vrot.lane.b32.xlu1 %v1200_v42, %s1854_s21 }
0x1818   :  { %682 = vrot.lane.b32.xlu1 %v2182_v25, %s1855_s22 }
0x1882   :  { %v1203_v46 = vpop.permute.xlu1 %1202 }
0x1883   :  { %v1205_v47 = vadd.f32 %v1203_v46, %v1195_v45 }
0x1885   :  { %1817 = vtanh.f32 %v1205_v47 }
0x1886   :  { %1819 = vtanh.f32 %v709_v49 }
0x1887   :  { %1821 = vpow2.f32 %v1631_v41 }
0x188a   :  { %v683_v50 = vpop.permute.xlu1 %682 }
0x188b   :  { %v1818_v51 = vpop.eup %1817  ;;  %685 = vst.msk [vmem:[%s2433_s11] sm:$0xff] %vm42_vm0, %v683_v50 }
0x188c   :  { %1208 = vrot.lane.b32.xlu2 %v1818_v51, %s1853_s18  ;;  %v1820_v25 = vpop.eup %1819 }
0x188d   :  { %v1822_v11 = vpop.eup %1821 }
0x188e   :  { %v713_v28 = vadd.f32 1.0, %v1822_v11 }
0x1890   :  { %1823 = vrcp.f32 %v713_v28  ;;  %v725_v59 = vand.u32 2147483648, %v713_v28  ;;  %vm719_vm5 = vweird.f32 %v713_v28  ;;  %v723_v60 = vand.u32 2147483647, %v713_v28 }
0x1892   :  { %v689_v27 = vld [vmem:[%s2433_s11] sm:$0xff]  ;;  %v726_v62 = vor.u32 1.1754944e-38, %v725_v59  ;;  %vm724_vm7 = vcmp.eq.f32.partialorder %v723_v60, 8.507059e+37 }
0x1894   :  { %736 = vrot.lane.b32.xlu2 %v1820_v25, %s1853_s18 }
0x1896   :  { %v1824_v52 = vpop.eup %1823 }
0x1897   :  { %v715_v53 = vmul.f32 %v1824_v52, %v713_v28  ;;  %vm720_vm4 = vweird.f32 %v1824_v52 }
0x1898   :  { %vm721_vm6 = vmor %vm719_vm5, %vm720_vm4  ;;  %vm1519_vm5 = vcmask 1041409  }
0x1899   :  { %v716_v56 = vsub.f32 1.0, %v715_v53 }
0x189b   :  { %v717_v57 = vmul.f32 %v1824_v52, %v716_v56 }
0x189c   :  { %731 = vrot.lane.b32.xlu2 %v689_v27, %s1854_s21 }
0x189d   :  { %v718_v58 = vadd.f32 %v1824_v52, %v717_v57 }
0x189f   :  { %v722_v61 = vsel %vm721_vm6, %v1824_v52, %v718_v58  ;;  %vm1521_vm6 = vcmask 1042434  }
0x18a0   :  { %v727_v0 = vsel %vm724_vm7, %v726_v62, %v722_v61  ;;  %vm1523_vm7 = vcmask 1043459  }
0x18e6   :  { %v1209_v54 = vpop.permute.xlu2 %1208 }
0x18e7   :  { %v1211_v55 = vmul.f32 %v1209_v54, %v1188_v40 }
0x18e9   :  { %1213 = vrot.lane.b32.xlu0 %v1211_v55, %s1854_s21 }
0x18ee   :  { %v737_v63 = vpop.permute.xlu2 %736 }
0x18ef   :  { %v739_v1 = vmul.f32 %v737_v63, %v727_v0 }
0x18f1   :  { %1218 = vrot.lane.b32.xlu0 %v1205_v47, %s1855_s22 }
0x18f6   :  { %v732_v6 = vpop.permute.xlu2 %731 }
0x18f7   :  { %v734_v7 = vmul.f32 %v732_v6, %v727_v0 }
0x18f9   :  { %741 = vrot.lane.b32.xlu0 %v739_v1, %s1854_s21 }
0x195b   :  { %v1214_v2 = vpop.permute.xlu0 %1213 }
0x195c   :  { %1680 = vst.msk [vmem:[%s2430_s10 + $0x8] sm:$0xff] %vm42_vm0, %v1214_v2 }
0x195d   :  { %1222 = vst.msk [vmem:[#allocation3 + $0x20] sm:$0xff] %vm42_vm0, %v1214_v2 }
0x1963   :  { %v1219_v3 = vpop.permute.xlu0 %1218  ;;  %v1682_v4 = vld [vmem:[%s2430_s10 + $0x8] sm:$0xff] }
0x1964   :  { %1681 = vst.msk [vmem:[%s2433_s11 + $0x8] sm:$0xff] %vm42_vm0, %v1219_v3  ;;  %v1226_v5 = vpack.c.bf16 %v1682_v4, %v1682_v4 }
0x1966   :  { %1684 = vmatmul.msk.bf16.vlgmr.msra.gmra.mxu0 %vm42_vm0, %v1226_v5 }
0x196b   :  { %v742_v9 = vpop.permute.xlu0 %741  ;;  %v1683_v19 = vld [vmem:[%s2433_s11 + $0x8] sm:$0xff] }
0x196c   :  { %v2329_v10 = vadd.f32 %v742_v9, %v734_v7 }
0x196e   :  { %1825 = vtanh.f32 %v2329_v10 }
0x1974   :  { %v1826_v12 = vpop.eup %1825 }
0x1975   :  { %747 = vrot.lane.b32.xlu0 %v1826_v12, %s1853_s18 }
0x19e3   :  { %v1239_v15 = vpop.f32.mrf.mxu0 }
0x19e4   :  { %v1243_v16 = vadd.f32 %v1239_v15, %v829_v14 }
0x19e6   :  { %1827 = vtanh.f32 %v1243_v16  ;;  %v1685_v20 = vmul.f32 -1.442695, %v1243_v16 }
0x19e7   :  { %v748_v38 = vpop.permute.xlu0 %747 }
0x19e8   :  { %1829 = vpow2.f32 %v1685_v20  ;;  %v750_v39 = vmul.f32 %v748_v38, %v727_v0 }
0x19eb   :  { %v1241_v17 = vpop.f32.mrf.mxu0 }
0x19ec   :  { %v1828_v18 = vpop.eup %1827 }
0x19ed   :  { %1270 = vrot.lane.b32.xlu1 %v1828_v18, %s1853_s18 }
0x19ee   :  { %v1830_v21 = vpop.eup %1829 }
0x19ef   :  { %v1247_v22 = vadd.f32 1.0, %v1830_v21 }
0x19f1   :  { %1831 = vrcp.f32 %v1247_v22  ;;  %v1259_v31 = vand.u32 2147483648, %v1247_v22  ;;  %vm1253_vm9 = vweird.f32 %v1247_v22  ;;  %v1257_v32 = vand.u32 2147483647, %v1247_v22 }
0x19f3   :  { %v1260_v34 = vor.u32 1.1754944e-38, %v1259_v31  ;;  %vm1258_vm11 = vcmp.eq.f32.partialorder %v1257_v32, 8.507059e+37 }
0x19f5   :  { %1265 = vrot.lane.b32.xlu1 %v1683_v19, %s1854_s21 }
0x19f7   :  { %v1832_v23 = vpop.eup %1831 }
0x19f8   :  { %v1249_v24 = vmul.f32 %v1832_v23, %v1247_v22  ;;  %vm1254_vm8 = vweird.f32 %v1832_v23 }
0x19f9   :  { %vm1255_vm10 = vmor %vm1253_vm9, %vm1254_vm8  ;;  %vm1525_vm8 = vcmask 1044484   ;;  %vm1527_vm9 = vcmask 1045509  }
0x19fa   :  { %v1250_v26 = vsub.f32 1.0, %v1249_v24 }
0x19fc   :  { %v1251_v29 = vmul.f32 %v1832_v23, %v1250_v26 }
0x19fe   :  { %v1252_v30 = vadd.f32 %v1832_v23, %v1251_v29 }
0x1a00   :  { %v1256_v33 = vsel %vm1255_vm10, %v1832_v23, %v1252_v30  ;;  %vm1529_vm10 = vcmask 1046534  }
0x1a01   :  { %v1261_v36 = vsel %vm1258_vm11, %v1260_v34, %v1256_v33  ;;  %vm1531_vm11 = vcmask 1047559  }
0x1a5f   :  { %v1271_v35 = vpop.permute.xlu1 %1270 }
0x1a60   :  { %v1273_v37 = vmul.f32 %v1271_v35, %v1261_v36 }
0x1a62   :  { %1275 = vrot.lane.b32.xlu2 %v1273_v37, %s1854_s21 }
0x1a67   :  { %v1266_v40 = vpop.permute.xlu1 %1265 }
0x1a68   :  { %v1268_v42 = vmul.f32 %v1266_v40, %v1261_v36 }
0x1a6a   :  { %752 = vrot.lane.b32.xlu2 %v750_v39, %s1854_s21 }
0x1abc   :  { %v1276_v44 = vpop.permute.xlu2 %1275 }
0x1abd   :  { %v1278_v45 = vadd.f32 %v1276_v44, %v1268_v42 }
0x1abf   :  { %1833 = vtanh.f32 %v1278_v45 }
0x1ac4   :  { %v753_v46 = vpop.permute.xlu2 %752 }
0x1ac5   :  { %v1834_v47 = vpop.eup %1833  ;;  %755 = vst.msk [vmem:[%s2430_s10] sm:$0xff] %vm42_vm0, %v753_v46 }
0x1ac6   :  { %762 = vst.msk [vmem:[#allocation3 + $0x38] sm:$0xff] %vm42_vm0, %v753_v46  ;;  %1281 = vrot.lane.b32.xlu1 %v1834_v47, %s1853_s18 }
0x1acd   :  { %v770_v8 = vld [vmem:[#allocation3 + $0x38] sm:$0xff] }
0x1ace   :  { %1291 = vrot.lane.b32.xlu1 %v1278_v45, %s1855_s22  ;;  %v774_v49 = vpack.c.bf16 %v770_v8, %v769_v48  ;;  %v1721_v8 = vld [vmem:[%s2437_s7] ss:$0 sm:$0xff] }
0x1ad0   :  { %1643 = vmatmul.msk.bf16.gmra.mxu3 %vm42_vm0, %v774_v49  ;;  %v1442_v49 = vld [vmem:[#allocation3] sm:$0xff] }
0x1b38   :  { %v1282_v50 = vpop.permute.xlu1 %1281 }
0x1b39   :  { %v1284_v51 = vmul.f32 %v1282_v50, %v1261_v36  ;;  %v1454_v50 = vmul.f32 %v1721_v8, %v1442_v49 }
0x1b3b   :  { %1286 = vrot.lane.b32.xlu0 %v1284_v51, %s1854_s21  ;;  %v1462_v51 = vsel %vm42_vm0, %v1454_v50, 0.0 }
0x1b40   :  { %v1292_v25 = vpop.permute.xlu1 %1291 }
0x1b41   :  { %1687 = vst.msk [vmem:[%s2433_s11 + $0x8] sm:$0xff] %vm42_vm0, %v1292_v25  ;;  %v1445_v25 = vld [vmem:[#allocation3 + $0x18] sm:$0xff] }
0x1b48   :  { %v1689_v27 = vld [vmem:[%s2433_s11 + $0x8] sm:$0xff] }
0x1b49   :  { %1338 = vrot.lane.b32.xlu0 %v1689_v27, %s1854_s21  ;;  %v1457_v27 = vmul.f32 %v1721_v8, %v1445_v25 }
0x1b53   :  { %v831_v52 = vpop.f32.mrf.mxu3 }
0x1b54   :  { %v832_v53 = vadd.f32 %v2172_v43, %v831_v52 }
0x1b5b   :  { %v833_v24 = vpop.f32.mrf.mxu3 }
0x1b5c   :  { %v834_v26 = vadd.f32 %v2172_v43, %v833_v24 }
0x1bad   :  { %v1287_v41 = vpop.permute.xlu0 %1286 }
0x1bae   :  { %1686 = vst.msk [vmem:[%s2430_s10 + $0x8] sm:$0xff] %vm42_vm0, %v1287_v41 }
0x1baf   :  { %1295 = vst.msk [vmem:[#allocation3 + $0x28] sm:$0xff] %vm42_vm0, %v1287_v41  ;;  %v1471_v41 = vsel %vm42_vm0, %v1457_v27, 0.0 }
0x1bb5   :  { %v1688_v11 = vld [vmem:[%s2430_s10 + $0x8] sm:$0xff] }
0x1bb6   :  { %v1299_v28 = vpack.c.bf16 %v1688_v11, %v1688_v11  ;;  %v1447_v11 = vld [vmem:[#allocation3 + $0x28] sm:$0xff] }
0x1bb8   :  { %1690 = vmatmul.msk.bf16.vlgmr.msrb.gmra.mxu1 %vm42_vm0, %v1299_v28  ;;  %v1459_v28 = vmul.f32 %v1721_v8, %v1447_v11 }
0x1bba   :  { %v1477_v52 = vsel %vm42_vm0, %v1459_v28, 0.0 }
0x1bbb   :  { %v1339_v12 = vpop.permute.xlu0 %1338 }
0x1c35   :  { %v1312_v54 = vpop.f32.mrf.mxu1 }
0x1c36   :  { %v1316_v55 = vadd.f32 %v1312_v54, %v832_v53 }
0x1c38   :  { %1835 = vtanh.f32 %v1316_v55  ;;  %v1691_v58 = vmul.f32 -1.442695, %v1316_v55 }
0x1c3a   :  { %1837 = vpow2.f32 %v1691_v58  ;;  %v17_v58 = vstv %s2438_s8 }
0x1c3b   :  { %18 = vst [vmem:[#allocation4] sm:$0x1] %v17_v58 }
0x1c3d   :  { %v1314_v56 = vpop.f32.mrf.mxu1 }
0x1c3e   :  { %v1836_v57 = vpop.eup %1835 }
0x1c3f   :  { %1343 = vrot.lane.b32.xlu2 %v1836_v57, %s1853_s18 }
0x1c40   :  { %v1838_v59 = vpop.eup %1837 }
0x1c41   :  { %v1320_v60 = vadd.f32 1.0, %v1838_v59  ;;  %v1856_v59 = vmov 0  }
0x1c42   :  { %1717 = vset.pattern.permute.xlu2 %v1856_v59  ;;  %1718 = vset.pattern.permute.xlu0 %v1856_v59 }
0x1c43   :  { %1839 = vrcp.f32 %v1320_v60  ;;  %v1332_v2 = vand.u32 2147483648, %v1320_v60  ;;  %vm1326_vm13 = vweird.f32 %v1320_v60  ;;  %v1330_v3 = vand.u32 2147483647, %v1320_v60 }
0x1c45   :  { %v1333_v5 = vor.u32 1.1754944e-38, %v1332_v2  ;;  %vm1331_vm15 = vcmp.eq.f32.partialorder %v1330_v3, 8.507059e+37  ;;  %v1444_v2 = vld [vmem:[#allocation3 + $0x10] sm:$0xff] }
0x1c46   :  { %v1456_v3 = vmul.f32 %v1721_v8, %v1444_v2 }
0x1c49   :  { %v1840_v61 = vpop.eup %1839 }
0x1c4a   :  { %v1322_v62 = vmul.f32 %v1840_v61, %v1320_v60  ;;  %vm1327_vm12 = vweird.f32 %v1840_v61  ;;  %v1443_v60 = vld [vmem:[#allocation3 + $0x8] sm:$0xff] }
0x1c4b   :  { %vm1328_vm14 = vmor %vm1326_vm13, %vm1327_vm12 }
0x1c4c   :  { %v1323_v63 = vsub.f32 1.0, %v1322_v62 }
0x1c4e   :  { %v1324_v0 = vmul.f32 %v1840_v61, %v1323_v63  ;;  %v1722_v63 = vld [vmem:[#allocation4] ss:$0 sm:$0xff] }
0x1c50   :  { %v1325_v1 = vadd.f32 %v1840_v61, %v1324_v0 }
0x1c52   :  { %v1329_v4 = vsel %vm1328_vm14, %v1840_v61, %v1325_v1  ;;  %v1455_v61 = vmul.f32 %v1721_v8, %v1443_v60 }
0x1c53   :  { %v1334_v7 = vsel %vm1331_vm15, %v1333_v5, %v1329_v4  ;;  %v1468_v4 = vsel %vm42_vm0, %v1456_v3, 0.0  ;;  %v1446_v5 = vld [vmem:[#allocation3 + $0x20] sm:$0xff] }
0x1c54   :  { %v1341_v13 = vmul.f32 %v1339_v12, %v1334_v7  ;;  %v1465_v62 = vsel %vm42_vm0, %v1455_v61, 0.0 }
0x1c99   :  { %v1344_v6 = vpop.permute.xlu2 %1343 }
0x1c9a   :  { %v1346_v9 = vmul.f32 %v1344_v6, %v1334_v7  ;;  %v1458_v6 = vmul.f32 %v1721_v8, %v1446_v5 }
0x1c9c   :  { %1348 = vrot.lane.b32.xlu1 %v1346_v9, %s1854_s21 }
0x1d0e   :  { %v1349_v14 = vpop.permute.xlu1 %1348 }
0x1d0f   :  { %v1351_v15 = vadd.f32 %v1349_v14, %v1341_v13 }
0x1d11   :  { %1841 = vtanh.f32 %v1351_v15  ;;  %1364 = vrot.lane.b32.xlu1 %v1351_v15, %s1855_s22 }
0x1d17   :  { %v1842_v16 = vpop.eup %1841 }
0x1d18   :  { %1354 = vrot.lane.b32.xlu2 %v1842_v16, %s1853_s18 }
0x1d72   :  { %v1355_v17 = vpop.permute.xlu2 %1354 }
0x1d73   :  { %v1357_v18 = vmul.f32 %v1355_v17, %v1334_v7  ;;  %v1474_v7 = vsel %vm42_vm0, %v1458_v6, 0.0 }
0x1d75   :  { %1359 = vrot.lane.b32.xlu0 %v1357_v18, %s1854_s21 }
0x1d83   :  { %v1365_v19 = vpop.permute.xlu1 %1364 }
0x1d84   :  { %1693 = vst.msk [vmem:[%s2433_s11 + $0x8] sm:$0xff] %vm42_vm0, %v1365_v19 }
0x1d8b   :  { %v1695_v20 = vld [vmem:[%s2433_s11 + $0x8] sm:$0xff] }
0x1d8c   :  { %1411 = vrot.lane.b32.xlu0 %v1695_v20, %s1854_s21  ;;  %v1509_v20 = vlaneseq }
0x1de7   :  { %v1360_v21 = vpop.permute.xlu0 %1359 }
0x1de8   :  { %1692 = vst.msk [vmem:[%s2430_s10 + $0x8] sm:$0xff] %vm42_vm0, %v1360_v21 }
0x1de9   :  { %1368 = vst.msk [vmem:[#allocation3 + $0x30] sm:$0xff] %vm42_vm0, %v1360_v21 }
0x1def   :  { %v1694_v22 = vld [vmem:[%s2430_s10 + $0x8] sm:$0xff] }
0x1df0   :  { %v1372_v23 = vpack.c.bf16 %v1694_v22, %v1694_v22  ;;  %v1448_v9 = vld [vmem:[#allocation3 + $0x30] sm:$0xff]  ;;  %v1510_v22 = vand.u32 127, %v1509_v20 }
0x1df1   :  { %v1460_v12 = vmul.f32 %v1721_v8, %v1448_v9 }
0x1df2   :  { %1696 = vmatmul.msk.bf16.vlgmr.msrb.gmra.mxu2 %vm42_vm0, %v1372_v23 }
0x1df3   :  { %v1480_v13 = vsel %vm42_vm0, %v1460_v12, 0.0 }
0x1dfe   :  { %v1412_v53 = vpop.permute.xlu0 %1411 }
0x1e75   :  { %v1385_v29 = vpop.f32.mrf.mxu2 }
0x1e76   :  { %v1389_v30 = vadd.f32 %v1385_v29, %v834_v26 }
0x1e78   :  { %1843 = vtanh.f32 %v1389_v30  ;;  %v1697_v33 = vmul.f32 -1.442695, %v1389_v30 }
0x1e7a   :  { %1845 = vpow2.f32 %v1697_v33 }
0x1e7d   :  { %v1387_v31 = vpop.f32.mrf.mxu2 }
0x1e7e   :  { %v1844_v32 = vpop.eup %1843 }
0x1e7f   :  { %1416 = vrot.lane.b32.xlu2 %v1844_v32, %s1853_s18 }
0x1e80   :  { %v1846_v34 = vpop.eup %1845 }
0x1e81   :  { %v1393_v35 = vadd.f32 1.0, %v1846_v34 }
0x1e83   :  { %1847 = vrcp.f32 %v1393_v35  ;;  %v1405_v42 = vand.u32 2147483648, %v1393_v35  ;;  %vm1399_vm2 = vweird.f32 %v1393_v35  ;;  %v1403_v43 = vand.u32 2147483647, %v1393_v35 }
0x1e85   :  { %v1406_v45 = vor.u32 1.1754944e-38, %v1405_v42  ;;  %vm1404_vm4 = vcmp.eq.f32.partialorder %v1403_v43, 8.507059e+37 }
0x1e89   :  { %v1848_v36 = vpop.eup %1847 }
0x1e8a   :  { %v1395_v37 = vmul.f32 %v1848_v36, %v1393_v35  ;;  %vm1400_vm1 = vweird.f32 %v1848_v36 }
0x1e8b   :  { %vm1401_vm3 = vmor %vm1399_vm2, %vm1400_vm1 }
0x1e8c   :  { %v1396_v38 = vsub.f32 1.0, %v1395_v37 }
0x1e8e   :  { %v1397_v39 = vmul.f32 %v1848_v36, %v1396_v38 }
0x1e90   :  { %v1398_v40 = vadd.f32 %v1848_v36, %v1397_v39 }
0x1e92   :  { %v1402_v44 = vsel %vm1401_vm3, %v1848_v36, %v1398_v40 }
0x1e93   :  { %v1407_v47 = vsel %vm1404_vm4, %v1406_v45, %v1402_v44 }
0x1e94   :  { %v1414_v54 = vmul.f32 %v1412_v53, %v1407_v47 }
0x1ed9   :  { %v1417_v46 = vpop.permute.xlu2 %1416 }
0x1eda   :  { %v1419_v48 = vmul.f32 %v1417_v46, %v1407_v47 }
0x1edc   :  { %1421 = vrot.lane.b32.xlu1 %v1419_v48, %s1854_s21 }
0x1f06   :  { %1463 = vadd.xlane.f32.xlu1 %v1462_v51 }
0x1f0e   :  { %1472 = vadd.xlane.f32.xlu1 %v1471_v41 }
0x1f16   :  { %1478 = vadd.xlane.f32.xlu1 %v1477_v52 }
0x1f4e   :  { %v1422_v55 = vpop.permute.xlu1 %1421 }
0x1f4f   :  { %v1424_v56 = vadd.f32 %v1422_v55, %v1414_v54 }
0x1f51   :  { %1849 = vtanh.f32 %v1424_v56 }
0x1f57   :  { %v1850_v57 = vpop.eup %1849 }
0x1f58   :  { %1427 = vrot.lane.b32.xlu2 %v1850_v57, %s1853_s18 }
0x1f79   :  { %v1464_v21 = vpop.xlane.xlu1 %1463 }
0x1f81   :  { %1466 = vadd.xlane.f32.xlu2 %v1465_v62  ;;  %v1473_v38 = vpop.xlane.xlu1 %1472 }
0x1f89   :  { %v1479_v39 = vpop.xlane.xlu1 %1478 }
0x1f99   :  { %1490 = vperm.xlu2 %1717, %v1722_v63  }
0x1fa1   :  { %757 = vrot.lane.b32.xlu2 %v2329_v10, %s1855_s22 }
0x1fb2   :  { %v1428_v0 = vpop.permute.xlu2 %1427 }
0x1fb3   :  { %v1430_v1 = vmul.f32 %v1428_v0, %v1407_v47 }
0x1fb5   :  { %1432 = vrot.lane.b32.xlu0 %v1430_v1, %s1854_s21 }
0x1fdf   :  { %1469 = vadd.xlane.f32.xlu0 %v1468_v4 }
0x1fe7   :  { %1475 = vadd.xlane.f32.xlu0 %v1474_v7 }
0x1fef   :  { %1481 = vadd.xlane.f32.xlu0 %v1480_v13 }
0x1ff4   :  { %v1467_v10 = vpop.xlane.xlu2 %1466 }
0x1ffc   :  { %v1491_v14 = vpop.permute.xlu2 %1490 }
0x1ffd   :  { %v1493_v23 = vadd.f32 %v1491_v14, %v1464_v21  ;;  %v1494_v24 = vadd.f32 %v1491_v14, %v1467_v10  ;;  %v1496_v42 = vadd.f32 %v1491_v14, %v1473_v38  ;;  %v1498_v46 = vadd.f32 %v1491_v14, %v1479_v39 }
0x1fff   :  { %v1511_v29 = vperm.slane %v1493_v23, %v1510_v22  ;;  %v1512_v30 = vperm.slane %v1494_v24, %v1510_v22  ;;  %v1514_v45 = vperm.slane %v1496_v42, %v1510_v22  ;;  %v1516_v51 = vperm.slane %v1498_v46, %v1510_v22 }
0x2001   :  { %v1520_v33 = vsel %vm1519_vm5, %v1512_v30, %v1511_v29 }
0x2003   :  { %1437 = vrot.lane.b32.xlu0 %v1424_v56, %s1855_s22 }
0x2004   :  { %v758_v15 = vpop.permute.xlu2 %757 }
0x2005   :  { %760 = vst.msk [vmem:[%s2433_s11] sm:$0xff] %vm42_vm0, %v758_v15 }
0x2027   :  { %v1433_v16 = vpop.permute.xlu0 %1432 }
0x2028   :  { %1698 = vst.msk [vmem:[%s2430_s10 + $0x8] sm:$0xff] %vm42_vm0, %v1433_v16 }
0x2029   :  { %1441 = vst.msk [vmem:[#allocation3 + $0x38] sm:$0xff] %vm42_vm0, %v1433_v16 }
0x2030   :  { %v1449_v17 = vld [vmem:[#allocation3 + $0x38] sm:$0xff] }
0x2031   :  { %v1461_v18 = vmul.f32 %v1721_v8, %v1449_v17 }
0x2033   :  { %v1483_v19 = vsel %vm42_vm0, %v1461_v18, 0.0 }
0x2034   :  { %1484 = vadd.xlane.f32.xlu1 %v1483_v19 }
0x2052   :  { %v1470_v26 = vpop.xlane.xlu0 %1469 }
0x2053   :  { %v1495_v31 = vadd.f32 %v1491_v14, %v1470_v26 }
0x2055   :  { %v1513_v32 = vperm.slane %v1495_v31, %v1510_v22 }
0x2057   :  { %v1522_v34 = vsel %vm1521_vm6, %v1513_v32, %v1520_v33 }
0x2058   :  { %v1524_v47 = vsel %vm1523_vm7, %v1514_v45, %v1522_v34 }
0x205a   :  { %v1476_v35 = vpop.xlane.xlu0 %1475 }
0x205b   :  { %v1497_v40 = vadd.f32 %v1491_v14, %v1476_v35 }
0x205d   :  { %v1515_v43 = vperm.slane %v1497_v40, %v1510_v22 }
0x205f   :  { %v1526_v48 = vsel %vm1525_vm8, %v1515_v43, %v1524_v47 }
0x2060   :  { %v1528_v27 = vsel %vm1527_vm9, %v1516_v51, %v1526_v48 }
0x2062   :  { %v1482_v36 = vpop.xlane.xlu0 %1481 }
0x2063   :  { %v1499_v44 = vadd.f32 %v1491_v14, %v1482_v36 }
0x2065   :  { %v1517_v8 = vperm.slane %v1499_v44, %v1510_v22 }
0x2067   :  { %v1530_v41 = vsel %vm1529_vm10, %v1517_v8, %v1528_v27 }
0x2075   :  { %v1438_v37 = vpop.permute.xlu0 %1437 }
0x2076   :  { %1699 = vst.msk [vmem:[%s2433_s11 + $0x8] sm:$0xff] %vm42_vm0, %v1438_v37  ;;  %vm1566_vm0 = vcmask 64512  }
0x20a7   :  { %v1485_v49 = vpop.xlane.xlu1 %1484 }
0x20a8   :  { %v1500_v50 = vadd.f32 %v1491_v14, %v1485_v49 }
0x20aa   :  { %v1518_v25 = vperm.slane %v1500_v50, %v1510_v22 }
0x20ac   :  { %v1532_v11 = vsel %vm1531_vm11, %v1518_v25, %v1530_v41 }
0x20ad   :  { %1534 = vxpose.xlu1.b32.start.end [1/1] (short) (narrow) %v1532_v11, 8 }
0x2151   :  { %v1550_v28 = vpop.trf.xlu1 }
0x2152   :  { %1567 = vst.msk [vmem:[%s2439_s9] sm:$0xff] %vm1566_vm0, %v1550_v28 }

</bundles_post_ra>
